<compile_context>
chip_gen: v6e
topology: v6e:2x2x1
jax: 0.10.0
libtpu: 0.0.40
codegen_flags: <defaults>
</compile_context>

<pallas_src>
import numpy as np
import jax
import jax.numpy as jnp
from jax.experimental import pallas as pl
from jax.experimental.pallas import tpu as pltpu


# ----------------------------- in-kernel GRU cell ----------------------------

def _gru_cell(h, gi, wh_ref, b_hn):
    """One GRU update with a single fused (H, 3H) hidden matmul.

    h      : (B, H)  f32 current hidden state
    gi     : (B, 3H) f32 hoisted input projection (+ folded r/z/n input biases)
    wh_ref : (H, 3H) bf16 stacked hidden weights, gate order (r, z, n)
    b_hn   : (1, H)  f32 hidden-side bias of the n gate (PyTorch GRU semantics)
    """
    H = h.shape[-1]
    gh = jnp.dot(h.astype(jnp.bfloat16), wh_ref[...],
                 preferred_element_type=jnp.float32)             # (B, 3H)
    r = jax.nn.sigmoid(gi[:, 0 * H:1 * H] + gh[:, 0 * H:1 * H])
    z = jax.nn.sigmoid(gi[:, 1 * H:2 * H] + gh[:, 1 * H:2 * H])
    n = jnp.tanh(gi[:, 2 * H:3 * H] + r * (gh[:, 2 * H:3 * H] + b_hn))
    return (1.0 - z) * n + z * h


# ------------------------------ Pallas kernels ------------------------------

def _encoder_kernel(x_ref,                               # (T, B, F) f32
                    wi0_ref, wh0_ref, bi0_ref, bhn0_ref,  # encoder layer 0
                    wi1_ref, wh1_ref, bi1_ref, bhn1_ref,  # encoder layer 1
                    repw0_ref, repw1_ref, repb_ref,       # representation Linear
                    rep_ref,                              # out: (B, 4H) f32
                    h0_scr, h1_scr,                       # (B, H) f32
                    gi_scr,                               # (T, B, 3H) f32 (reused per layer)
                    seq0_scr):                            # (T, B, H) bf16 layer-0 outputs
    """Fused 2-layer unidirectional encoder GRU + representation Linear+Tanh."""
    T, B, F = x_ref.shape
    H = h0_scr.shape[-1]

    # ---- hoisted layer-0 input projections: one big (T*B, F) @ (F, 3H) ----
    x_flat = x_ref[...].reshape(T * B, F).astype(jnp.bfloat16)
    gi_scr[...] = (jnp.dot(x_flat, wi0_ref[...], preferred_element_type=jnp.float32)
                   + bi0_ref[...]).reshape(T, B, 3 * H)

    # ---- layer-0 recurrence: only h @ W_hh left inside the loop ----
    h0_scr[...] = jnp.zeros_like(h0_scr)
    b_hn0 = bhn0_ref[...]

    @pl.loop(0, T)
    def _layer0(t):
        h = _gru_cell(h0_scr[...], gi_scr[t], wh0_ref, b_hn0)
        h0_scr[...] = h
        seq0_scr[t] = h.astype(jnp.bfloat16)

    # ---- hoisted layer-1 input projections from the layer-0 sequence ----
    gi_scr[...] = (jnp.dot(seq0_scr[...].reshape(T * B, H), wi1_ref[...],
                           preferred_element_type=jnp.float32)
                   + bi1_ref[...]).reshape(T, B, 3 * H)

    # ---- layer-1 recurrence ----
    h1_scr[...] = jnp.zeros_like(h1_scr)
    b_hn1 = bhn1_ref[...]

    @pl.loop(0, T)
    def _layer1(t):
        h1_scr[...] = _gru_cell(h1_scr[...], gi_scr[t], wh1_ref, b_hn1)

    # representation = tanh([h_l0, h_l1] @ W_rep + b); W_rep split host-side so
    # the concat becomes a sum of two matmuls.
    rep = (jnp.dot(h0_scr[...].astype(jnp.bfloat16), repw0_ref[...],
                   preferred_element_type=jnp.float32)
           + jnp.dot(h1_scr[...].astype(jnp.bfloat16), repw1_ref[...],
                     preferred_element_type=jnp.float32)
           + repb_ref[...])
    rep_ref[...] = jnp.tanh(rep)


def _decoder_kernel(x_ref, rep_ref,
                    wi0f_ref, wh0f_ref, bi0f_ref, bhn0f_ref,   # layer 0 forward
                    wi0b_ref, wh0b_ref, bi0b_ref, bhn0b_ref,   # layer 0 backward
                    wi1fa_ref, wi1fb_ref, wh1f_ref, bi1f_ref, bhn1f_ref,  # layer 1 fwd
                    wi1ba_ref, wi1bb_ref, wh1b_ref, bi1b_ref, bhn1b_ref,  # layer 1 bwd
                    recwf_ref, recwb_ref, recb_ref,            # reconstruction Linear
                    out_ref,                                   # out: (T, B, F) f32 (time-flipped)
                    hf0_scr, hb0_scr, hf1_scr, hb1_scr,        # (B, H) f32
                    gif_scr, gib_scr,                          # (T, B, 3H) f32 (reused per layer)
                    seqf_scr, seqb_scr):                       # (T, B, H) bf16 (reused per layer)
    """Fused 2-layer bidirectional decoder GRU + reconstruction Linear+Tanh."""
    T, B, F = x_ref.shape
    H = hf0_scr.shape[-1]

    # decoder initial hidden = representation chunks [l0 fwd, l0 bwd, l1 fwd, l1 bwd]
    rep = rep_ref[...]
    hf0_scr[...] = rep[:, 0 * H:1 * H]
    hb0_scr[...] = rep[:, 1 * H:2 * H]
    hf1_scr[...] = rep[:, 2 * H:3 * H]
    hb1_scr[...] = rep[:, 3 * H:4 * H]

    # ---- hoisted layer-0 input projections for both directions ----
    # decoder_input[s] = x[T-s] for s>=1 and zeros for s==0, so the recurrence
    # only reads rows 1..T-1 (at flipped indices); row 0 is overwritten with the
    # bias-only (zero-input) projection => no per-step masking or bias adds.
    x_flat = x_ref[...].reshape(T * B, F).astype(jnp.bfloat16)
    gif_scr[...] = (jnp.dot(x_flat, wi0f_ref[...], preferred_element_type=jnp.float32)
                    + bi0f_ref[...]).reshape(T, B, 3 * H)
    gib_scr[...] = (jnp.dot(x_flat, wi0b_ref[...], preferred_element_type=jnp.float32)
                    + bi0b_ref[...]).reshape(T, B, 3 * H)
    gif_scr[0] = jnp.broadcast_to(bi0f_ref[...], (B, 3 * H))
    gib_scr[0] = jnp.broadcast_to(bi0b_ref[...], (B, 3 * H))

    # ---- layer 0: forward + backward directions share one time loop ----
    b_hn0f = bhn0f_ref[...]
    b_hn0b = bhn0b_ref[...]

    @pl.loop(0, T)
    def _layer0(t):
        idx_f = jnp.where(t == 0, 0, T - t)        # fwd dir, decoder time t
        idx_b = jnp.where(t == T - 1, 0, t + 1)    # bwd dir, decoder time T-1-t
        hf = _gru_cell(hf0_scr[...], gif_scr[idx_f], wh0f_ref, b_hn0f)
        hb = _gru_cell(hb0_scr[...], gib_scr[idx_b], wh0b_ref, b_hn0b)
        hf0_scr[...] = hf
        hb0_scr[...] = hb
        seqf_scr[t] = hf.astype(jnp.bfloat16)           # decoder-time order
        seqb_scr[T - 1 - t] = hb.astype(jnp.bfloat16)   # decoder-time order

    # ---- hoisted layer-1 input projections; the direction "concat" is the sum
    #      of two split matmuls (no concat materialized) ----
    l0f = seqf_scr[...].reshape(T * B, H)
    l0b = seqb_scr[...].reshape(T * B, H)
    gif_scr[...] = (jnp.dot(l0f, wi1fa_ref[...], preferred_element_type=jnp.float32)
                    + jnp.dot(l0b, wi1fb_ref[...], preferred_element_type=jnp.float32)
                    + bi1f_ref[...]).reshape(T, B, 3 * H)
    gib_scr[...] = (jnp.dot(l0f, wi1ba_ref[...], preferred_element_type=jnp.float32)
                    + jnp.dot(l0b, wi1bb_ref[...], preferred_element_type=jnp.float32)
                    + bi1b_ref[...]).reshape(T, B, 3 * H)

    # ---- layer 1: both directions in one loop; outputs stored already
    #      time-flipped (reconstruction.flip(1) folded into the store index).
    #      The layer-0 sequence buffers are dead here and are reused. ----
    b_hn1f = bhn1f_ref[...]
    b_hn1b = bhn1b_ref[...]

    @pl.loop(0, T)
    def _layer1(t):
        hf = _gru_cell(hf1_scr[...], gif_scr[t], wh1f_ref, b_hn1f)          # dec time t
        hb = _gru_cell(hb1_scr[...], gib_scr[T - 1 - t], wh1b_ref, b_hn1b)  # dec time T-1-t
        hf1_scr[...] = hf
        hb1_scr[...] = hb
        seqf_scr[T - 1 - t] = hf.astype(jnp.bfloat16)   # output-time order
        seqb_scr[t] = hb.astype(jnp.bfloat16)           # output-time order

    # ---- reconstruction = tanh(decoder_seq @ W_rec + b) over all T*B rows ----
    # TODO(synk): on v7x fold this matmul into _layer1 to drop the two (T,B,H)
    #             buffers entirely (64 MiB VMEM budget at larger T).
    af = seqf_scr[...].reshape(T * B, H)
    ab = seqb_scr[...].reshape(T * B, H)
    rec = (jnp.dot(af, recwf_ref[...], preferred_element_type=jnp.float32)
           + jnp.dot(ab, recwb_ref[...], preferred_element_type=jnp.float32)
           + recb_ref[...])
    out_ref[...] = jnp.tanh(rec).reshape(T, B, F)


# ------------------------------ Forward pass --------------------------------

def _nbytes(shape, dtype):
    return int(np.prod(shape)) * np.dtype(dtype).itemsize


def _vmem_limit(arg_arrays, extra_shapes_dtypes):
    total = sum(_nbytes(a.shape, a.dtype) for a in arg_arrays)
    total += sum(_nbytes(s, d) for s, d in extra_shapes_dtypes)
    # 2x headroom for compiler temporaries; cap below v7x's 64 MiB physical VMEM.
    return int(min(2 * total + (8 << 20), 64 << 20))


def forward(params, x):
    """Eval-mode forward. x: (B, T, F) f32.  Returns (reconstruction (B,T,F), representation (B,4H))."""
    B, T, F = x.shape
    H = params["enc_l0"][1].shape[0]
    # bf16 matmul LHS packs 16 sublanes; B is the only M dim in the recurrent matmuls.
    B_pad = max(16, ((B + 15) // 16) * 16)

    # one transpose in (batch-first -> time-major) + batch pad; all flips /
    # shifts / concats happen inside the kernels via index arithmetic.
    x_t = jnp.transpose(x, (1, 0, 2))
    if B_pad != B:
        x_t = jnp.pad(x_t, ((0, 0), (0, B_pad - B), (0, 0)))

    vmem = pl.BlockSpec(memory_space=pltpu.MemorySpace.VMEM)

    # ---------------- encoder (+ representation) ----------------
    wi0, wh0, bi0, bhn0 = params["enc_l0"]
    wi1, wh1, bi1, bhn1 = params["enc_l1"]
    repw = params["rep_w"]

    enc_args = (x_t, wi0, wh0, bi0, bhn0, wi1, wh1, bi1, bhn1,
                repw[:H], repw[H:], params["rep_b"])
    enc_extra = [((B_pad, 4 * H), jnp.float32),
                 ((B_pad, H), jnp.float32), ((B_pad, H), jnp.float32),
                 ((T, B_pad, 3 * H), jnp.float32),
                 ((T, B_pad, H), jnp.bfloat16)]
    rep_pad = pl.pallas_call(
        _encoder_kernel,
        out_shape=jax.ShapeDtypeStruct((B_pad, 4 * H), jnp.float32),
        in_specs=[vmem] * len(enc_args),
        out_specs=vmem,
        scratch_shapes=[pltpu.VMEM((B_pad, H), jnp.float32),
                        pltpu.VMEM((B_pad, H), jnp.float32),
                        pltpu.VMEM((T, B_pad, 3 * H), jnp.float32),
                        pltpu.VMEM((T, B_pad, H), jnp.bfloat16)],
        compiler_params=pltpu.CompilerParams(
            vmem_limit_bytes=_vmem_limit(enc_args, enc_extra)),
    )(*enc_args)

    # ---------------- decoder (+ reconstruction) ----------------
    wi0f, wh0f, bi0f, bhn0f = params["dec_l0_f"]
    wi0b, wh0b, bi0b, bhn0b = params["dec_l0_b"]
    wi1f, wh1f, bi1f, bhn1f = params["dec_l1_f"]
    wi1b, wh1b, bi1b, bhn1b = params["dec_l1_b"]
    recw = params["rec_w"]

    dec_args = (x_t, rep_pad,
                wi0f, wh0f, bi0f, bhn0f,
                wi0b, wh0b, bi0b, bhn0b,
                wi1f[:H], wi1f[H:], wh1f, bi1f, bhn1f,
                wi1b[:H], wi1b[H:], wh1b, bi1b, bhn1b,
                recw[:H], recw[H:], params["rec_b"])
    dec_extra = ([((T, B_pad, F), jnp.float32)]
                 + [((B_pad, H), jnp.float32)] * 4
                 + [((T, B_pad, 3 * H), jnp.float32)] * 2
                 + [((T, B_pad, H), jnp.bfloat16)] * 2)
    rec_t = pl.pallas_call(
        _decoder_kernel,
        out_shape=jax.ShapeDtypeStruct((T, B_pad, F), jnp.float32),
        in_specs=[vmem] * len(dec_args),
        out_specs=vmem,
        scratch_shapes=([pltpu.VMEM((B_pad, H), jnp.float32) for _ in range(4)]
                        + [pltpu.VMEM((T, B_pad, 3 * H), jnp.float32) for _ in range(2)]
                        + [pltpu.VMEM((T, B_pad, H), jnp.bfloat16) for _ in range(2)]),
        compiler_params=pltpu.CompilerParams(
            vmem_limit_bytes=_vmem_limit(dec_args, dec_extra)),
    )(*dec_args)

    reconstruction = jnp.transpose(rec_t, (1, 0, 2))[:B]   # time flip already folded in-kernel
    representation = rep_pad[:B]
    return reconstruction, representation


# --------------------------- pure-JAX reference -----------------------------
# Same bf16-matmul / f32-accumulate numerics so the check is tight.

def _gru_seq_ref(x_tbf, h0, wi, wh, bi, bhn, reverse=False):
    H = wh.shape[0]
    xs = x_tbf[::-1] if reverse else x_tbf

    def cell(h, xt):
        gi = jnp.dot(xt.astype(jnp.bfloat16), wi,
                     preferred_element_type=jnp.float32) + bi
        gh = jnp.dot(h.astype(jnp.bfloat16), wh,
                     preferred_element_type=jnp.float32)
        r = jax.nn.sigmoid(gi[:, :H] + gh[:, :H])
        z = jax.nn.sigmoid(gi[:, H:2 * H] + gh[:, H:2 * H])
        n = jnp.tanh(gi[:, 2 * H:] + r * (gh[:, 2 * H:] + bhn))
        hn = (1.0 - z) * n + z * h
        return hn, hn

    hT, seq = jax.lax.scan(cell, h0, xs)
    if reverse:
        seq = seq[::-1]
    return seq, hT


def forward_ref(params, x):
    B, T, F = x.shape
    H = params["enc_l0"][1].shape[0]
    x_t = jnp.transpose(x, (1, 0, 2))
    h0 = jnp.zeros((B, H), jnp.float32)

    seq0, h_l0 = _gru_seq_ref(x_t, h0, *params["enc_l0"])
    _, h_l1 = _gru_seq_ref(seq0, h0, *params["enc_l1"])
    enc_cat = jnp.concatenate([h_l0, h_l1], -1).astype(jnp.bfloat16)
    rep = jnp.tanh(jnp.dot(enc_cat, params["rep_w"],
                           preferred_element_type=jnp.float32) + params["rep_b"])

    dh = [rep[:, i * H:(i + 1) * H] for i in range(4)]
    targets = x[:, ::-1, :]
    dec_in = jnp.concatenate(
        [jnp.zeros((B, 1, F), jnp.float32), targets[:, :-1, :]], axis=1)
    dec_in_t = jnp.transpose(dec_in, (1, 0, 2))

    f0, _ = _gru_seq_ref(dec_in_t, dh[0], *params["dec_l0_f"])
    b0, _ = _gru_seq_ref(dec_in_t, dh[1], *params["dec_l0_b"], reverse=True)
    l0 = jnp.concatenate([f0, b0], -1)
    f1, _ = _gru_seq_ref(l0, dh[2], *params["dec_l1_f"])
    b1, _ = _gru_seq_ref(l0, dh[3], *params["dec_l1_b"], reverse=True)
    dec = jnp.concatenate([f1, b1], -1)                       # (T, B, 2H)

    dec_bt = jnp.transpose(dec, (1, 0, 2)).reshape(B * T, 2 * H).astype(jnp.bfloat16)
    rec = jnp.tanh(jnp.dot(dec_bt, params["rec_w"],
                           preferred_element_type=jnp.float32) + params["rec_b"])
    rec = rec.reshape(B, T, F)[:, ::-1, :]
    return rec, rep


# ------------------------------ Parameters -----------------------------------

def init_params(key, n_features, n_units):
    """Synthetic PyTorch-style U(-1/sqrt(fan), 1/sqrt(fan)) init.

    Gate-stacked layout (gate order r, z, n), weights pre-cast to bf16 once:
      wi  : (in, 3H) bf16      wh  : (H, 3H) bf16
      bi  : (1, 3H)  f32  = [b_ir+b_hr, b_iz+b_hz, b_in]
      bhn : (1, H)   f32  = b_hn
    """
    H = n_units
    keys = iter(jax.random.split(key, 64))

    def u(shape, scale):
        return jax.random.uniform(next(keys), shape, jnp.float32, -scale, scale)

    kg = 1.0 / np.sqrt(H)

    def gru(in_dim):
        wi = u((in_dim, 3 * H), kg)
        wh = u((H, 3 * H), kg)
        b_ih = u((1, 3 * H), kg)
        b_hh = u((1, 3 * H), kg)
        bi = jnp.concatenate([b_ih[:, :2 * H] + b_hh[:, :2 * H],
                              b_ih[:, 2 * H:]], axis=1)       # (1, 3H)
        bhn = b_hh[:, 2 * H:]                                 # (1, H)
        return wi.astype(jnp.bfloat16), wh.astype(jnp.bfloat16), bi, bhn

    params = {
        "enc_l0": gru(n_features),
        "enc_l1": gru(H),
        "dec_l0_f": gru(n_features),
        "dec_l0_b": gru(n_features),
        "dec_l1_f": gru(2 * H),
        "dec_l1_b": gru(2 * H),
    }
    kl = 1.0 / np.sqrt(2 * H)
    params["rep_w"] = u((2 * H, 4 * H), kl).astype(jnp.bfloat16)   # Linear(2H -> 4H), transposed
    params["rep_b"] = u((1, 4 * H), kl)
    params["rec_w"] = u((2 * H, n_features), kl).astype(jnp.bfloat16)  # Linear(2H -> F), transposed
    params["rec_b"] = u((1, n_features), kl)
    return params


# --------------------------------- Main --------------------------------------

if __name__ == "__main__":
    # Small but lane-aligned demo config: F and H multiples of 128 keep every
    # matmul, gate slice and output store lane-dense (realistic auDeep uses
    # F=128 mel bins, H=256 units).
    B, T, F, H = 2, 8, 128, 128

    key = jax.random.PRNGKey(0)
    pkey, xkey = jax.random.split(key)
    params = init_params(pkey, F, H)
    x = jax.random.normal(xkey, (B, T, F), jnp.float32)

    rec, rep = jax.jit(forward)(params, x)
    rec, rep = jax.block_until_ready((rec, rep))

    assert rec.shape == (B, T, F), rec.shape
    assert rep.shape == (B, 4 * H), rep.shape

    rec_ref, rep_ref = jax.jit(forward_ref)(params, x)
    np.testing.assert_allclose(np.asarray(rec), np.asarray(rec_ref),
                               rtol=2e-2, atol=2e-2)
    np.testing.assert_allclose(np.asarray(rep), np.asarray(rep_ref),
                               rtol=2e-2, atol=2e-2)

    print("KERNEL_OK")
</pallas_src>

<mosaic_0001>
module attributes {stable_mosaic.version = 11 : i64} {
  func.func @_encoder_kernel(%arg0: memref<8x16x128xf32, #tpu.memory_space<vmem>>, %arg1: memref<128x384xbf16, #tpu.memory_space<vmem>>, %arg2: memref<128x384xbf16, #tpu.memory_space<vmem>>, %arg3: memref<1x384xf32, #tpu.memory_space<vmem>>, %arg4: memref<1x128xf32, #tpu.memory_space<vmem>>, %arg5: memref<128x384xbf16, #tpu.memory_space<vmem>>, %arg6: memref<128x384xbf16, #tpu.memory_space<vmem>>, %arg7: memref<1x384xf32, #tpu.memory_space<vmem>>, %arg8: memref<1x128xf32, #tpu.memory_space<vmem>>, %arg9: memref<128x512xbf16, #tpu.memory_space<vmem>>, %arg10: memref<128x512xbf16, #tpu.memory_space<vmem>>, %arg11: memref<1x512xf32, #tpu.memory_space<vmem>>, %arg12: memref<16x512xf32, #tpu.memory_space<vmem>>, %arg13: memref<16x128xf32, #tpu.memory_space<vmem>>, %arg14: memref<16x128xf32, #tpu.memory_space<vmem>>, %arg15: memref<8x16x384xf32, #tpu.memory_space<vmem>>, %arg16: memref<8x16x128xbf16, #tpu.memory_space<vmem>>) attributes {dimension_semantics = [], scalar_prefetch = 0 : i64, scratch_operands = 4 : i64, tpu.core_type = #tpu.core_type<tc>} {
    %c0 = arith.constant 0 : index
    %c0_0 = arith.constant 0 : index
    %c0_1 = arith.constant 0 : index
    %0 = vector.load %arg0[%c0, %c0_0, %c0_1] : memref<8x16x128xf32, #tpu.memory_space<vmem>>, vector<8x16x128xf32>
    %1 = vector.shape_cast %0 : vector<8x16x128xf32> to vector<128x128xf32>
    %2 = arith.truncf %1 : vector<128x128xf32> to vector<128x128xbf16>
    %c0_2 = arith.constant 0 : index
    %c0_3 = arith.constant 0 : index
    %3 = vector.load %arg1[%c0_2, %c0_3] : memref<128x384xbf16, #tpu.memory_space<vmem>>, vector<128x384xbf16>
    %cst = arith.constant dense<0.000000e+00> : vector<128x384xf32>
    %4 = tpu.matmul %2, %3, %cst {dimension_numbers = #tpu.dot_dimension_numbers<[1], [0], [0], [1], [0, 0, 1, 1], [], []>} : vector<128x128xbf16>, vector<128x384xbf16>, vector<128x384xf32> -> vector<128x384xf32>
    %c0_4 = arith.constant 0 : index
    %c0_5 = arith.constant 0 : index
    %5 = vector.load %arg3[%c0_4, %c0_5] : memref<1x384xf32, #tpu.memory_space<vmem>>, vector<1x384xf32>
    %6 = vector.broadcast %5 : vector<1x384xf32> to vector<128x384xf32>
    %7 = arith.addf %4, %6 : vector<128x384xf32>
    %8 = vector.shape_cast %7 : vector<128x384xf32> to vector<8x16x384xf32>
    %c0_6 = arith.constant 0 : index
    %c0_7 = arith.constant 0 : index
    %c0_8 = arith.constant 0 : index
    %9 = vector.load %arg15[%c0_6, %c0_7, %c0_8] : memref<8x16x384xf32, #tpu.memory_space<vmem>>, vector<8x16x384xf32>
    tpu.vector_store %arg15[%c0_6, %c0_7, %c0_8], %8 {strides = array<i32>} : memref<8x16x384xf32, #tpu.memory_space<vmem>>, vector<8x16x384xf32>,
    %cst_9 = arith.constant 0.000000e+00 : f32
    %10 = vector.broadcast %cst_9 : f32 to vector<16x128xf32>
    %c0_10 = arith.constant 0 : index
    %c0_11 = arith.constant 0 : index
    %11 = vector.load %arg13[%c0_10, %c0_11] : memref<16x128xf32, #tpu.memory_space<vmem>>, vector<16x128xf32>
    tpu.vector_store %arg13[%c0_10, %c0_11], %10 {strides = array<i32>} : memref<16x128xf32, #tpu.memory_space<vmem>>, vector<16x128xf32>,
    %c0_12 = arith.constant 0 : index
    %c0_13 = arith.constant 0 : index
    %12 = vector.load %arg4[%c0_12, %c0_13] : memref<1x128xf32, #tpu.memory_space<vmem>>, vector<1x128xf32>
    %c0_i32 = arith.constant 0 : i32
    %c8_i32 = arith.constant 8 : i32
    %13 = arith.addi %c0_i32, %c8_i32 : i32
    %c1_i32 = arith.constant 1 : i32
    scf.for %arg17 = %c0_i32 to %13 step %c1_i32  : i32 {
      %c1_i32_49 = arith.constant 1 : i32
      %41 = arith.muli %arg17, %c1_i32_49 : i32
      %c0_i32_50 = arith.constant 0 : i32
      %42 = arith.addi %c0_i32_50, %41 : i32
      %c0_51 = arith.constant 0 : index
      %c0_52 = arith.constant 0 : index
      %43 = vector.load %arg13[%c0_51, %c0_52] : memref<16x128xf32, #tpu.memory_space<vmem>>, vector<16x128xf32>
      %44 = arith.index_cast %42 : i32 to index
      %c0_53 = arith.constant 0 : index
      %c0_54 = arith.constant 0 : index
      %45 = vector.load %arg15[%44, %c0_53, %c0_54] : memref<8x16x384xf32, #tpu.memory_space<vmem>>, vector<1x16x384xf32>
      %46 = vector.shape_cast %45 : vector<1x16x384xf32> to vector<16x384xf32>
      %47 = arith.truncf %43 : vector<16x128xf32> to vector<16x128xbf16>
      %c0_55 = arith.constant 0 : index
      %c0_56 = arith.constant 0 : index
      %48 = vector.load %arg2[%c0_55, %c0_56] : memref<128x384xbf16, #tpu.memory_space<vmem>>, vector<128x384xbf16>
      %cst_57 = arith.constant dense<0.000000e+00> : vector<16x384xf32>
      %49 = tpu.matmul %47, %48, %cst_57 {dimension_numbers = #tpu.dot_dimension_numbers<[1], [0], [0], [1], [0, 0, 1, 1], [], []>} : vector<16x128xbf16>, vector<128x384xbf16>, vector<16x384xf32> -> vector<16x384xf32>
      %50 = vector.extract_strided_slice %46 {offsets = [0, 0], sizes = [16, 128], strides = [1, 1]} : vector<16x384xf32> to vector<16x128xf32>
      %51 = vector.extract_strided_slice %49 {offsets = [0, 0], sizes = [16, 128], strides = [1, 1]} : vector<16x384xf32> to vector<16x128xf32>
      %52 = arith.addf %50, %51 : vector<16x128xf32>
      %53 = arith.negf %52 : vector<16x128xf32>
      %54 = math.exp %53 : vector<16x128xf32>
      %cst_58 = arith.constant 1.000000e+00 : f32
      %55 = vector.broadcast %cst_58 : f32 to vector<16x128xf32>
      %56 = arith.addf %55, %54 : vector<16x128xf32>
      %57 = arith.divf %55, %56 : vector<16x128xf32>
      %58 = vector.extract_strided_slice %46 {offsets = [0, 128], sizes = [16, 128], strides = [1, 1]} : vector<16x384xf32> to vector<16x128xf32>
      %59 = vector.extract_strided_slice %49 {offsets = [0, 128], sizes = [16, 128], strides = [1, 1]} : vector<16x384xf32> to vector<16x128xf32>
      %60 = arith.addf %58, %59 : vector<16x128xf32>
      %61 = arith.negf %60 : vector<16x128xf32>
      %62 = math.exp %61 : vector<16x128xf32>
      %cst_59 = arith.constant 1.000000e+00 : f32
      %63 = vector.broadcast %cst_59 : f32 to vector<16x128xf32>
      %64 = arith.addf %63, %62 : vector<16x128xf32>
      %65 = arith.divf %63, %64 : vector<16x128xf32>
      %66 = vector.extract_strided_slice %46 {offsets = [0, 256], sizes = [16, 128], strides = [1, 1]} : vector<16x384xf32> to vector<16x128xf32>
      %67 = vector.extract_strided_slice %49 {offsets = [0, 256], sizes = [16, 128], strides = [1, 1]} : vector<16x384xf32> to vector<16x128xf32>
      %68 = vector.broadcast %12 : vector<1x128xf32> to vector<16x128xf32>
      %69 = arith.addf %67, %68 : vector<16x128xf32>
      %70 = arith.mulf %57, %69 : vector<16x128xf32>
      %71 = arith.addf %66, %70 : vector<16x128xf32>
      %72 = math.tanh %71 : vector<16x128xf32>
      %cst_60 = arith.constant 1.000000e+00 : f32
      %73 = vector.broadcast %cst_60 : f32 to vector<16x128xf32>
      %74 = arith.subf %73, %65 : vector<16x128xf32>
      %75 = arith.mulf %74, %72 : vector<16x128xf32>
      %76 = arith.mulf %65, %43 : vector<16x128xf32>
      %77 = arith.addf %75, %76 : vector<16x128xf32>
      %c0_61 = arith.constant 0 : index
      %c0_62 = arith.constant 0 : index
      %78 = vector.load %arg13[%c0_61, %c0_62] : memref<16x128xf32, #tpu.memory_space<vmem>>, vector<16x128xf32>
      tpu.vector_store %arg13[%c0_61, %c0_62], %77 {strides = array<i32>} : memref<16x128xf32, #tpu.memory_space<vmem>>, vector<16x128xf32>,
      %79 = arith.truncf %77 : vector<16x128xf32> to vector<16x128xbf16>
      %80 = arith.index_cast %42 : i32 to index
      %c0_63 = arith.constant 0 : index
      %c0_64 = arith.constant 0 : index
      %81 = vector.load %arg16[%80, %c0_63, %c0_64] : memref<8x16x128xbf16, #tpu.memory_space<vmem>>, vector<1x16x128xbf16>
      %82 = vector.shape_cast %81 : vector<1x16x128xbf16> to vector<16x128xbf16>
      %83 = vector.shape_cast %79 : vector<16x128xbf16> to vector<1x16x128xbf16>
      tpu.vector_store %arg16[%80, %c0_63, %c0_64], %83 {strides = array<i32>} : memref<8x16x128xbf16, #tpu.memory_space<vmem>>, vector<1x16x128xbf16>,
    }
    %c8_i32_14 = arith.constant 8 : i32
    %c0_15 = arith.constant 0 : index
    %c0_16 = arith.constant 0 : index
    %c0_17 = arith.constant 0 : index
    %14 = vector.load %arg16[%c0_15, %c0_16, %c0_17] : memref<8x16x128xbf16, #tpu.memory_space<vmem>>, vector<8x16x128xbf16>
    %15 = vector.shape_cast %14 : vector<8x16x128xbf16> to vector<128x128xbf16>
    %c0_18 = arith.constant 0 : index
    %c0_19 = arith.constant 0 : index
    %16 = vector.load %arg5[%c0_18, %c0_19] : memref<128x384xbf16, #tpu.memory_space<vmem>>, vector<128x384xbf16>
    %cst_20 = arith.constant dense<0.000000e+00> : vector<128x384xf32>
    %17 = tpu.matmul %15, %16, %cst_20 {dimension_numbers = #tpu.dot_dimension_numbers<[1], [0], [0], [1], [0, 0, 1, 1], [], []>} : vector<128x128xbf16>, vector<128x384xbf16>, vector<128x384xf32> -> vector<128x384xf32>
    %c0_21 = arith.constant 0 : index
    %c0_22 = arith.constant 0 : index
    %18 = vector.load %arg7[%c0_21, %c0_22] : memref<1x384xf32, #tpu.memory_space<vmem>>, vector<1x384xf32>
    %19 = vector.broadcast %18 : vector<1x384xf32> to vector<128x384xf32>
    %20 = arith.addf %17, %19 : vector<128x384xf32>
    %21 = vector.shape_cast %20 : vector<128x384xf32> to vector<8x16x384xf32>
    %c0_23 = arith.constant 0 : index
    %c0_24 = arith.constant 0 : index
    %c0_25 = arith.constant 0 : index
    %22 = vector.load %arg15[%c0_23, %c0_24, %c0_25] : memref<8x16x384xf32, #tpu.memory_space<vmem>>, vector<8x16x384xf32>
    tpu.vector_store %arg15[%c0_23, %c0_24, %c0_25], %21 {strides = array<i32>} : memref<8x16x384xf32, #tpu.memory_space<vmem>>, vector<8x16x384xf32>,
    %cst_26 = arith.constant 0.000000e+00 : f32
    %23 = vector.broadcast %cst_26 : f32 to vector<16x128xf32>
    %c0_27 = arith.constant 0 : index
    %c0_28 = arith.constant 0 : index
    %24 = vector.load %arg14[%c0_27, %c0_28] : memref<16x128xf32, #tpu.memory_space<vmem>>, vector<16x128xf32>
    tpu.vector_store %arg14[%c0_27, %c0_28], %23 {strides = array<i32>} : memref<16x128xf32, #tpu.memory_space<vmem>>, vector<16x128xf32>,
    %c0_29 = arith.constant 0 : index
    %c0_30 = arith.constant 0 : index
    %25 = vector.load %arg8[%c0_29, %c0_30] : memref<1x128xf32, #tpu.memory_space<vmem>>, vector<1x128xf32>
    %c0_i32_31 = arith.constant 0 : i32
    %c8_i32_32 = arith.constant 8 : i32
    %26 = arith.addi %c0_i32_31, %c8_i32_32 : i32
    %c1_i32_33 = arith.constant 1 : i32
    scf.for %arg17 = %c0_i32_31 to %26 step %c1_i32_33  : i32 {
      %c1_i32_49 = arith.constant 1 : i32
      %41 = arith.muli %arg17, %c1_i32_49 : i32
      %c0_i32_50 = arith.constant 0 : i32
      %42 = arith.addi %c0_i32_50, %41 : i32
      %c0_51 = arith.constant 0 : index
      %c0_52 = arith.constant 0 : index
      %43 = vector.load %arg14[%c0_51, %c0_52] : memref<16x128xf32, #tpu.memory_space<vmem>>, vector<16x128xf32>
      %44 = arith.index_cast %42 : i32 to index
      %c0_53 = arith.constant 0 : index
      %c0_54 = arith.constant 0 : index
      %45 = vector.load %arg15[%44, %c0_53, %c0_54] : memref<8x16x384xf32, #tpu.memory_space<vmem>>, vector<1x16x384xf32>
      %46 = vector.shape_cast %45 : vector<1x16x384xf32> to vector<16x384xf32>
      %47 = arith.truncf %43 : vector<16x128xf32> to vector<16x128xbf16>
      %c0_55 = arith.constant 0 : index
      %c0_56 = arith.constant 0 : index
      %48 = vector.load %arg6[%c0_55, %c0_56] : memref<128x384xbf16, #tpu.memory_space<vmem>>, vector<128x384xbf16>
      %cst_57 = arith.constant dense<0.000000e+00> : vector<16x384xf32>
      %49 = tpu.matmul %47, %48, %cst_57 {dimension_numbers = #tpu.dot_dimension_numbers<[1], [0], [0], [1], [0, 0, 1, 1], [], []>} : vector<16x128xbf16>, vector<128x384xbf16>, vector<16x384xf32> -> vector<16x384xf32>
      %50 = vector.extract_strided_slice %46 {offsets = [0, 0], sizes = [16, 128], strides = [1, 1]} : vector<16x384xf32> to vector<16x128xf32>
      %51 = vector.extract_strided_slice %49 {offsets = [0, 0], sizes = [16, 128], strides = [1, 1]} : vector<16x384xf32> to vector<16x128xf32>
      %52 = arith.addf %50, %51 : vector<16x128xf32>
      %53 = arith.negf %52 : vector<16x128xf32>
      %54 = math.exp %53 : vector<16x128xf32>
      %cst_58 = arith.constant 1.000000e+00 : f32
      %55 = vector.broadcast %cst_58 : f32 to vector<16x128xf32>
      %56 = arith.addf %55, %54 : vector<16x128xf32>
      %57 = arith.divf %55, %56 : vector<16x128xf32>
      %58 = vector.extract_strided_slice %46 {offsets = [0, 128], sizes = [16, 128], strides = [1, 1]} : vector<16x384xf32> to vector<16x128xf32>
      %59 = vector.extract_strided_slice %49 {offsets = [0, 128], sizes = [16, 128], strides = [1, 1]} : vector<16x384xf32> to vector<16x128xf32>
      %60 = arith.addf %58, %59 : vector<16x128xf32>
      %61 = arith.negf %60 : vector<16x128xf32>
      %62 = math.exp %61 : vector<16x128xf32>
      %cst_59 = arith.constant 1.000000e+00 : f32
      %63 = vector.broadcast %cst_59 : f32 to vector<16x128xf32>
      %64 = arith.addf %63, %62 : vector<16x128xf32>
      %65 = arith.divf %63, %64 : vector<16x128xf32>
      %66 = vector.extract_strided_slice %46 {offsets = [0, 256], sizes = [16, 128], strides = [1, 1]} : vector<16x384xf32> to vector<16x128xf32>
      %67 = vector.extract_strided_slice %49 {offsets = [0, 256], sizes = [16, 128], strides = [1, 1]} : vector<16x384xf32> to vector<16x128xf32>
      %68 = vector.broadcast %25 : vector<1x128xf32> to vector<16x128xf32>
      %69 = arith.addf %67, %68 : vector<16x128xf32>
      %70 = arith.mulf %57, %69 : vector<16x128xf32>
      %71 = arith.addf %66, %70 : vector<16x128xf32>
      %72 = math.tanh %71 : vector<16x128xf32>
      %cst_60 = arith.constant 1.000000e+00 : f32
      %73 = vector.broadcast %cst_60 : f32 to vector<16x128xf32>
      %74 = arith.subf %73, %65 : vector<16x128xf32>
      %75 = arith.mulf %74, %72 : vector<16x128xf32>
      %76 = arith.mulf %65, %43 : vector<16x128xf32>
      %77 = arith.addf %75, %76 : vector<16x128xf32>
      %c0_61 = arith.constant 0 : index
      %c0_62 = arith.constant 0 : index
      %78 = vector.load %arg14[%c0_61, %c0_62] : memref<16x128xf32, #tpu.memory_space<vmem>>, vector<16x128xf32>
      tpu.vector_store %arg14[%c0_61, %c0_62], %77 {strides = array<i32>} : memref<16x128xf32, #tpu.memory_space<vmem>>, vector<16x128xf32>,
    }
    %c8_i32_34 = arith.constant 8 : i32
    %c0_35 = arith.constant 0 : index
    %c0_36 = arith.constant 0 : index
    %27 = vector.load %arg13[%c0_35, %c0_36] : memref<16x128xf32, #tpu.memory_space<vmem>>, vector<16x128xf32>
    %28 = arith.truncf %27 : vector<16x128xf32> to vector<16x128xbf16>
    %c0_37 = arith.constant 0 : index
    %c0_38 = arith.constant 0 : index
    %29 = vector.load %arg9[%c0_37, %c0_38] : memref<128x512xbf16, #tpu.memory_space<vmem>>, vector<128x512xbf16>
    %cst_39 = arith.constant dense<0.000000e+00> : vector<16x512xf32>
    %30 = tpu.matmul %28, %29, %cst_39 {dimension_numbers = #tpu.dot_dimension_numbers<[1], [0], [0], [1], [0, 0, 1, 1], [], []>} : vector<16x128xbf16>, vector<128x512xbf16>, vector<16x512xf32> -> vector<16x512xf32>
    %c0_40 = arith.constant 0 : index
    %c0_41 = arith.constant 0 : index
    %31 = vector.load %arg14[%c0_40, %c0_41] : memref<16x128xf32, #tpu.memory_space<vmem>>, vector<16x128xf32>
    %32 = arith.truncf %31 : vector<16x128xf32> to vector<16x128xbf16>
    %c0_42 = arith.constant 0 : index
    %c0_43 = arith.constant 0 : index
    %33 = vector.load %arg10[%c0_42, %c0_43] : memref<128x512xbf16, #tpu.memory_space<vmem>>, vector<128x512xbf16>
    %cst_44 = arith.constant dense<0.000000e+00> : vector<16x512xf32>
    %34 = tpu.matmul %32, %33, %cst_44 {dimension_numbers = #tpu.dot_dimension_numbers<[1], [0], [0], [1], [0, 0, 1, 1], [], []>} : vector<16x128xbf16>, vector<128x512xbf16>, vector<16x512xf32> -> vector<16x512xf32>
    %35 = arith.addf %30, %34 : vector<16x512xf32>
    %c0_45 = arith.constant 0 : index
    %c0_46 = arith.constant 0 : index
    %36 = vector.load %arg11[%c0_45, %c0_46] : memref<1x512xf32, #tpu.memory_space<vmem>>, vector<1x512xf32>
    %37 = vector.broadcast %36 : vector<1x512xf32> to vector<16x512xf32>
    %38 = arith.addf %35, %37 : vector<16x512xf32>
    %39 = math.tanh %38 : vector<16x512xf32>
    %c0_47 = arith.constant 0 : index
    %c0_48 = arith.constant 0 : index
    %40 = vector.load %arg12[%c0_47, %c0_48] : memref<16x512xf32, #tpu.memory_space<vmem>>, vector<16x512xf32>
    tpu.vector_store %arg12[%c0_47, %c0_48], %39 {strides = array<i32>} : memref<16x512xf32, #tpu.memory_space<vmem>>, vector<16x512xf32>,
    return
  }
}

module attributes {stable_mosaic.version = 11 : i64} {
  func.func @_decoder_kernel(%arg0: memref<8x16x128xf32, #tpu.memory_space<vmem>>, %arg1: memref<16x512xf32, #tpu.memory_space<vmem>>, %arg2: memref<128x384xbf16, #tpu.memory_space<vmem>>, %arg3: memref<128x384xbf16, #tpu.memory_space<vmem>>, %arg4: memref<1x384xf32, #tpu.memory_space<vmem>>, %arg5: memref<1x128xf32, #tpu.memory_space<vmem>>, %arg6: memref<128x384xbf16, #tpu.memory_space<vmem>>, %arg7: memref<128x384xbf16, #tpu.memory_space<vmem>>, %arg8: memref<1x384xf32, #tpu.memory_space<vmem>>, %arg9: memref<1x128xf32, #tpu.memory_space<vmem>>, %arg10: memref<128x384xbf16, #tpu.memory_space<vmem>>, %arg11: memref<128x384xbf16, #tpu.memory_space<vmem>>, %arg12: memref<128x384xbf16, #tpu.memory_space<vmem>>, %arg13: memref<1x384xf32, #tpu.memory_space<vmem>>, %arg14: memref<1x128xf32, #tpu.memory_space<vmem>>, %arg15: memref<128x384xbf16, #tpu.memory_space<vmem>>, %arg16: memref<128x384xbf16, #tpu.memory_space<vmem>>, %arg17: memref<128x384xbf16, #tpu.memory_space<vmem>>, %arg18: memref<1x384xf32, #tpu.memory_space<vmem>>, %arg19: memref<1x128xf32, #tpu.memory_space<vmem>>, %arg20: memref<128x128xbf16, #tpu.memory_space<vmem>>, %arg21: memref<128x128xbf16, #tpu.memory_space<vmem>>, %arg22: memref<1x128xf32, #tpu.memory_space<vmem>>, %arg23: memref<8x16x128xf32, #tpu.memory_space<vmem>>, %arg24: memref<16x128xf32, #tpu.memory_space<vmem>>, %arg25: memref<16x128xf32, #tpu.memory_space<vmem>>, %arg26: memref<16x128xf32, #tpu.memory_space<vmem>>, %arg27: memref<16x128xf32, #tpu.memory_space<vmem>>, %arg28: memref<8x16x384xf32, #tpu.memory_space<vmem>>, %arg29: memref<8x16x384xf32, #tpu.memory_space<vmem>>, %arg30: memref<8x16x128xbf16, #tpu.memory_space<vmem>>, %arg31: memref<8x16x128xbf16, #tpu.memory_space<vmem>>) attributes {dimension_semantics = [], scalar_prefetch = 0 : i64, scratch_operands = 8 : i64, tpu.core_type = #tpu.core_type<tc>} {
    %c0 = arith.constant 0 : index
    %c0_0 = arith.constant 0 : index
    %0 = vector.load %arg1[%c0, %c0_0] : memref<16x512xf32, #tpu.memory_space<vmem>>, vector<16x512xf32>
    %1 = vector.extract_strided_slice %0 {offsets = [0, 0], sizes = [16, 128], strides = [1, 1]} : vector<16x512xf32> to vector<16x128xf32>
    %c0_1 = arith.constant 0 : index
    %c0_2 = arith.constant 0 : index
    %2 = vector.load %arg24[%c0_1, %c0_2] : memref<16x128xf32, #tpu.memory_space<vmem>>, vector<16x128xf32>
    tpu.vector_store %arg24[%c0_1, %c0_2], %1 {strides = array<i32>} : memref<16x128xf32, #tpu.memory_space<vmem>>, vector<16x128xf32>,
    %3 = vector.extract_strided_slice %0 {offsets = [0, 128], sizes = [16, 128], strides = [1, 1]} : vector<16x512xf32> to vector<16x128xf32>
    %c0_3 = arith.constant 0 : index
    %c0_4 = arith.constant 0 : index
    %4 = vector.load %arg25[%c0_3, %c0_4] : memref<16x128xf32, #tpu.memory_space<vmem>>, vector<16x128xf32>
    tpu.vector_store %arg25[%c0_3, %c0_4], %3 {strides = array<i32>} : memref<16x128xf32, #tpu.memory_space<vmem>>, vector<16x128xf32>,
    %5 = vector.extract_strided_slice %0 {offsets = [0, 256], sizes = [16, 128], strides = [1, 1]} : vector<16x512xf32> to vector<16x128xf32>
    %c0_5 = arith.constant 0 : index
    %c0_6 = arith.constant 0 : index
    %6 = vector.load %arg26[%c0_5, %c0_6] : memref<16x128xf32, #tpu.memory_space<vmem>>, vector<16x128xf32>
    tpu.vector_store %arg26[%c0_5, %c0_6], %5 {strides = array<i32>} : memref<16x128xf32, #tpu.memory_space<vmem>>, vector<16x128xf32>,
    %7 = vector.extract_strided_slice %0 {offsets = [0, 384], sizes = [16, 128], strides = [1, 1]} : vector<16x512xf32> to vector<16x128xf32>
    %c0_7 = arith.constant 0 : index
    %c0_8 = arith.constant 0 : index
    %8 = vector.load %arg27[%c0_7, %c0_8] : memref<16x128xf32, #tpu.memory_space<vmem>>, vector<16x128xf32>
    tpu.vector_store %arg27[%c0_7, %c0_8], %7 {strides = array<i32>} : memref<16x128xf32, #tpu.memory_space<vmem>>, vector<16x128xf32>,
    %c0_9 = arith.constant 0 : index
    %c0_10 = arith.constant 0 : index
    %c0_11 = arith.constant 0 : index
    %9 = vector.load %arg0[%c0_9, %c0_10, %c0_11] : memref<8x16x128xf32, #tpu.memory_space<vmem>>, vector<8x16x128xf32>
    %10 = vector.shape_cast %9 : vector<8x16x128xf32> to vector<128x128xf32>
    %11 = arith.truncf %10 : vector<128x128xf32> to vector<128x128xbf16>
    %c0_12 = arith.constant 0 : index
    %c0_13 = arith.constant 0 : index
    %12 = vector.load %arg2[%c0_12, %c0_13] : memref<128x384xbf16, #tpu.memory_space<vmem>>, vector<128x384xbf16>
    %cst = arith.constant dense<0.000000e+00> : vector<128x384xf32>
    %13 = tpu.matmul %11, %12, %cst {dimension_numbers = #tpu.dot_dimension_numbers<[1], [0], [0], [1], [0, 0, 1, 1], [], []>} : vector<128x128xbf16>, vector<128x384xbf16>, vector<128x384xf32> -> vector<128x384xf32>
    %c0_14 = arith.constant 0 : index
    %c0_15 = arith.constant 0 : index
    %14 = vector.load %arg4[%c0_14, %c0_15] : memref<1x384xf32, #tpu.memory_space<vmem>>, vector<1x384xf32>
    %15 = vector.broadcast %14 : vector<1x384xf32> to vector<128x384xf32>
    %16 = arith.addf %13, %15 : vector<128x384xf32>
    %17 = vector.shape_cast %16 : vector<128x384xf32> to vector<8x16x384xf32>
    %c0_16 = arith.constant 0 : index
    %c0_17 = arith.constant 0 : index
    %c0_18 = arith.constant 0 : index
    %18 = vector.load %arg28[%c0_16, %c0_17, %c0_18] : memref<8x16x384xf32, #tpu.memory_space<vmem>>, vector<8x16x384xf32>
    tpu.vector_store %arg28[%c0_16, %c0_17, %c0_18], %17 {strides = array<i32>} : memref<8x16x384xf32, #tpu.memory_space<vmem>>, vector<8x16x384xf32>,
    %c0_19 = arith.constant 0 : index
    %c0_20 = arith.constant 0 : index
    %19 = vector.load %arg6[%c0_19, %c0_20] : memref<128x384xbf16, #tpu.memory_space<vmem>>, vector<128x384xbf16>
    %cst_21 = arith.constant dense<0.000000e+00> : vector<128x384xf32>
    %20 = tpu.matmul %11, %19, %cst_21 {dimension_numbers = #tpu.dot_dimension_numbers<[1], [0], [0], [1], [0, 0, 1, 1], [], []>} : vector<128x128xbf16>, vector<128x384xbf16>, vector<128x384xf32> -> vector<128x384xf32>
    %c0_22 = arith.constant 0 : index
    %c0_23 = arith.constant 0 : index
    %21 = vector.load %arg8[%c0_22, %c0_23] : memref<1x384xf32, #tpu.memory_space<vmem>>, vector<1x384xf32>
    %22 = vector.broadcast %21 : vector<1x384xf32> to vector<128x384xf32>
    %23 = arith.addf %20, %22 : vector<128x384xf32>
    %24 = vector.shape_cast %23 : vector<128x384xf32> to vector<8x16x384xf32>
    %c0_24 = arith.constant 0 : index
    %c0_25 = arith.constant 0 : index
    %c0_26 = arith.constant 0 : index
    %25 = vector.load %arg29[%c0_24, %c0_25, %c0_26] : memref<8x16x384xf32, #tpu.memory_space<vmem>>, vector<8x16x384xf32>
    tpu.vector_store %arg29[%c0_24, %c0_25, %c0_26], %24 {strides = array<i32>} : memref<8x16x384xf32, #tpu.memory_space<vmem>>, vector<8x16x384xf32>,
    %c0_27 = arith.constant 0 : index
    %c0_28 = arith.constant 0 : index
    %26 = vector.load %arg4[%c0_27, %c0_28] : memref<1x384xf32, #tpu.memory_space<vmem>>, vector<1x384xf32>
    %27 = vector.shape_cast %26 : vector<1x384xf32> to vector<1x384xf32>
    %28 = vector.broadcast %27 : vector<1x384xf32> to vector<16x384xf32>
    %c0_29 = arith.constant 0 : index
    %c0_30 = arith.constant 0 : index
    %c0_31 = arith.constant 0 : index
    %29 = vector.load %arg28[%c0_29, %c0_30, %c0_31] : memref<8x16x384xf32, #tpu.memory_space<vmem>>, vector<1x16x384xf32>
    %30 = vector.shape_cast %29 : vector<1x16x384xf32> to vector<16x384xf32>
    %31 = vector.shape_cast %28 : vector<16x384xf32> to vector<1x16x384xf32>
    tpu.vector_store %arg28[%c0_29, %c0_30, %c0_31], %31 {strides = array<i32>} : memref<8x16x384xf32, #tpu.memory_space<vmem>>, vector<1x16x384xf32>,
    %c0_32 = arith.constant 0 : index
    %c0_33 = arith.constant 0 : index
    %32 = vector.load %arg8[%c0_32, %c0_33] : memref<1x384xf32, #tpu.memory_space<vmem>>, vector<1x384xf32>
    %33 = vector.shape_cast %32 : vector<1x384xf32> to vector<1x384xf32>
    %34 = vector.broadcast %33 : vector<1x384xf32> to vector<16x384xf32>
    %c0_34 = arith.constant 0 : index
    %c0_35 = arith.constant 0 : index
    %c0_36 = arith.constant 0 : index
    %35 = vector.load %arg29[%c0_34, %c0_35, %c0_36] : memref<8x16x384xf32, #tpu.memory_space<vmem>>, vector<1x16x384xf32>
    %36 = vector.shape_cast %35 : vector<1x16x384xf32> to vector<16x384xf32>
    %37 = vector.shape_cast %34 : vector<16x384xf32> to vector<1x16x384xf32>
    tpu.vector_store %arg29[%c0_34, %c0_35, %c0_36], %37 {strides = array<i32>} : memref<8x16x384xf32, #tpu.memory_space<vmem>>, vector<1x16x384xf32>,
    %c0_37 = arith.constant 0 : index
    %c0_38 = arith.constant 0 : index
    %38 = vector.load %arg5[%c0_37, %c0_38] : memref<1x128xf32, #tpu.memory_space<vmem>>, vector<1x128xf32>
    %c0_39 = arith.constant 0 : index
    %c0_40 = arith.constant 0 : index
    %39 = vector.load %arg9[%c0_39, %c0_40] : memref<1x128xf32, #tpu.memory_space<vmem>>, vector<1x128xf32>
    %c0_i32 = arith.constant 0 : i32
    %c8_i32 = arith.constant 8 : i32
    %40 = arith.addi %c0_i32, %c8_i32 : i32
    %c1_i32 = arith.constant 1 : i32
    scf.for %arg32 = %c0_i32 to %40 step %c1_i32  : i32 {
      %c1_i32_95 = arith.constant 1 : i32
      %83 = arith.muli %arg32, %c1_i32_95 : i32
      %c0_i32_96 = arith.constant 0 : i32
      %84 = arith.addi %c0_i32_96, %83 : i32
      %c0_i32_97 = arith.constant 0 : i32
      %85 = arith.cmpi eq, %84, %c0_i32_97 : i32
      %c8_i32_98 = arith.constant 8 : i32
      %86 = arith.subi %c8_i32_98, %84 : i32
      %c0_i32_99 = arith.constant 0 : i32
      %87 = arith.select %85, %c0_i32_99, %86 : i32
      %c7_i32 = arith.constant 7 : i32
      %88 = arith.cmpi eq, %84, %c7_i32 : i32
      %c1_i32_100 = arith.constant 1 : i32
      %89 = arith.addi %84, %c1_i32_100 : i32
      %c0_i32_101 = arith.constant 0 : i32
      %90 = arith.select %88, %c0_i32_101, %89 : i32
      %c0_102 = arith.constant 0 : index
      %c0_103 = arith.constant 0 : index
      %91 = vector.load %arg24[%c0_102, %c0_103] : memref<16x128xf32, #tpu.memory_space<vmem>>, vector<16x128xf32>
      %92 = arith.index_cast %87 : i32 to index
      %c0_104 = arith.constant 0 : index
      %c0_105 = arith.constant 0 : index
      %93 = vector.load %arg28[%92, %c0_104, %c0_105] : memref<8x16x384xf32, #tpu.memory_space<vmem>>, vector<1x16x384xf32>
      %94 = vector.shape_cast %93 : vector<1x16x384xf32> to vector<16x384xf32>
      %95 = arith.truncf %91 : vector<16x128xf32> to vector<16x128xbf16>
      %c0_106 = arith.constant 0 : index
      %c0_107 = arith.constant 0 : index
      %96 = vector.load %arg3[%c0_106, %c0_107] : memref<128x384xbf16, #tpu.memory_space<vmem>>, vector<128x384xbf16>
      %cst_108 = arith.constant dense<0.000000e+00> : vector<16x384xf32>
      %97 = tpu.matmul %95, %96, %cst_108 {dimension_numbers = #tpu.dot_dimension_numbers<[1], [0], [0], [1], [0, 0, 1, 1], [], []>} : vector<16x128xbf16>, vector<128x384xbf16>, vector<16x384xf32> -> vector<16x384xf32>
      %98 = vector.extract_strided_slice %94 {offsets = [0, 0], sizes = [16, 128], strides = [1, 1]} : vector<16x384xf32> to vector<16x128xf32>
      %99 = vector.extract_strided_slice %97 {offsets = [0, 0], sizes = [16, 128], strides = [1, 1]} : vector<16x384xf32> to vector<16x128xf32>
      %100 = arith.addf %98, %99 : vector<16x128xf32>
      %101 = arith.negf %100 : vector<16x128xf32>
      %102 = math.exp %101 : vector<16x128xf32>
      %cst_109 = arith.constant 1.000000e+00 : f32
      %103 = vector.broadcast %cst_109 : f32 to vector<16x128xf32>
      %104 = arith.addf %103, %102 : vector<16x128xf32>
      %105 = arith.divf %103, %104 : vector<16x128xf32>
      %106 = vector.extract_strided_slice %94 {offsets = [0, 128], sizes = [16, 128], strides = [1, 1]} : vector<16x384xf32> to vector<16x128xf32>
      %107 = vector.extract_strided_slice %97 {offsets = [0, 128], sizes = [16, 128], strides = [1, 1]} : vector<16x384xf32> to vector<16x128xf32>
      %108 = arith.addf %106, %107 : vector<16x128xf32>
      %109 = arith.negf %108 : vector<16x128xf32>
      %110 = math.exp %109 : vector<16x128xf32>
      %cst_110 = arith.constant 1.000000e+00 : f32
      %111 = vector.broadcast %cst_110 : f32 to vector<16x128xf32>
      %112 = arith.addf %111, %110 : vector<16x128xf32>
      %113 = arith.divf %111, %112 : vector<16x128xf32>
      %114 = vector.extract_strided_slice %94 {offsets = [0, 256], sizes = [16, 128], strides = [1, 1]} : vector<16x384xf32> to vector<16x128xf32>
      %115 = vector.extract_strided_slice %97 {offsets = [0, 256], sizes = [16, 128], strides = [1, 1]} : vector<16x384xf32> to vector<16x128xf32>
      %116 = vector.broadcast %38 : vector<1x128xf32> to vector<16x128xf32>
      %117 = arith.addf %115, %116 : vector<16x128xf32>
      %118 = arith.mulf %105, %117 : vector<16x128xf32>
      %119 = arith.addf %114, %118 : vector<16x128xf32>
      %120 = math.tanh %119 : vector<16x128xf32>
      %cst_111 = arith.constant 1.000000e+00 : f32
      %121 = vector.broadcast %cst_111 : f32 to vector<16x128xf32>
      %122 = arith.subf %121, %113 : vector<16x128xf32>
      %123 = arith.mulf %122, %120 : vector<16x128xf32>
      %124 = arith.mulf %113, %91 : vector<16x128xf32>
      %125 = arith.addf %123, %124 : vector<16x128xf32>
      %c0_112 = arith.constant 0 : index
      %c0_113 = arith.constant 0 : index
      %126 = vector.load %arg25[%c0_112, %c0_113] : memref<16x128xf32, #tpu.memory_space<vmem>>, vector<16x128xf32>
      %127 = arith.index_cast %90 : i32 to index
      %c0_114 = arith.constant 0 : index
      %c0_115 = arith.constant 0 : index
      %128 = vector.load %arg29[%127, %c0_114, %c0_115] : memref<8x16x384xf32, #tpu.memory_space<vmem>>, vector<1x16x384xf32>
      %129 = vector.shape_cast %128 : vector<1x16x384xf32> to vector<16x384xf32>
      %130 = arith.truncf %126 : vector<16x128xf32> to vector<16x128xbf16>
      %c0_116 = arith.constant 0 : index
      %c0_117 = arith.constant 0 : index
      %131 = vector.load %arg7[%c0_116, %c0_117] : memref<128x384xbf16, #tpu.memory_space<vmem>>, vector<128x384xbf16>
      %cst_118 = arith.constant dense<0.000000e+00> : vector<16x384xf32>
      %132 = tpu.matmul %130, %131, %cst_118 {dimension_numbers = #tpu.dot_dimension_numbers<[1], [0], [0], [1], [0, 0, 1, 1], [], []>} : vector<16x128xbf16>, vector<128x384xbf16>, vector<16x384xf32> -> vector<16x384xf32>
      %133 = vector.extract_strided_slice %129 {offsets = [0, 0], sizes = [16, 128], strides = [1, 1]} : vector<16x384xf32> to vector<16x128xf32>
      %134 = vector.extract_strided_slice %132 {offsets = [0, 0], sizes = [16, 128], strides = [1, 1]} : vector<16x384xf32> to vector<16x128xf32>
      %135 = arith.addf %133, %134 : vector<16x128xf32>
      %136 = arith.negf %135 : vector<16x128xf32>
      %137 = math.exp %136 : vector<16x128xf32>
      %cst_119 = arith.constant 1.000000e+00 : f32
      %138 = vector.broadcast %cst_119 : f32 to vector<16x128xf32>
      %139 = arith.addf %138, %137 : vector<16x128xf32>
      %140 = arith.divf %138, %139 : vector<16x128xf32>
      %141 = vector.extract_strided_slice %129 {offsets = [0, 128], sizes = [16, 128], strides = [1, 1]} : vector<16x384xf32> to vector<16x128xf32>
      %142 = vector.extract_strided_slice %132 {offsets = [0, 128], sizes = [16, 128], strides = [1, 1]} : vector<16x384xf32> to vector<16x128xf32>
      %143 = arith.addf %141, %142 : vector<16x128xf32>
      %144 = arith.negf %143 : vector<16x128xf32>
      %145 = math.exp %144 : vector<16x128xf32>
      %cst_120 = arith.constant 1.000000e+00 : f32
      %146 = vector.broadcast %cst_120 : f32 to vector<16x128xf32>
      %147 = arith.addf %146, %145 : vector<16x128xf32>
      %148 = arith.divf %146, %147 : vector<16x128xf32>
      %149 = vector.extract_strided_slice %129 {offsets = [0, 256], sizes = [16, 128], strides = [1, 1]} : vector<16x384xf32> to vector<16x128xf32>
      %150 = vector.extract_strided_slice %132 {offsets = [0, 256], sizes = [16, 128], strides = [1, 1]} : vector<16x384xf32> to vector<16x128xf32>
      %151 = vector.broadcast %39 : vector<1x128xf32> to vector<16x128xf32>
      %152 = arith.addf %150, %151 : vector<16x128xf32>
      %153 = arith.mulf %140, %152 : vector<16x128xf32>
      %154 = arith.addf %149, %153 : vector<16x128xf32>
      %155 = math.tanh %154 : vector<16x128xf32>
      %cst_121 = arith.constant 1.000000e+00 : f32
      %156 = vector.broadcast %cst_121 : f32 to vector<16x128xf32>
      %157 = arith.subf %156, %148 : vector<16x128xf32>
      %158 = arith.mulf %157, %155 : vector<16x128xf32>
      %159 = arith.mulf %148, %126 : vector<16x128xf32>
      %160 = arith.addf %158, %159 : vector<16x128xf32>
      %c0_122 = arith.constant 0 : index
      %c0_123 = arith.constant 0 : index
      %161 = vector.load %arg24[%c0_122, %c0_123] : memref<16x128xf32, #tpu.memory_space<vmem>>, vector<16x128xf32>
      tpu.vector_store %arg24[%c0_122, %c0_123], %125 {strides = array<i32>} : memref<16x128xf32, #tpu.memory_space<vmem>>, vector<16x128xf32>,
      %c0_124 = arith.constant 0 : index
      %c0_125 = arith.constant 0 : index
      %162 = vector.load %arg25[%c0_124, %c0_125] : memref<16x128xf32, #tpu.memory_space<vmem>>, vector<16x128xf32>
      tpu.vector_store %arg25[%c0_124, %c0_125], %160 {strides = array<i32>} : memref<16x128xf32, #tpu.memory_space<vmem>>, vector<16x128xf32>,
      %163 = arith.truncf %125 : vector<16x128xf32> to vector<16x128xbf16>
      %164 = arith.index_cast %84 : i32 to index
      %c0_126 = arith.constant 0 : index
      %c0_127 = arith.constant 0 : index
      %165 = vector.load %arg30[%164, %c0_126, %c0_127] : memref<8x16x128xbf16, #tpu.memory_space<vmem>>, vector<1x16x128xbf16>
      %166 = vector.shape_cast %165 : vector<1x16x128xbf16> to vector<16x128xbf16>
      %167 = vector.shape_cast %163 : vector<16x128xbf16> to vector<1x16x128xbf16>
      tpu.vector_store %arg30[%164, %c0_126, %c0_127], %167 {strides = array<i32>} : memref<8x16x128xbf16, #tpu.memory_space<vmem>>, vector<1x16x128xbf16>,
      %168 = arith.truncf %160 : vector<16x128xf32> to vector<16x128xbf16>
      %c7_i32_128 = arith.constant 7 : i32
      %169 = arith.subi %c7_i32_128, %84 : i32
      %170 = arith.index_cast %169 : i32 to index
      %c0_129 = arith.constant 0 : index
      %c0_130 = arith.constant 0 : index
      %171 = vector.load %arg31[%170, %c0_129, %c0_130] : memref<8x16x128xbf16, #tpu.memory_space<vmem>>, vector<1x16x128xbf16>
      %172 = vector.shape_cast %171 : vector<1x16x128xbf16> to vector<16x128xbf16>
      %173 = vector.shape_cast %168 : vector<16x128xbf16> to vector<1x16x128xbf16>
      tpu.vector_store %arg31[%170, %c0_129, %c0_130], %173 {strides = array<i32>} : memref<8x16x128xbf16, #tpu.memory_space<vmem>>, vector<1x16x128xbf16>,
    }
    %c8_i32_41 = arith.constant 8 : i32
    %c0_42 = arith.constant 0 : index
    %c0_43 = arith.constant 0 : index
    %c0_44 = arith.constant 0 : index
    %41 = vector.load %arg30[%c0_42, %c0_43, %c0_44] : memref<8x16x128xbf16, #tpu.memory_space<vmem>>, vector<8x16x128xbf16>
    %42 = vector.shape_cast %41 : vector<8x16x128xbf16> to vector<128x128xbf16>
    %c0_45 = arith.constant 0 : index
    %c0_46 = arith.constant 0 : index
    %c0_47 = arith.constant 0 : index
    %43 = vector.load %arg31[%c0_45, %c0_46, %c0_47] : memref<8x16x128xbf16, #tpu.memory_space<vmem>>, vector<8x16x128xbf16>
    %44 = vector.shape_cast %43 : vector<8x16x128xbf16> to vector<128x128xbf16>
    %c0_48 = arith.constant 0 : index
    %c0_49 = arith.constant 0 : index
    %45 = vector.load %arg10[%c0_48, %c0_49] : memref<128x384xbf16, #tpu.memory_space<vmem>>, vector<128x384xbf16>
    %cst_50 = arith.constant dense<0.000000e+00> : vector<128x384xf32>
    %46 = tpu.matmul %42, %45, %cst_50 {dimension_numbers = #tpu.dot_dimension_numbers<[1], [0], [0], [1], [0, 0, 1, 1], [], []>} : vector<128x128xbf16>, vector<128x384xbf16>, vector<128x384xf32> -> vector<128x384xf32>
    %c0_51 = arith.constant 0 : index
    %c0_52 = arith.constant 0 : index
    %47 = vector.load %arg11[%c0_51, %c0_52] : memref<128x384xbf16, #tpu.memory_space<vmem>>, vector<128x384xbf16>
    %cst_53 = arith.constant dense<0.000000e+00> : vector<128x384xf32>
    %48 = tpu.matmul %44, %47, %cst_53 {dimension_numbers = #tpu.dot_dimension_numbers<[1], [0], [0], [1], [0, 0, 1, 1], [], []>} : vector<128x128xbf16>, vector<128x384xbf16>, vector<128x384xf32> -> vector<128x384xf32>
    %49 = arith.addf %46, %48 : vector<128x384xf32>
    %c0_54 = arith.constant 0 : index
    %c0_55 = arith.constant 0 : index
    %50 = vector.load %arg13[%c0_54, %c0_55] : memref<1x384xf32, #tpu.memory_space<vmem>>, vector<1x384xf32>
    %51 = vector.broadcast %50 : vector<1x384xf32> to vector<128x384xf32>
    %52 = arith.addf %49, %51 : vector<128x384xf32>
    %53 = vector.shape_cast %52 : vector<128x384xf32> to vector<8x16x384xf32>
    %c0_56 = arith.constant 0 : index
    %c0_57 = arith.constant 0 : index
    %c0_58 = arith.constant 0 : index
    %54 = vector.load %arg28[%c0_56, %c0_57, %c0_58] : memref<8x16x384xf32, #tpu.memory_space<vmem>>, vector<8x16x384xf32>
    tpu.vector_store %arg28[%c0_56, %c0_57, %c0_58], %53 {strides = array<i32>} : memref<8x16x384xf32, #tpu.memory_space<vmem>>, vector<8x16x384xf32>,
    %c0_59 = arith.constant 0 : index
    %c0_60 = arith.constant 0 : index
    %55 = vector.load %arg15[%c0_59, %c0_60] : memref<128x384xbf16, #tpu.memory_space<vmem>>, vector<128x384xbf16>
    %cst_61 = arith.constant dense<0.000000e+00> : vector<128x384xf32>
    %56 = tpu.matmul %42, %55, %cst_61 {dimension_numbers = #tpu.dot_dimension_numbers<[1], [0], [0], [1], [0, 0, 1, 1], [], []>} : vector<128x128xbf16>, vector<128x384xbf16>, vector<128x384xf32> -> vector<128x384xf32>
    %c0_62 = arith.constant 0 : index
    %c0_63 = arith.constant 0 : index
    %57 = vector.load %arg16[%c0_62, %c0_63] : memref<128x384xbf16, #tpu.memory_space<vmem>>, vector<128x384xbf16>
    %cst_64 = arith.constant dense<0.000000e+00> : vector<128x384xf32>
    %58 = tpu.matmul %44, %57, %cst_64 {dimension_numbers = #tpu.dot_dimension_numbers<[1], [0], [0], [1], [0, 0, 1, 1], [], []>} : vector<128x128xbf16>, vector<128x384xbf16>, vector<128x384xf32> -> vector<128x384xf32>
    %59 = arith.addf %56, %58 : vector<128x384xf32>
    %c0_65 = arith.constant 0 : index
    %c0_66 = arith.constant 0 : index
    %60 = vector.load %arg18[%c0_65, %c0_66] : memref<1x384xf32, #tpu.memory_space<vmem>>, vector<1x384xf32>
    %61 = vector.broadcast %60 : vector<1x384xf32> to vector<128x384xf32>
    %62 = arith.addf %59, %61 : vector<128x384xf32>
    %63 = vector.shape_cast %62 : vector<128x384xf32> to vector<8x16x384xf32>
    %c0_67 = arith.constant 0 : index
    %c0_68 = arith.constant 0 : index
    %c0_69 = arith.constant 0 : index
    %64 = vector.load %arg29[%c0_67, %c0_68, %c0_69] : memref<8x16x384xf32, #tpu.memory_space<vmem>>, vector<8x16x384xf32>
    tpu.vector_store %arg29[%c0_67, %c0_68, %c0_69], %63 {strides = array<i32>} : memref<8x16x384xf32, #tpu.memory_space<vmem>>, vector<8x16x384xf32>,
    %c0_70 = arith.constant 0 : index
    %c0_71 = arith.constant 0 : index
    %65 = vector.load %arg14[%c0_70, %c0_71] : memref<1x128xf32, #tpu.memory_space<vmem>>, vector<1x128xf32>
    %c0_72 = arith.constant 0 : index
    %c0_73 = arith.constant 0 : index
    %66 = vector.load %arg19[%c0_72, %c0_73] : memref<1x128xf32, #tpu.memory_space<vmem>>, vector<1x128xf32>
    %c0_i32_74 = arith.constant 0 : i32
    %c8_i32_75 = arith.constant 8 : i32
    %67 = arith.addi %c0_i32_74, %c8_i32_75 : i32
    %c1_i32_76 = arith.constant 1 : i32
    scf.for %arg32 = %c0_i32_74 to %67 step %c1_i32_76  : i32 {
      %c1_i32_95 = arith.constant 1 : i32
      %83 = arith.muli %arg32, %c1_i32_95 : i32
      %c0_i32_96 = arith.constant 0 : i32
      %84 = arith.addi %c0_i32_96, %83 : i32
      %c0_97 = arith.constant 0 : index
      %c0_98 = arith.constant 0 : index
      %85 = vector.load %arg26[%c0_97, %c0_98] : memref<16x128xf32, #tpu.memory_space<vmem>>, vector<16x128xf32>
      %86 = arith.index_cast %84 : i32 to index
      %c0_99 = arith.constant 0 : index
      %c0_100 = arith.constant 0 : index
      %87 = vector.load %arg28[%86, %c0_99, %c0_100] : memref<8x16x384xf32, #tpu.memory_space<vmem>>, vector<1x16x384xf32>
      %88 = vector.shape_cast %87 : vector<1x16x384xf32> to vector<16x384xf32>
      %89 = arith.truncf %85 : vector<16x128xf32> to vector<16x128xbf16>
      %c0_101 = arith.constant 0 : index
      %c0_102 = arith.constant 0 : index
      %90 = vector.load %arg12[%c0_101, %c0_102] : memref<128x384xbf16, #tpu.memory_space<vmem>>, vector<128x384xbf16>
      %cst_103 = arith.constant dense<0.000000e+00> : vector<16x384xf32>
      %91 = tpu.matmul %89, %90, %cst_103 {dimension_numbers = #tpu.dot_dimension_numbers<[1], [0], [0], [1], [0, 0, 1, 1], [], []>} : vector<16x128xbf16>, vector<128x384xbf16>, vector<16x384xf32> -> vector<16x384xf32>
      %92 = vector.extract_strided_slice %88 {offsets = [0, 0], sizes = [16, 128], strides = [1, 1]} : vector<16x384xf32> to vector<16x128xf32>
      %93 = vector.extract_strided_slice %91 {offsets = [0, 0], sizes = [16, 128], strides = [1, 1]} : vector<16x384xf32> to vector<16x128xf32>
      %94 = arith.addf %92, %93 : vector<16x128xf32>
      %95 = arith.negf %94 : vector<16x128xf32>
      %96 = math.exp %95 : vector<16x128xf32>
      %cst_104 = arith.constant 1.000000e+00 : f32
      %97 = vector.broadcast %cst_104 : f32 to vector<16x128xf32>
      %98 = arith.addf %97, %96 : vector<16x128xf32>
      %99 = arith.divf %97, %98 : vector<16x128xf32>
      %100 = vector.extract_strided_slice %88 {offsets = [0, 128], sizes = [16, 128], strides = [1, 1]} : vector<16x384xf32> to vector<16x128xf32>
      %101 = vector.extract_strided_slice %91 {offsets = [0, 128], sizes = [16, 128], strides = [1, 1]} : vector<16x384xf32> to vector<16x128xf32>
      %102 = arith.addf %100, %101 : vector<16x128xf32>
      %103 = arith.negf %102 : vector<16x128xf32>
      %104 = math.exp %103 : vector<16x128xf32>
      %cst_105 = arith.constant 1.000000e+00 : f32
      %105 = vector.broadcast %cst_105 : f32 to vector<16x128xf32>
      %106 = arith.addf %105, %104 : vector<16x128xf32>
      %107 = arith.divf %105, %106 : vector<16x128xf32>
      %108 = vector.extract_strided_slice %88 {offsets = [0, 256], sizes = [16, 128], strides = [1, 1]} : vector<16x384xf32> to vector<16x128xf32>
      %109 = vector.extract_strided_slice %91 {offsets = [0, 256], sizes = [16, 128], strides = [1, 1]} : vector<16x384xf32> to vector<16x128xf32>
      %110 = vector.broadcast %65 : vector<1x128xf32> to vector<16x128xf32>
      %111 = arith.addf %109, %110 : vector<16x128xf32>
      %112 = arith.mulf %99, %111 : vector<16x128xf32>
      %113 = arith.addf %108, %112 : vector<16x128xf32>
      %114 = math.tanh %113 : vector<16x128xf32>
      %cst_106 = arith.constant 1.000000e+00 : f32
      %115 = vector.broadcast %cst_106 : f32 to vector<16x128xf32>
      %116 = arith.subf %115, %107 : vector<16x128xf32>
      %117 = arith.mulf %116, %114 : vector<16x128xf32>
      %118 = arith.mulf %107, %85 : vector<16x128xf32>
      %119 = arith.addf %117, %118 : vector<16x128xf32>
      %c0_107 = arith.constant 0 : index
      %c0_108 = arith.constant 0 : index
      %120 = vector.load %arg27[%c0_107, %c0_108] : memref<16x128xf32, #tpu.memory_space<vmem>>, vector<16x128xf32>
      %c7_i32 = arith.constant 7 : i32
      %121 = arith.subi %c7_i32, %84 : i32
      %122 = arith.index_cast %121 : i32 to index
      %c0_109 = arith.constant 0 : index
      %c0_110 = arith.constant 0 : index
      %123 = vector.load %arg29[%122, %c0_109, %c0_110] : memref<8x16x384xf32, #tpu.memory_space<vmem>>, vector<1x16x384xf32>
      %124 = vector.shape_cast %123 : vector<1x16x384xf32> to vector<16x384xf32>
      %125 = arith.truncf %120 : vector<16x128xf32> to vector<16x128xbf16>
      %c0_111 = arith.constant 0 : index
      %c0_112 = arith.constant 0 : index
      %126 = vector.load %arg17[%c0_111, %c0_112] : memref<128x384xbf16, #tpu.memory_space<vmem>>, vector<128x384xbf16>
      %cst_113 = arith.constant dense<0.000000e+00> : vector<16x384xf32>
      %127 = tpu.matmul %125, %126, %cst_113 {dimension_numbers = #tpu.dot_dimension_numbers<[1], [0], [0], [1], [0, 0, 1, 1], [], []>} : vector<16x128xbf16>, vector<128x384xbf16>, vector<16x384xf32> -> vector<16x384xf32>
      %128 = vector.extract_strided_slice %124 {offsets = [0, 0], sizes = [16, 128], strides = [1, 1]} : vector<16x384xf32> to vector<16x128xf32>
      %129 = vector.extract_strided_slice %127 {offsets = [0, 0], sizes = [16, 128], strides = [1, 1]} : vector<16x384xf32> to vector<16x128xf32>
      %130 = arith.addf %128, %129 : vector<16x128xf32>
      %131 = arith.negf %130 : vector<16x128xf32>
      %132 = math.exp %131 : vector<16x128xf32>
      %cst_114 = arith.constant 1.000000e+00 : f32
      %133 = vector.broadcast %cst_114 : f32 to vector<16x128xf32>
      %134 = arith.addf %133, %132 : vector<16x128xf32>
      %135 = arith.divf %133, %134 : vector<16x128xf32>
      %136 = vector.extract_strided_slice %124 {offsets = [0, 128], sizes = [16, 128], strides = [1, 1]} : vector<16x384xf32> to vector<16x128xf32>
      %137 = vector.extract_strided_slice %127 {offsets = [0, 128], sizes = [16, 128], strides = [1, 1]} : vector<16x384xf32> to vector<16x128xf32>
      %138 = arith.addf %136, %137 : vector<16x128xf32>
      %139 = arith.negf %138 : vector<16x128xf32>
      %140 = math.exp %139 : vector<16x128xf32>
      %cst_115 = arith.constant 1.000000e+00 : f32
      %141 = vector.broadcast %cst_115 : f32 to vector<16x128xf32>
      %142 = arith.addf %141, %140 : vector<16x128xf32>
      %143 = arith.divf %141, %142 : vector<16x128xf32>
      %144 = vector.extract_strided_slice %124 {offsets = [0, 256], sizes = [16, 128], strides = [1, 1]} : vector<16x384xf32> to vector<16x128xf32>
      %145 = vector.extract_strided_slice %127 {offsets = [0, 256], sizes = [16, 128], strides = [1, 1]} : vector<16x384xf32> to vector<16x128xf32>
      %146 = vector.broadcast %66 : vector<1x128xf32> to vector<16x128xf32>
      %147 = arith.addf %145, %146 : vector<16x128xf32>
      %148 = arith.mulf %135, %147 : vector<16x128xf32>
      %149 = arith.addf %144, %148 : vector<16x128xf32>
      %150 = math.tanh %149 : vector<16x128xf32>
      %cst_116 = arith.constant 1.000000e+00 : f32
      %151 = vector.broadcast %cst_116 : f32 to vector<16x128xf32>
      %152 = arith.subf %151, %143 : vector<16x128xf32>
      %153 = arith.mulf %152, %150 : vector<16x128xf32>
      %154 = arith.mulf %143, %120 : vector<16x128xf32>
      %155 = arith.addf %153, %154 : vector<16x128xf32>
      %c0_117 = arith.constant 0 : index
      %c0_118 = arith.constant 0 : index
      %156 = vector.load %arg26[%c0_117, %c0_118] : memref<16x128xf32, #tpu.memory_space<vmem>>, vector<16x128xf32>
      tpu.vector_store %arg26[%c0_117, %c0_118], %119 {strides = array<i32>} : memref<16x128xf32, #tpu.memory_space<vmem>>, vector<16x128xf32>,
      %c0_119 = arith.constant 0 : index
      %c0_120 = arith.constant 0 : index
      %157 = vector.load %arg27[%c0_119, %c0_120] : memref<16x128xf32, #tpu.memory_space<vmem>>, vector<16x128xf32>
      tpu.vector_store %arg27[%c0_119, %c0_120], %155 {strides = array<i32>} : memref<16x128xf32, #tpu.memory_space<vmem>>, vector<16x128xf32>,
      %158 = arith.truncf %119 : vector<16x128xf32> to vector<16x128xbf16>
      %c7_i32_121 = arith.constant 7 : i32
      %159 = arith.subi %c7_i32_121, %84 : i32
      %160 = arith.index_cast %159 : i32 to index
      %c0_122 = arith.constant 0 : index
      %c0_123 = arith.constant 0 : index
      %161 = vector.load %arg30[%160, %c0_122, %c0_123] : memref<8x16x128xbf16, #tpu.memory_space<vmem>>, vector<1x16x128xbf16>
      %162 = vector.shape_cast %161 : vector<1x16x128xbf16> to vector<16x128xbf16>
      %163 = vector.shape_cast %158 : vector<16x128xbf16> to vector<1x16x128xbf16>
      tpu.vector_store %arg30[%160, %c0_122, %c0_123], %163 {strides = array<i32>} : memref<8x16x128xbf16, #tpu.memory_space<vmem>>, vector<1x16x128xbf16>,
      %164 = arith.truncf %155 : vector<16x128xf32> to vector<16x128xbf16>
      %165 = arith.index_cast %84 : i32 to index
      %c0_124 = arith.constant 0 : index
      %c0_125 = arith.constant 0 : index
      %166 = vector.load %arg31[%165, %c0_124, %c0_125] : memref<8x16x128xbf16, #tpu.memory_space<vmem>>, vector<1x16x128xbf16>
      %167 = vector.shape_cast %166 : vector<1x16x128xbf16> to vector<16x128xbf16>
      %168 = vector.shape_cast %164 : vector<16x128xbf16> to vector<1x16x128xbf16>
      tpu.vector_store %arg31[%165, %c0_124, %c0_125], %168 {strides = array<i32>} : memref<8x16x128xbf16, #tpu.memory_space<vmem>>, vector<1x16x128xbf16>,
    }
    %c8_i32_77 = arith.constant 8 : i32
    %c0_78 = arith.constant 0 : index
    %c0_79 = arith.constant 0 : index
    %c0_80 = arith.constant 0 : index
    %68 = vector.load %arg30[%c0_78, %c0_79, %c0_80] : memref<8x16x128xbf16, #tpu.memory_space<vmem>>, vector<8x16x128xbf16>
    %69 = vector.shape_cast %68 : vector<8x16x128xbf16> to vector<128x128xbf16>
    %c0_81 = arith.constant 0 : index
    %c0_82 = arith.constant 0 : index
    %c0_83 = arith.constant 0 : index
    %70 = vector.load %arg31[%c0_81, %c0_82, %c0_83] : memref<8x16x128xbf16, #tpu.memory_space<vmem>>, vector<8x16x128xbf16>
    %71 = vector.shape_cast %70 : vector<8x16x128xbf16> to vector<128x128xbf16>
    %c0_84 = arith.constant 0 : index
    %c0_85 = arith.constant 0 : index
    %72 = vector.load %arg20[%c0_84, %c0_85] : memref<128x128xbf16, #tpu.memory_space<vmem>>, vector<128x128xbf16>
    %cst_86 = arith.constant dense<0.000000e+00> : vector<128x128xf32>
    %73 = tpu.matmul %69, %72, %cst_86 {dimension_numbers = #tpu.dot_dimension_numbers<[1], [0], [0], [1], [0, 0, 1, 1], [], []>} : vector<128x128xbf16>, vector<128x128xbf16>, vector<128x128xf32> -> vector<128x128xf32>
    %c0_87 = arith.constant 0 : index
    %c0_88 = arith.constant 0 : index
    %74 = vector.load %arg21[%c0_87, %c0_88] : memref<128x128xbf16, #tpu.memory_space<vmem>>, vector<128x128xbf16>
    %cst_89 = arith.constant dense<0.000000e+00> : vector<128x128xf32>
    %75 = tpu.matmul %71, %74, %cst_89 {dimension_numbers = #tpu.dot_dimension_numbers<[1], [0], [0], [1], [0, 0, 1, 1], [], []>} : vector<128x128xbf16>, vector<128x128xbf16>, vector<128x128xf32> -> vector<128x128xf32>
    %76 = arith.addf %73, %75 : vector<128x128xf32>
    %c0_90 = arith.constant 0 : index
    %c0_91 = arith.constant 0 : index
    %77 = vector.load %arg22[%c0_90, %c0_91] : memref<1x128xf32, #tpu.memory_space<vmem>>, vector<1x128xf32>
    %78 = vector.broadcast %77 : vector<1x128xf32> to vector<128x128xf32>
    %79 = arith.addf %76, %78 : vector<128x128xf32>
    %80 = math.tanh %79 : vector<128x128xf32>
    %81 = vector.shape_cast %80 : vector<128x128xf32> to vector<8x16x128xf32>
    %c0_92 = arith.constant 0 : index
    %c0_93 = arith.constant 0 : index
    %c0_94 = arith.constant 0 : index
    %82 = vector.load %arg23[%c0_92, %c0_93, %c0_94] : memref<8x16x128xf32, #tpu.memory_space<vmem>>, vector<8x16x128xf32>
    tpu.vector_store %arg23[%c0_92, %c0_93, %c0_94], %81 {strides = array<i32>} : memref<8x16x128xf32, #tpu.memory_space<vmem>>, vector<8x16x128xf32>,
    return
  }
}

</mosaic_0001>

<bundles_post_ra>
// kernel: forward.2
= control target key start
LH: loop header
LB: loop body
LE: loop exit
PB: predicated region body
PF: predicated region fallthrough
CT: control target
= control target key end

     0   :  { %v2951_v1 = vmov 0   ;;  %v2952_v49 = vmov 0.0   ;;  %v100_v51 = vlaneseq  ;;  %s3803_s1 = inlined_call_operand.vmem [shape: bf16[128,384], index: 1, kind: input, shape index: {}]   ;;  %s3804_s2 = inlined_call_operand.vmem [shape: bf16[128,384], index: 2, kind: input, shape index: {}]   ;;  %s3805_s5 = inlined_call_operand.vmem [shape: bf16[128,384], index: 5, kind: input, shape index: {}]   ;;  %s3806_s6 = inlined_call_operand.vmem [shape: bf16[128,384], index: 6, kind: input, shape index: {}]   ;;  %s3807_s7 = inlined_call_operand.vmem [shape: f32[1,384], index: 7, kind: input, shape index: {}]   ;;  %s3808_s8 = inlined_call_operand.vmem [shape: f32[1,128], index: 8, kind: input, shape index: {}]   ;;  %s3809_s9 = inlined_call_operand.vmem [shape: bf16[128,512], index: 9, kind: input, shape index: {}]   ;;  %s3810_s10 = inlined_call_operand.vmem [shape: bf16[128,512], index: 10, kind: input, shape index: {}]   ;;  %s3811_s11 = inlined_call_operand.vmem [shape: f32[1,512], index: 11, kind: input, shape index: {}]   ;;  %s3812_s12 = inlined_call_operand.vmem [shape: f32[16,512], index: 12, kind: output, shape index: {}]   ;;  %s3813_s0 = inlined_call_operand.vmem [shape: f32[8,16,128], index: 0, kind: input, shape index: {}]   ;;  %s3814_s4 = inlined_call_operand.vmem [shape: f32[1,128], index: 4, kind: input, shape index: {}]   ;;  %s3815_s3 = inlined_call_operand.vmem [shape: f32[1,384], index: 3, kind: input, shape index: {}]  }
   0x1   :  { %v2647_v0 = vld [vmem:[%s3803_s1 + $0xac] ss:$12 sps:$4 sm:$0xff]   ;;  %275 = vmatprep.mubr.bf16.mxu0 %v2951_v1  ;;  %v2649_v2 = vld [vmem:[%s3803_s1 + $0xa8] ss:$12 sps:$4 sm:$0xff]   ;;  %v2652_v4 = vld [vmem:[%s3803_s1 + $0x90] ss:$12 sps:$4 sm:$0xff]  }
   0x2   :  { %243 = vmatprep.subr.bf16.mxu0 %v2647_v0  ;;  %v2650_v3 = vld [vmem:[%s3803_s1 + $0x94] ss:$12 sps:$4 sm:$0xff]   ;;  %v2653_v5 = vld [vmem:[%s3803_s1 + $0x7c] ss:$12 sps:$4 sm:$0xff]   ;;  %v2655_v6 = vld [vmem:[%s3803_s1 + $0x78] ss:$12 sps:$4 sm:$0xff]  }
   0x3   :  { %244 = vmatpush1.bf16.msra.mxu0 %v2649_v2  ;;  %v2656_v7 = vld [vmem:[%s3803_s1 + $0x64] ss:$12 sps:$4 sm:$0xff]   ;;  %v2658_v9 = vld [vmem:[%s3803_s1 + $0x60] ss:$12 sps:$4 sm:$0xff]   ;;  %v2661_v16 = vld [vmem:[%s3803_s1 + $0x48] ss:$12 sps:$4 sm:$0xff]  }
   0x4   :  { %245 = vmatprep.subr.bf16.mxu0 %v2650_v3  ;;  %v2668_v8 = vld [vmem:[%s3803_s1 + $0xb0] ss:$12 sps:$4 sm:$0xff]   ;;  %v2659_v10 = vld [vmem:[%s3803_s1 + $0x4c] ss:$12 sps:$4 sm:$0xff]   ;;  %v42_v12 = vld [vmem:[%s3813_s0] sm:$0xff]  ;;  %501 = vst [vmem:[#allocation2] sm:$0xff] %v2952_v49 }
   0x5   :  { %2519 = vmatprep.subr.bf16.mxu1 %v2668_v8  ;;  %v2672_v11 = vld [vmem:[%s3803_s1 + $0x98] ss:$12 sps:$4 sm:$0xff]   ;;  %v43_v13 = vld [vmem:[%s3813_s0 + $0x8] sm:$0xff]  ;;  %v2662_v17 = vld [vmem:[%s3803_s1 + $0x34] ss:$12 sps:$4 sm:$0xff]   ;;  %502 = vst [vmem:[#allocation2 + $0x8] sm:$0xff] %v2952_v49 }
   0x6   :  { %2520 = vmatpush3.bf16.msra.mxu1 %v2668_v8  ;;  %v58_v14 = vpack.c.bf16 %v43_v13, %v42_v12  ;;  %v2673_v15 = vld [vmem:[%s3803_s1 + $0x80] ss:$12 sps:$4 sm:$0xff]   ;;  %v2674_v18 = vld [vmem:[%s3803_s1 + $0x68] ss:$12 sps:$4 sm:$0xff]   ;;  %v2664_v19 = vld [vmem:[%s3803_s1 + $0x30] ss:$12 sps:$4 sm:$0xff]  }
   0x7   :  { %246 = vmatpush1.bf16.msra.mxu0 %v2652_v4  ;;  %2521 = vmatprep.subr.bf16.mxu1 %v2672_v11  ;;  %v2665_v20 = vld [vmem:[%s3803_s1 + $0x1c] ss:$12 sps:$4 sm:$0xff]   ;;  %v2667_v22 = vld [vmem:[%s3803_s1 + $0x18] ss:$12 sps:$4 sm:$0xff]   ;;  %v2671_v25 = vld [vmem:[%s3803_s1] ss:$12 sps:$4 sm:$0xff]  }
   0x8   :  { %247 = vmatprep.subr.bf16.mxu0 %v2653_v5  ;;  %2535 = vmatprep.mubr.bf16.mxu1 %v58_v14  ;;  %v2675_v21 = vld [vmem:[%s3803_s1 + $0x50] ss:$12 sps:$4 sm:$0xff]   ;;  %v2676_v24 = vld [vmem:[%s3803_s1 + $0x38] ss:$12 sps:$4 sm:$0xff]   ;;  %v2677_v26 = vld [vmem:[%s3803_s1 + $0x20] ss:$12 sps:$4 sm:$0xff]  }
   0x9   :  { %v2669_v23 = vld [vmem:[%s3803_s1 + $0x4] ss:$12 sps:$4 sm:$0xff]   ;;  %v2678_v27 = vld [vmem:[%s3803_s1 + $0x8] ss:$12 sps:$4 sm:$0xff]   ;;  %v45_v29 = vld [vmem:[%s3813_s0 + $0x18] sm:$0xff]  ;;  %v3159_v52 = vshrl.u32 %v100_v51, 7 }
   0xa   :  { %2522 = vmatpush3.bf16.msra.mxu1 %v2672_v11  ;;  %v44_v28 = vld [vmem:[%s3813_s0 + $0x10] sm:$0xff]  ;;  %v46_v31 = vld [vmem:[%s3813_s0 + $0x20] sm:$0xff]  ;;  %v47_v32 = vld [vmem:[%s3813_s0 + $0x28] sm:$0xff] }
   0xb   :  { %248 = vmatpush1.bf16.msra.mxu0 %v2655_v6  ;;  %2523 = vmatprep.subr.bf16.mxu1 %v2673_v15  ;;  %v59_v30 = vpack.c.bf16 %v45_v29, %v44_v28  ;;  %v60_v33 = vpack.c.bf16 %v47_v32, %v46_v31  ;;  %v48_v34 = vld [vmem:[%s3813_s0 + $0x30] sm:$0xff]  ;;  %v49_v35 = vld [vmem:[%s3813_s0 + $0x38] sm:$0xff]  ;;  %v50_v36 = vld [vmem:[%s3813_s0 + $0x40] sm:$0xff]  ;;  %v3162_v53 = vsub.s32 0, %v3159_v52  ;;  %v3168_v55 = vsub.s32 1, %v3159_v52 }
   0xc   :  { %249 = vmatprep.subr.bf16.mxu0 %v2656_v7  ;;  %v51_v37 = vld [vmem:[%s3813_s0 + $0x48] sm:$0xff]  ;;  %v61_v38 = vpack.c.bf16 %v49_v35, %v48_v34  ;;  %v54_v40 = vld [vmem:[%s3813_s0 + $0x60] sm:$0xff]  ;;  %v52_v42 = vld [vmem:[%s3813_s0 + $0x50] sm:$0xff]  ;;  %v3179_v62 = vsub.s32 2, %v3159_v52 }
   0xd   :  { %v62_v39 = vpack.c.bf16 %v51_v37, %v50_v36  ;;  %v55_v41 = vld [vmem:[%s3813_s0 + $0x68] sm:$0xff]  ;;  %v53_v43 = vld [vmem:[%s3813_s0 + $0x58] sm:$0xff]  ;;  %v56_v46 = vld [vmem:[%s3813_s0 + $0x70] sm:$0xff] }
   0xe   :  { %2524 = vmatpush3.bf16.msra.mxu1 %v2673_v15  ;;  %v64_v44 = vpack.c.bf16 %v55_v41, %v54_v40  ;;  %v63_v45 = vpack.c.bf16 %v53_v43, %v52_v42  ;;  %v57_v47 = vld [vmem:[%s3813_s0 + $0x78] sm:$0xff]  ;;  %v3157_v50 = vld [vmem:[%s3814_s4] ss:$0 sm:$0xff] }
   0xf   :  { %250 = vmatpush1.bf16.msra.mxu0 %v2658_v9  ;;  %2525 = vmatprep.subr.bf16.mxu1 %v2674_v18  ;;  %v65_v48 = vpack.c.bf16 %v57_v47, %v56_v46  ;;  %v98_v54 = vld [vmem:[%s3815_s3] sm:$0x7]  ;;  %s3230_s3 = smov 0  }
  0x10   :  { %251 = vmatprep.subr.bf16.mxu0 %v2659_v10  ;;  %v3171_v56 = vrot.slane %v98_v54, %v3162_v53  ;;  %v3174_v57 = vrot.slane %v98_v54, %v3168_v55  ;;  %v3184_v4 = vrot.slane %v98_v54, %v3179_v62 }
  0x12   :  { %2526 = vmatpush3.bf16.msra.mxu1 %v2674_v18 }
  0x13   :  { %252 = vmatpush1.bf16.msra.mxu0 %v2661_v16  ;;  %2527 = vmatprep.subr.bf16.mxu1 %v2675_v21 }
  0x14   :  { %253 = vmatprep.subr.bf16.mxu0 %v2662_v17 }
  0x16   :  { %2528 = vmatpush3.bf16.msra.mxu1 %v2675_v21 }
  0x17   :  { %254 = vmatpush1.bf16.msra.mxu0 %v2664_v19  ;;  %2529 = vmatprep.subr.bf16.mxu1 %v2676_v24 }
  0x18   :  { %255 = vmatprep.subr.bf16.mxu0 %v2665_v20 }
  0x1a   :  { %2530 = vmatpush3.bf16.msra.mxu1 %v2676_v24 }
  0x1b   :  { %256 = vmatpush1.bf16.msra.mxu0 %v2667_v22  ;;  %2531 = vmatprep.subr.bf16.mxu1 %v2677_v26 }
  0x1c   :  { %257 = vmatprep.subr.bf16.mxu0 %v2669_v23 }
  0x1e   :  { %2532 = vmatpush3.bf16.msra.mxu1 %v2677_v26 }
  0x1f   :  { %258 = vmatpush1.bf16.msra.mxu0 %v2671_v25  ;;  %2533 = vmatprep.subr.bf16.mxu1 %v2678_v27 }
  0x22   :  { %276 = vmatmul.mubr.bf16.vlgmr.msra.gmra.mxu0 %v58_v14  ;;  %2534 = vmatpush3.bf16.msra.mxu1 %v2678_v27 }
  0x23   :  { %285 = vmatprep.mubr.bf16.mxu0 %v2951_v1 }
  0x25   :  { %2536 = vmatmul.mubr.bf16.vlgmr.msra.gmra.mxu1 %v59_v30 }
  0x26   :  { %2539 = vmatprep.mubr.bf16.mxu1 %v60_v33 }
  0x2a   :  { %286 = vmatmul.mubr.bf16.gmra.mxu0 %v59_v30 }
  0x2b   :  { %295 = vmatprep.mubr.bf16.mxu0 %v2951_v1 }
  0x2d   :  { %2540 = vmatmul.mubr.bf16.gmra.mxu1 %v61_v38 }
  0x2e   :  { %2543 = vmatprep.mubr.bf16.mxu1 %v62_v39 }
  0x32   :  { %296 = vmatmul.mubr.bf16.gmra.mxu0 %v60_v33 }
  0x33   :  { %305 = vmatprep.mubr.bf16.mxu0 %v2951_v1 }
  0x35   :  { %2544 = vmatmul.mubr.bf16.gmra.mxu1 %v63_v45 }
  0x36   :  { %2547 = vmatprep.mubr.bf16.mxu1 %v64_v44 }
  0x3a   :  { %306 = vmatmul.mubr.bf16.gmra.mxu0 %v61_v38 }
  0x3b   :  { %315 = vmatprep.mubr.bf16.mxu0 %v2951_v1 }
  0x3d   :  { %2548 = vmatmul.mubr.bf16.gmra.mxu1 %v65_v48 }
  0x42   :  { %316 = vmatmul.mubr.bf16.gmra.mxu0 %v62_v39 }
  0x43   :  { %325 = vmatprep.mubr.bf16.mxu0 %v2951_v1 }
  0x4a   :  { %326 = vmatmul.mubr.bf16.gmra.mxu0 %v63_v45 }
  0x4b   :  { %335 = vmatprep.mubr.bf16.mxu0 %v2951_v1 }
  0x52   :  { %336 = vmatmul.mubr.bf16.gmra.mxu0 %v64_v44 }
  0x53   :  { %345 = vmatprep.mubr.bf16.mxu0 %v2951_v1 }
  0x5a   :  { %346 = vmatmul.mubr.bf16.gmra.mxu0 %v65_v48 }
  0xe2   :  { %v277_v58 = vpop.f32.mrf.mxu0 }
  0xe3   :  { %v278_v59 = vadd.f32 %v277_v58, %v3171_v56 }
  0xe4   :  { %v279_v60 = vpop.f32.mrf.mxu0 }
  0xe5   :  { %453 = vst [vmem:[#allocation4] sm:$0xff] %v278_v59  ;;  %v280_v61 = vadd.f32 %v279_v60, %v3174_v57  ;;  %v2537_v8 = vpop.f32.mrf.mxu1 }
  0xe6   :  { %v281_v63 = vpop.f32.mrf.mxu0  ;;  %v399_v10 = vadd.f32 %v2537_v8, %v3184_v4 }
  0xe7   :  { %454 = vst [vmem:[#allocation4 + $0x8] sm:$0xff] %v280_v61  ;;  %v282_v0 = vadd.f32 %v281_v63, %v3171_v56  ;;  %v390_v12 = vpop.f32.mrf.mxu1 }
  0xe8   :  { %v283_v2 = vpop.f32.mrf.mxu0  ;;  %461 = vst [vmem:[#allocation4 + $0x40] sm:$0xff] %v399_v10  ;;  %v391_v14 = vadd.f32 %v390_v12, %v3184_v4 }
  0xe9   :  { %456 = vst [vmem:[#allocation4 + $0x18] sm:$0xff] %v282_v0  ;;  %v284_v3 = vadd.f32 %v283_v2, %v3174_v57  ;;  %v2538_v16 = vpop.f32.mrf.mxu1 }
  0xea   :  { %v287_v5 = vpop.f32.mrf.mxu0  ;;  %455 = vst [vmem:[#allocation4 + $0x10] sm:$0xff] %v391_v14  ;;  %v402_v18 = vadd.f32 %v2538_v16, %v3184_v4 }
  0xeb   :  { %457 = vst [vmem:[#allocation4 + $0x20] sm:$0xff] %v284_v3  ;;  %v288_v6 = vadd.f32 %v287_v5, %v3171_v56  ;;  %v393_v20 = vpop.f32.mrf.mxu1 }
  0xec   :  { %v289_v7 = vpop.f32.mrf.mxu0  ;;  %464 = vst [vmem:[#allocation4 + $0x58] sm:$0xff] %v402_v18  ;;  %v394_v22 = vadd.f32 %v393_v20, %v3184_v4 }
  0xed   :  { %459 = vst [vmem:[#allocation4 + $0x30] sm:$0xff] %v288_v6  ;;  %v290_v9 = vadd.f32 %v289_v7, %v3174_v57  ;;  %v2541_v24 = vpop.f32.mrf.mxu1 }
  0xee   :  { %v291_v11 = vpop.f32.mrf.mxu0  ;;  %458 = vst [vmem:[#allocation4 + $0x28] sm:$0xff] %v394_v22  ;;  %v415_v26 = vadd.f32 %v2541_v24, %v3184_v4 }
  0xef   :  { %460 = vst [vmem:[#allocation4 + $0x38] sm:$0xff] %v290_v9  ;;  %v292_v13 = vadd.f32 %v291_v11, %v3171_v56  ;;  %v406_v28 = vpop.f32.mrf.mxu1 }
  0xf0   :  { %v293_v15 = vpop.f32.mrf.mxu0  ;;  %473 = vst [vmem:[#allocation4 + $0xa0] sm:$0xff] %v415_v26  ;;  %v407_v30 = vadd.f32 %v406_v28, %v3184_v4 }
  0xf1   :  { %462 = vst [vmem:[#allocation4 + $0x48] sm:$0xff] %v292_v13  ;;  %v294_v17 = vadd.f32 %v293_v15, %v3174_v57  ;;  %v2542_v32 = vpop.f32.mrf.mxu1 }
  0xf2   :  { %v297_v19 = vpop.f32.mrf.mxu0  ;;  %467 = vst [vmem:[#allocation4 + $0x70] sm:$0xff] %v407_v30  ;;  %v418_v34 = vadd.f32 %v2542_v32, %v3184_v4 }
  0xf3   :  { %463 = vst [vmem:[#allocation4 + $0x50] sm:$0xff] %v294_v17  ;;  %v298_v21 = vadd.f32 %v297_v19, %v3171_v56  ;;  %v409_v36 = vpop.f32.mrf.mxu1 }
  0xf4   :  { %v299_v23 = vpop.f32.mrf.mxu0  ;;  %476 = vst [vmem:[#allocation4 + $0xb8] sm:$0xff] %v418_v34  ;;  %v410_v38 = vadd.f32 %v409_v36, %v3184_v4 }
  0xf5   :  { %465 = vst [vmem:[#allocation4 + $0x60] sm:$0xff] %v298_v21  ;;  %v300_v25 = vadd.f32 %v299_v23, %v3174_v57  ;;  %v2545_v40 = vpop.f32.mrf.mxu1 }
  0xf6   :  { %v301_v27 = vpop.f32.mrf.mxu0  ;;  %470 = vst [vmem:[#allocation4 + $0x88] sm:$0xff] %v410_v38  ;;  %v431_v42 = vadd.f32 %v2545_v40, %v3184_v4 }
  0xf7   :  { %466 = vst [vmem:[#allocation4 + $0x68] sm:$0xff] %v300_v25  ;;  %v302_v29 = vadd.f32 %v301_v27, %v3171_v56  ;;  %v422_v44 = vpop.f32.mrf.mxu1 }
  0xf8   :  { %v303_v31 = vpop.f32.mrf.mxu0  ;;  %485 = vst [vmem:[#allocation4 + $0x100] sm:$0xff] %v431_v42  ;;  %v423_v46 = vadd.f32 %v422_v44, %v3184_v4 }
  0xf9   :  { %468 = vst [vmem:[#allocation4 + $0x78] sm:$0xff] %v302_v29  ;;  %v304_v33 = vadd.f32 %v303_v31, %v3174_v57  ;;  %v2546_v48 = vpop.f32.mrf.mxu1 }
  0xfa   :  { %v307_v35 = vpop.f32.mrf.mxu0  ;;  %479 = vst [vmem:[#allocation4 + $0xd0] sm:$0xff] %v423_v46  ;;  %v434_v54 = vadd.f32 %v2546_v48, %v3184_v4 }
  0xfb   :  { %469 = vst [vmem:[#allocation4 + $0x80] sm:$0xff] %v304_v33  ;;  %v308_v37 = vadd.f32 %v307_v35, %v3171_v56  ;;  %v425_v59 = vpop.f32.mrf.mxu1 }
  0xfc   :  { %v309_v39 = vpop.f32.mrf.mxu0  ;;  %488 = vst [vmem:[#allocation4 + $0x118] sm:$0xff] %v434_v54  ;;  %v426_v61 = vadd.f32 %v425_v59, %v3184_v4 }
  0xfd   :  { %471 = vst [vmem:[#allocation4 + $0x90] sm:$0xff] %v308_v37  ;;  %v310_v41 = vadd.f32 %v309_v39, %v3174_v57  ;;  %v2549_v0 = vpop.f32.mrf.mxu1 }
  0xfe   :  { %v311_v43 = vpop.f32.mrf.mxu0  ;;  %482 = vst [vmem:[#allocation4 + $0xe8] sm:$0xff] %v426_v61  ;;  %v447_v3 = vadd.f32 %v2549_v0, %v3184_v4 }
  0xff   :  { %472 = vst [vmem:[#allocation4 + $0x98] sm:$0xff] %v310_v41  ;;  %v312_v45 = vadd.f32 %v311_v43, %v3171_v56  ;;  %v438_v6 = vpop.f32.mrf.mxu1 }
 0x100   :  { %v313_v47 = vpop.f32.mrf.mxu0  ;;  %497 = vst [vmem:[#allocation4 + $0x160] sm:$0xff] %v447_v3  ;;  %v439_v8 = vadd.f32 %v438_v6, %v3184_v4 }
 0x101   :  { %474 = vst [vmem:[#allocation4 + $0xa8] sm:$0xff] %v312_v45  ;;  %v314_v51 = vadd.f32 %v313_v47, %v3174_v57  ;;  %v2550_v10 = vpop.f32.mrf.mxu1 }
 0x102   :  { %v317_v58 = vpop.f32.mrf.mxu0  ;;  %491 = vst [vmem:[#allocation4 + $0x130] sm:$0xff] %v439_v8  ;;  %v450_v12 = vadd.f32 %v2550_v10, %v3184_v4 }
 0x103   :  { %475 = vst [vmem:[#allocation4 + $0xb0] sm:$0xff] %v314_v51  ;;  %v318_v60 = vadd.f32 %v317_v58, %v3171_v56  ;;  %v441_v14 = vpop.f32.mrf.mxu1 }
 0x104   :  { %v319_v63 = vpop.f32.mrf.mxu0  ;;  %500 = vst [vmem:[#allocation4 + $0x178] sm:$0xff] %v450_v12  ;;  %v442_v16 = vadd.f32 %v441_v14, %v3184_v4 }
 0x105   :  { %477 = vst [vmem:[#allocation4 + $0xc0] sm:$0xff] %v318_v60  ;;  %v320_v2 = vadd.f32 %v319_v63, %v3174_v57 }
 0x106   :  { %v321_v5 = vpop.f32.mrf.mxu0  ;;  %494 = vst [vmem:[#allocation4 + $0x148] sm:$0xff] %v442_v16 }
 0x107   :  { %478 = vst [vmem:[#allocation4 + $0xc8] sm:$0xff] %v320_v2  ;;  %v322_v7 = vadd.f32 %v321_v5, %v3171_v56 }
 0x108   :  { %v323_v9 = vpop.f32.mrf.mxu0 }
 0x109   :  { %480 = vst [vmem:[#allocation4 + $0xd8] sm:$0xff] %v322_v7  ;;  %v324_v11 = vadd.f32 %v323_v9, %v3174_v57 }
 0x10a   :  { %v327_v13 = vpop.f32.mrf.mxu0 }
 0x10b   :  { %481 = vst [vmem:[#allocation4 + $0xe0] sm:$0xff] %v324_v11  ;;  %v328_v15 = vadd.f32 %v327_v13, %v3171_v56 }
 0x10c   :  { %v329_v17 = vpop.f32.mrf.mxu0 }
 0x10d   :  { %483 = vst [vmem:[#allocation4 + $0xf0] sm:$0xff] %v328_v15  ;;  %v330_v18 = vadd.f32 %v329_v17, %v3174_v57 }
 0x10e   :  { %v331_v19 = vpop.f32.mrf.mxu0 }
 0x10f   :  { %484 = vst [vmem:[#allocation4 + $0xf8] sm:$0xff] %v330_v18  ;;  %v332_v20 = vadd.f32 %v331_v19, %v3171_v56 }
 0x110   :  { %v333_v21 = vpop.f32.mrf.mxu0 }
 0x111   :  { %486 = vst [vmem:[#allocation4 + $0x108] sm:$0xff] %v332_v20  ;;  %v334_v22 = vadd.f32 %v333_v21, %v3174_v57 }
 0x112   :  { %v337_v23 = vpop.f32.mrf.mxu0 }
 0x113   :  { %487 = vst [vmem:[#allocation4 + $0x110] sm:$0xff] %v334_v22  ;;  %v338_v24 = vadd.f32 %v337_v23, %v3171_v56 }
 0x114   :  { %v339_v25 = vpop.f32.mrf.mxu0 }
 0x115   :  { %489 = vst [vmem:[#allocation4 + $0x120] sm:$0xff] %v338_v24  ;;  %v340_v4 = vadd.f32 %v339_v25, %v3174_v57 }
 0x116   :  { %v341_v26 = vpop.f32.mrf.mxu0 }
 0x117   :  { %490 = vst [vmem:[#allocation4 + $0x128] sm:$0xff] %v340_v4  ;;  %v342_v27 = vadd.f32 %v341_v26, %v3171_v56 }
 0x118   :  { %v343_v28 = vpop.f32.mrf.mxu0 }
 0x119   :  { %492 = vst [vmem:[#allocation4 + $0x138] sm:$0xff] %v342_v27  ;;  %v344_v29 = vadd.f32 %v343_v28, %v3174_v57 }
 0x11a   :  { %v347_v30 = vpop.f32.mrf.mxu0 }
 0x11b   :  { %493 = vst [vmem:[#allocation4 + $0x140] sm:$0xff] %v344_v29  ;;  %v348_v31 = vadd.f32 %v347_v30, %v3171_v56 }
 0x11c   :  { %v349_v32 = vpop.f32.mrf.mxu0 }
 0x11d   :  { %495 = vst [vmem:[#allocation4 + $0x150] sm:$0xff] %v348_v31  ;;  %v350_v33 = vadd.f32 %v349_v32, %v3174_v57 }
 0x11e   :  { %v351_v34 = vpop.f32.mrf.mxu0 }
 0x11f   :  { %496 = vst [vmem:[#allocation4 + $0x158] sm:$0xff] %v350_v33  ;;  %v352_v35 = vadd.f32 %v351_v34, %v3171_v56 }
 0x120   :  { %v353_v36 = vpop.f32.mrf.mxu0 }
 0x121   :  { %498 = vst [vmem:[#allocation4 + $0x168] sm:$0xff] %v352_v35  ;;  %v354_v37 = vadd.f32 %v353_v36, %v3174_v57 }
 0x123   :  { %499 = vst [vmem:[#allocation4 + $0x170] sm:$0xff] %v354_v37 }
 0x124 LB: > { %v2679_v38 = vld [vmem:[%s3804_s2 + $0xac] ss:$12 sps:$4 sm:$0xff]   ;;  %v2681_v56 = vld [vmem:[%s3804_s2 + $0xa8] ss:$12 sps:$4 sm:$0xff]   ;;  %v2953_v39 = vmov 0.0   ;;  %v2954_v40 = vmov 0   ;;  %s2945_s3 = sphi %s3230_s3, %s509_s3  }
 0x125   : > { %2551 = vmatprep.subr.bf16.mxu1 %v2953_v39  ;;  %714 = vmatprep.mubr.bf16.mxu0 %v2954_v40  ;;  %v2682_v57 = vld [vmem:[%s3804_s2 + $0x94] ss:$12 sps:$4 sm:$0xff]   ;;  %vm2955_vm0 = vmmov 0   ;;  %v2684_v41 = vld [vmem:[%s3804_s2 + $0x90] ss:$12 sps:$4 sm:$0xff]   ;;  %v3300_v6 = vld [vmem:[#allocation2 + $0x8] sm:$0xff] }
 0x126   : > { %682 = vmatprep.subr.bf16.mxu0 %v2679_v38  ;;  %2567 = vmatprep.mubr.msk.bf16.mxu1 %vm2955_vm0, %v2953_v39  ;;  %v2685_v42 = vld [vmem:[%s3804_s2 + $0x7c] ss:$12 sps:$4 sm:$0xff]   ;;  %v2687_v43 = vld [vmem:[%s3804_s2 + $0x78] ss:$12 sps:$4 sm:$0xff]   ;;  %v2690_v46 = vld [vmem:[%s3804_s2 + $0x60] ss:$12 sps:$4 sm:$0xff]  }
 0x127   : > { %683 = vmatpush1.bf16.msra.mxu0 %v2681_v56  ;;  %v2688_v44 = vld [vmem:[%s3804_s2 + $0x64] ss:$12 sps:$4 sm:$0xff]   ;;  %v2691_v47 = vld [vmem:[%s3804_s2 + $0x4c] ss:$12 sps:$4 sm:$0xff]   ;;  %v2693_v51 = vld [vmem:[%s3804_s2 + $0x48] ss:$12 sps:$4 sm:$0xff]  }
 0x128   : > { %684 = vmatprep.subr.bf16.mxu0 %v2682_v57  ;;  %v2700_v45 = vld [vmem:[%s3804_s2 + $0xb0] ss:$12 sps:$4 sm:$0xff]   ;;  %v2704_v48 = vld [vmem:[%s3804_s2 + $0x98] ss:$12 sps:$4 sm:$0xff]   ;;  %v2694_v54 = vld [vmem:[%s3804_s2 + $0x34] ss:$12 sps:$4 sm:$0xff]  }
 0x129   : > { %2552 = vmatpush3.bf16.msra.mxu1 %v2700_v45  ;;  %v2705_v58 = vld [vmem:[%s3804_s2 + $0x80] ss:$12 sps:$4 sm:$0xff]   ;;  %v2696_v59 = vld [vmem:[%s3804_s2 + $0x30] ss:$12 sps:$4 sm:$0xff]   ;;  %v2706_v61 = vld [vmem:[%s3804_s2 + $0x68] ss:$12 sps:$4 sm:$0xff]  }
 0x12a   : > { %2553 = vmatprep.subr.bf16.mxu1 %v2953_v39  ;;  %v2697_v60 = vld [vmem:[%s3804_s2 + $0x1c] ss:$12 sps:$4 sm:$0xff]   ;;  %v2699_v63 = vld [vmem:[%s3804_s2 + $0x18] ss:$12 sps:$4 sm:$0xff]   ;;  %v2703_v3 = vld [vmem:[%s3804_s2] ss:$12 sps:$4 sm:$0xff]  }
 0x12b   : > { %685 = vmatpush1.bf16.msra.mxu0 %v2684_v41  ;;  %v2701_v0 = vld [vmem:[%s3804_s2 + $0x4] ss:$12 sps:$4 sm:$0xff]   ;;  %v2709_v9 = vld [vmem:[%s3804_s2 + $0x20] ss:$12 sps:$4 sm:$0xff]   ;;  %v2710_v10 = vld [vmem:[%s3804_s2 + $0x8] ss:$12 sps:$4 sm:$0xff]  }
 0x12c   : > { %686 = vmatprep.subr.bf16.mxu0 %v2685_v42  ;;  %v2707_v2 = vld [vmem:[%s3804_s2 + $0x50] ss:$12 sps:$4 sm:$0xff]   ;;  %v3298_v5 = vld [vmem:[#allocation2] sm:$0xff]  ;;  %s2459_s17 = smul.u32 48, %s2945_s3  ;;  %s2462_s19 = sshll.u32 %s2945_s3, 3 }
 0x12d   : > { %2554 = vmatpush3.bf16.msra.mxu1 %v2704_v48  ;;  %v2708_v7 = vld [vmem:[%s3804_s2 + $0x38] ss:$12 sps:$4 sm:$0xff]   ;;  %v521_v8 = vpack.c.bf16 %v3300_v6, %v3298_v5  ;;  %s828_s20 = scalar_lea.vmem [#allocation5], %s2462_s19  ;;  %s509_s3 = sadd.s32 1, %s2945_s3  }
 0x12e   : > { %2555 = vmatprep.subr.bf16.mxu1 %v2953_v39  ;;  %s3314_s18 = scalar_lea.vmem [#allocation4], %s2459_s17  ;;  %p506_p0 = scmp.ge.s32.totalorder %s509_s3, 8  }
 0x12f   : > { %687 = vmatpush1.bf16.msra.mxu0 %v2687_v43  ;;  %v515_v11 = vld [vmem:[%s3314_s18] sm:$0xff]  ;;  %v518_v15 = vld [vmem:[%s3314_s18 + $0x18] sm:$0xff]  ;;  %v516_v17 = vld [vmem:[%s3314_s18 + $0x8] sm:$0xff]  ;;  %1330 = vst [vmem:[#allocation3 + $0x8] sm:$0xff] (%p506_p0), %v2952_v49 }
 0x130   : > { %688 = vmatprep.subr.bf16.mxu0 %v2688_v44  ;;  %v519_v22 = vld [vmem:[%s3314_s18 + $0x20] sm:$0xff]  ;;  %v520_v43 = vld [vmem:[%s3314_s18 + $0x28] sm:$0xff]  ;;  %1331 = vst [vmem:[#allocation3] sm:$0xff] (%p506_p0), %v2952_v49 }
 0x131   : > { %2556 = vmatpush3.bf16.msra.mxu1 %v2705_v58  ;;  %v2739_v49 = vld [vmem:[%s3805_s5 + $0x78] ss:$12 sps:$4 sm:$0xff] (%p506_p0)  }
 0x132   : > { %2557 = vmatprep.subr.bf16.mxu1 %v2953_v39 }
 0x133   : > { %689 = vmatpush1.bf16.msra.mxu0 %v2690_v46 }
 0x134   : > { %690 = vmatprep.subr.bf16.mxu0 %v2691_v47 }
 0x135   : > { %2558 = vmatpush3.bf16.msra.mxu1 %v2706_v61 }
 0x136   : > { %2559 = vmatprep.subr.bf16.mxu1 %v2953_v39 }
 0x137   : > { %691 = vmatpush1.bf16.msra.mxu0 %v2693_v51 }
 0x138   : > { %692 = vmatprep.subr.bf16.mxu0 %v2694_v54 }
 0x139   : > { %2560 = vmatpush3.bf16.msra.mxu1 %v2707_v2 }
 0x13a   : > { %2561 = vmatprep.subr.bf16.mxu1 %v2953_v39 }
 0x13b   : > { %693 = vmatpush1.bf16.msra.mxu0 %v2696_v59 }
 0x13c   : > { %694 = vmatprep.subr.bf16.mxu0 %v2697_v60 }
 0x13d   : > { %2562 = vmatpush3.bf16.msra.mxu1 %v2708_v7  ;;  %v2734_v7 = vld [vmem:[%s3805_s5 + $0x94] ss:$12 sps:$4 sm:$0xff] (%p506_p0)  }
 0x13e   : > { %2563 = vmatprep.subr.bf16.mxu1 %v2953_v39 }
 0x13f   : > { %695 = vmatpush1.bf16.msra.mxu0 %v2699_v63 }
 0x140   : > { %696 = vmatprep.subr.bf16.mxu0 %v2701_v0 }
 0x141   : > { %2564 = vmatpush3.bf16.msra.mxu1 %v2709_v9  ;;  %v2740_v9 = vld [vmem:[%s3805_s5 + $0x64] ss:$12 sps:$4 sm:$0xff] (%p506_p0)  }
 0x142   : > { %2565 = vmatprep.subr.bf16.mxu1 %v2953_v39  ;;  %v517_v39 = vld [vmem:[%s3314_s18 + $0x10] sm:$0xff] }
 0x143   : > { %697 = vmatpush1.bf16.msra.mxu0 %v2703_v3 }
 0x145   : > { %2566 = vmatpush3.bf16.msra.mxu1 %v2710_v10  ;;  %v2752_v10 = vld [vmem:[%s3805_s5 + $0xb0] ss:$12 sps:$4 sm:$0xff] (%p506_p0)  }
 0x146   : > { %715 = vmatmul.mubr.bf16.vlgmr.msra.gmra.mxu0 %v521_v8  ;;  %2571 = vmatprep.subr.bf16.mxu1 (%p506_p0), %v2752_v10 }
 0x147   :  { %1104 = vmatprep.mubr.bf16.mxu0 (%p506_p0), %v2951_v1 }
 0x148   : > { %2568 = vmatmul.mubr.bf16.vlgmr.msra.gmra.mxu1 %v521_v8  ;;  %v2737_v8 = vld [vmem:[%s3805_s5 + $0x7c] ss:$12 sps:$4 sm:$0xff] (%p506_p0)  }
 0x149   :  { %2572 = vmatpush3.bf16.msra.mxu1 (%p506_p0), %v2752_v10 }
 0x206   : > { %v716_v12 = vpop.f32.mrf.mxu0 }
 0x207   : > { %v766_v13 = vadd.f32 %v716_v12, %v515_v11  ;;  %v2742_v11 = vld [vmem:[%s3805_s5 + $0x60] ss:$12 sps:$4 sm:$0xff] (%p506_p0)  }
 0x208   : > { %v718_v14 = vpop.f32.mrf.mxu0  ;;  %v759_v24 = vpop.f32.mrf.mxu1  ;;  %v2743_v12 = vld [vmem:[%s3805_s5 + $0x4c] ss:$12 sps:$4 sm:$0xff] (%p506_p0)  }
 0x209   : > { %v2324_v16 = vmul.f32 -1.442695, %v766_v13  ;;  %v780_v20 = vadd.f32 %v718_v14, %v516_v17  ;;  %v800_v37 = vadd.f32 %v3157_v50, %v759_v24  ;;  %v2756_v13 = vld [vmem:[%s3805_s5 + $0x98] ss:$12 sps:$4 sm:$0xff] (%p506_p0)   ;;  %v2746_v17 = vld [vmem:[%s3805_s5 + $0x34] ss:$12 sps:$4 sm:$0xff] (%p506_p0)  }
 0x20a   : > { %v720_v18 = vpop.f32.mrf.mxu0  ;;  %v2569_v26 = vpop.f32.mrf.mxu1  ;;  %2573 = vmatprep.subr.bf16.mxu1 (%p506_p0), %v2756_v13  ;;  %v2762_v24 = vld [vmem:[%s3805_s5 + $0x38] ss:$12 sps:$4 sm:$0xff] (%p506_p0)  }
 0x20b   : > { %2711 = vpow2.f32 %v2324_v16  ;;  %v767_v19 = vadd.f32 %v720_v18, %v518_v15  ;;  %v2326_v4 = vmul.f32 -1.442695, %v780_v20  ;;  %v2758_v15 = vld [vmem:[%s3805_s5 + $0x80] ss:$12 sps:$4 sm:$0xff] (%p506_p0)   ;;  %v2745_v16 = vld [vmem:[%s3805_s5 + $0x48] ss:$12 sps:$4 sm:$0xff] (%p506_p0)   ;;  %2574 = vmatpush3.bf16.msra.mxu1 (%p506_p0), %v2756_v13 }
 0x20c   : > { %v722_v23 = vpop.f32.mrf.mxu0  ;;  %v762_v27 = vpop.f32.mrf.mxu1  ;;  %2575 = vmatprep.subr.bf16.mxu1 (%p506_p0), %v2758_v15  ;;  %v2759_v18 = vld [vmem:[%s3805_s5 + $0x68] ss:$12 sps:$4 sm:$0xff] (%p506_p0)  }
 0x20d   : > { %v2325_v21 = vmul.f32 -1.442695, %v767_v19  ;;  %v781_v25 = vadd.f32 %v722_v23, %v519_v22  ;;  %v801_v41 = vadd.f32 %v3157_v50, %v762_v27  ;;  %v2736_v50 = vld [vmem:[%s3805_s5 + $0x90] ss:$12 sps:$4 sm:$0xff] (%p506_p0)   ;;  %v2751_v22 = vld [vmem:[%s3805_s5 + $0x18] ss:$12 sps:$4 sm:$0xff] (%p506_p0)  }
 0x20e   : > { %v2570_v29 = vpop.f32.mrf.mxu1  ;;  %v2748_v19 = vld [vmem:[%s3805_s5 + $0x30] ss:$12 sps:$4 sm:$0xff] (%p506_p0)   ;;  %v2765_v26 = vld [vmem:[%s3805_s5 + $0x8] ss:$12 sps:$4 sm:$0xff] (%p506_p0)  }
 0x20f   : > { %2713 = vpow2.f32 %v2325_v21  ;;  %v2327_v28 = vmul.f32 -1.442695, %v781_v25  ;;  %v2749_v20 = vld [vmem:[%s3805_s5 + $0x1c] ss:$12 sps:$4 sm:$0xff] (%p506_p0)   ;;  %2576 = vmatpush3.bf16.msra.mxu1 (%p506_p0), %v2758_v15  ;;  %v2753_v23 = vld [vmem:[%s3805_s5 + $0x4] ss:$12 sps:$4 sm:$0xff] (%p506_p0)  }
 0x210   : > { %2715 = vpow2.f32 %v2326_v4  ;;  %2577 = vmatprep.subr.bf16.mxu1 (%p506_p0), %v2759_v18  ;;  %v2761_v21 = vld [vmem:[%s3805_s5 + $0x50] ss:$12 sps:$4 sm:$0xff] (%p506_p0)   ;;  %v2755_v25 = vld [vmem:[%s3805_s5] ss:$12 sps:$4 sm:$0xff] (%p506_p0)  }
 0x211   : > { %2717 = vpow2.f32 %v2327_v28  ;;  %v2764_v4 = vld [vmem:[%s3805_s5 + $0x20] ss:$12 sps:$4 sm:$0xff] (%p506_p0)  }
 0x213   :  { %2578 = vmatpush3.bf16.msra.mxu1 (%p506_p0), %v2759_v18 }
 0x214   :  { %2579 = vmatprep.subr.bf16.mxu1 (%p506_p0), %v2761_v21 }
 0x217   :  { %2580 = vmatpush3.bf16.msra.mxu1 (%p506_p0), %v2761_v21 }
 0x218   : > { %v2712_v30 = vpop.eup %2711  ;;  %2581 = vmatprep.subr.bf16.mxu1 (%p506_p0), %v2762_v24 }
 0x219   : > { %v774_v31 = vadd.f32 1.0, %v2712_v30 }
 0x21b   : > { %2719 = vrcp.f32 %v774_v31  ;;  %2582 = vmatpush3.bf16.msra.mxu1 (%p506_p0), %v2762_v24 }
 0x21c   : > { %v2714_v32 = vpop.eup %2713  ;;  %2583 = vmatprep.subr.bf16.mxu1 (%p506_p0), %v2764_v4 }
 0x21d   : > { %v775_v33 = vadd.f32 1.0, %v2714_v32  ;;  %v2716_v34 = vpop.eup %2715 }
 0x21e   : > { %v2718_v35 = vpop.eup %2717  ;;  %v788_v36 = vadd.f32 1.0, %v2716_v34  ;;  %v3415_v34 = vld [vmem:[%s3808_s8] ss:$0 sm:$0xff] (%p506_p0) }
 0x21f   : > { %2721 = vrcp.f32 %v775_v33  ;;  %v789_v56 = vadd.f32 1.0, %v2718_v35  ;;  %2584 = vmatpush3.bf16.msra.mxu1 (%p506_p0), %v2764_v4  ;;  %v879_v35 = vld [vmem:[%s3807_s7] sm:$0x7] (%p506_p0)  ;;  %s3477_s7 = smov (%p506_p0), 0  }
 0x220   : > { %2723 = vrcp.f32 %v788_v36  ;;  %2585 = vmatprep.subr.bf16.mxu1 (%p506_p0), %v2765_v26  ;;  %v3421_v36 = vrot.slane (%p506_p0), %v879_v35, %v3162_v53 }
 0x221   : > { %2725 = vrcp.f32 %v789_v56 }
 0x223   :  { %2586 = vmatpush3.bf16.msra.mxu1 (%p506_p0), %v2765_v26 }
 0x228   : > { %v2720_v38 = vpop.eup %2719 }
 0x229   : > { %v802_v40 = vmul.f32 %v2720_v38, %v800_v37  ;;  %v3424_v37 = vrot.slane (%p506_p0), %v879_v35, %v3168_v55 }
 0x22b   : > { %v804_v57 = vadd.f32 %v802_v40, %v517_v39 }
 0x22c   : > { %v2722_v42 = vpop.eup %2721 }
 0x22d   : > { %2727 = vtanh.f32 %v804_v57  ;;  %v803_v44 = vmul.f32 %v2722_v42, %v801_v41  ;;  %v2724_v46 = vpop.eup %2723 }
 0x22e   : > { %v2726_v47 = vpop.eup %2725  ;;  %v808_v48 = vsub.f32 1.0, %v2724_v46  ;;  %v812_v54 = vmul.f32 %v2724_v46, %v3298_v5  ;;  %v2731_v5 = vld [vmem:[%s3805_s5 + $0xac] ss:$12 sps:$4 sm:$0xff] (%p506_p0)  }
 0x22f   : > { %v805_v45 = vadd.f32 %v803_v44, %v520_v43  ;;  %v809_v59 = vsub.f32 1.0, %v2726_v47  ;;  %v813_v63 = vmul.f32 %v2726_v47, %v3300_v6  ;;  %v2733_v6 = vld [vmem:[%s3805_s5 + $0xa8] ss:$12 sps:$4 sm:$0xff] (%p506_p0)   ;;  %1072 = vmatprep.subr.bf16.mxu0 (%p506_p0), %v2731_v5  ;;  %v3431_v44 = vrot.slane (%p506_p0), %v879_v35, %v3179_v62 }
 0x230   :  { %1073 = vmatpush1.bf16.msra.mxu0 (%p506_p0), %v2733_v6 }
 0x231   : > { %2729 = vtanh.f32 %v805_v45  ;;  %1074 = vmatprep.subr.bf16.mxu0 (%p506_p0), %v2734_v7 }
 0x234   :  { %1075 = vmatpush1.bf16.msra.mxu0 (%p506_p0), %v2736_v50 }
 0x235   :  { %1076 = vmatprep.subr.bf16.mxu0 (%p506_p0), %v2737_v8 }
 0x238   :  { %1077 = vmatpush1.bf16.msra.mxu0 (%p506_p0), %v2739_v49 }
 0x239   :  { %1078 = vmatprep.subr.bf16.mxu0 (%p506_p0), %v2740_v9 }
 0x23a   : > { %v2728_v51 = vpop.eup %2727 }
 0x23b   : > { %v810_v58 = vmul.f32 %v2728_v51, %v808_v48 }
 0x23c   :  { %1079 = vmatpush1.bf16.msra.mxu0 (%p506_p0), %v2742_v11 }
 0x23d   : > { %v814_v60 = vadd.f32 %v812_v54, %v810_v58  ;;  %1080 = vmatprep.subr.bf16.mxu0 (%p506_p0), %v2743_v12 }
 0x23e   : > { %v2730_v61 = vpop.eup %2729 }
 0x23f   : > { %816 = vst [vmem:[#allocation2] sm:$0xff] %v814_v60  ;;  %v811_v0 = vmul.f32 %v2730_v61, %v809_v59 }
 0x240   :  { %1081 = vmatpush1.bf16.msra.mxu0 (%p506_p0), %v2745_v16 }
 0x241   : > { %v815_v2 = vadd.f32 %v813_v63, %v811_v0  ;;  %508 = sbr.rel (!%p506_p0) target bundleno = 292 (0x124), region = 85  ;;  %1082 = vmatprep.subr.bf16.mxu0 (%p506_p0), %v2746_v17 }
 0x243   : > { %817 = vst [vmem:[#allocation2 + $0x8] sm:$0xff] %v815_v2  ;;  %v2467_v3 = vpack.c.bf16 %v815_v2, %v814_v60 }
 0x244   :  { %1083 = vmatpush1.bf16.msra.mxu0 (%p506_p0), %v2748_v19 }
 0x245   : > { %2468 = vst [vmem:[%s828_s20] sm:$0xff] %v2467_v3   ;;  %1084 = vmatprep.subr.bf16.mxu0 (%p506_p0), %v2749_v20 }
 0x248   :  { %1085 = vmatpush1.bf16.msra.mxu0 %v2751_v22 }
 0x249   :  { %1086 = vmatprep.subr.bf16.mxu0 %v2753_v23 }
 0x24c   :  { %v2757_v14 = vld [vmem:[#allocation5] sm:$0xff]   ;;  %1087 = vmatpush1.bf16.msra.mxu0 %v2755_v25  ;;  %v2760_v27 = vld [vmem:[#allocation5 + $0x8] sm:$0xff]   ;;  %v2763_v28 = vld [vmem:[#allocation5 + $0x10] sm:$0xff]  }
 0x24d   :  { %2587 = vmatprep.mubr.bf16.mxu1 %v2757_v14  ;;  %v2766_v29 = vld [vmem:[#allocation5 + $0x18] sm:$0xff]   ;;  %v2767_v30 = vld [vmem:[#allocation5 + $0x20] sm:$0xff]   ;;  %v2769_v31 = vld [vmem:[#allocation5 + $0x30] sm:$0xff]  }
 0x24e   :  { %2588 = vmatmul.mubr.bf16.vlgmr.msra.gmra.mxu1 %v2760_v27  ;;  %v2768_v32 = vld [vmem:[#allocation5 + $0x28] sm:$0xff]   ;;  %v2770_v33 = vld [vmem:[#allocation5 + $0x38] sm:$0xff]  }
 0x24f   :  { %1105 = vmatmul.mubr.bf16.vlgmr.msra.gmra.mxu0 %v2757_v14  ;;  %2591 = vmatprep.mubr.bf16.mxu1 %v2763_v28 }
 0x250   :  { %1114 = vmatprep.mubr.bf16.mxu0 %v2951_v1 }
 0x256   :  { %2592 = vmatmul.mubr.bf16.gmra.mxu1 %v2766_v29 }
 0x257   :  { %1115 = vmatmul.mubr.bf16.gmra.mxu0 %v2760_v27  ;;  %2595 = vmatprep.mubr.bf16.mxu1 %v2767_v30 }
 0x258   :  { %1124 = vmatprep.mubr.bf16.mxu0 %v2951_v1 }
 0x25e   :  { %2596 = vmatmul.mubr.bf16.gmra.mxu1 %v2768_v32 }
 0x25f   :  { %1125 = vmatmul.mubr.bf16.gmra.mxu0 %v2763_v28  ;;  %2599 = vmatprep.mubr.bf16.mxu1 %v2769_v31 }
 0x260   :  { %1134 = vmatprep.mubr.bf16.mxu0 %v2951_v1 }
 0x266   :  { %2600 = vmatmul.mubr.bf16.gmra.mxu1 %v2770_v33 }
 0x267   :  { %1135 = vmatmul.mubr.bf16.gmra.mxu0 %v2766_v29 }
 0x268   :  { %1144 = vmatprep.mubr.bf16.mxu0 %v2951_v1 }
 0x26f   :  { %1145 = vmatmul.mubr.bf16.gmra.mxu0 %v2767_v30 }
 0x270   :  { %1154 = vmatprep.mubr.bf16.mxu0 %v2951_v1 }
 0x277   :  { %1155 = vmatmul.mubr.bf16.gmra.mxu0 %v2768_v32 }
 0x278   :  { %1164 = vmatprep.mubr.bf16.mxu0 %v2951_v1 }
 0x27f   :  { %1165 = vmatmul.mubr.bf16.gmra.mxu0 %v2769_v31 }
 0x280   :  { %1174 = vmatprep.mubr.bf16.mxu0 %v2951_v1 }
 0x287   :  { %1175 = vmatmul.mubr.bf16.gmra.mxu0 %v2770_v33 }
 0x30e   :  { %v2589_v48 = vpop.f32.mrf.mxu1 }
 0x30f   :  { %v1106_v38 = vpop.f32.mrf.mxu0  ;;  %v1228_v54 = vadd.f32 %v2589_v48, %v3431_v44 }
 0x310   :  { %v1107_v56 = vadd.f32 %v1106_v38, %v3421_v36  ;;  %v1219_v59 = vpop.f32.mrf.mxu1 }
 0x311   :  { %v1108_v39 = vpop.f32.mrf.mxu0  ;;  %1290 = vst [vmem:[#allocation4 + $0x40] sm:$0xff] %v1228_v54  ;;  %v1220_v61 = vadd.f32 %v1219_v59, %v3431_v44 }
 0x312   :  { %1282 = vst [vmem:[#allocation4] sm:$0xff] %v1107_v56  ;;  %v1109_v40 = vadd.f32 %v1108_v39, %v3424_v37  ;;  %v2590_v0 = vpop.f32.mrf.mxu1 }
 0x313   :  { %v1110_v57 = vpop.f32.mrf.mxu0  ;;  %1284 = vst [vmem:[#allocation4 + $0x10] sm:$0xff] %v1220_v61  ;;  %v1231_v3 = vadd.f32 %v2590_v0, %v3431_v44 }
 0x314   :  { %1283 = vst [vmem:[#allocation4 + $0x8] sm:$0xff] %v1109_v40  ;;  %v1111_v41 = vadd.f32 %v1110_v57, %v3421_v36  ;;  %v1222_v6 = vpop.f32.mrf.mxu1 }
 0x315   :  { %v1112_v42 = vpop.f32.mrf.mxu0  ;;  %1293 = vst [vmem:[#allocation4 + $0x58] sm:$0xff] %v1231_v3  ;;  %v1223_v50 = vadd.f32 %v1222_v6, %v3431_v44 }
 0x316   :  { %1285 = vst [vmem:[#allocation4 + $0x18] sm:$0xff] %v1111_v41  ;;  %v1113_v43 = vadd.f32 %v1112_v42, %v3424_v37  ;;  %v2593_v49 = vpop.f32.mrf.mxu1 }
 0x317   :  { %v1116_v45 = vpop.f32.mrf.mxu0  ;;  %1287 = vst [vmem:[#allocation4 + $0x28] sm:$0xff] %v1223_v50  ;;  %v1244_v10 = vadd.f32 %v2593_v49, %v3431_v44 }
 0x318   :  { %1286 = vst [vmem:[#allocation4 + $0x20] sm:$0xff] %v1113_v43  ;;  %v1117_v46 = vadd.f32 %v1116_v45, %v3421_v36  ;;  %v1235_v12 = vpop.f32.mrf.mxu1 }
 0x319   :  { %v1118_v47 = vpop.f32.mrf.mxu0  ;;  %1302 = vst [vmem:[#allocation4 + $0xa0] sm:$0xff] %v1244_v10  ;;  %v1236_v14 = vadd.f32 %v1235_v12, %v3431_v44 }
 0x31a   :  { %1288 = vst [vmem:[#allocation4 + $0x30] sm:$0xff] %v1117_v46  ;;  %v1119_v51 = vadd.f32 %v1118_v47, %v3424_v37  ;;  %v2594_v16 = vpop.f32.mrf.mxu1 }
 0x31b   :  { %v1120_v58 = vpop.f32.mrf.mxu0  ;;  %1296 = vst [vmem:[#allocation4 + $0x70] sm:$0xff] %v1236_v14  ;;  %v1247_v18 = vadd.f32 %v2594_v16, %v3431_v44 }
 0x31c   :  { %1289 = vst [vmem:[#allocation4 + $0x38] sm:$0xff] %v1119_v51  ;;  %v1121_v60 = vadd.f32 %v1120_v58, %v3421_v36  ;;  %v1238_v20 = vpop.f32.mrf.mxu1 }
 0x31d   :  { %v1122_v63 = vpop.f32.mrf.mxu0  ;;  %1305 = vst [vmem:[#allocation4 + $0xb8] sm:$0xff] %v1247_v18  ;;  %v1239_v22 = vadd.f32 %v1238_v20, %v3431_v44 }
 0x31e   :  { %1291 = vst [vmem:[#allocation4 + $0x48] sm:$0xff] %v1121_v60  ;;  %v1123_v2 = vadd.f32 %v1122_v63, %v3424_v37  ;;  %v2597_v24 = vpop.f32.mrf.mxu1 }
 0x31f   :  { %v1126_v5 = vpop.f32.mrf.mxu0  ;;  %1299 = vst [vmem:[#allocation4 + $0x88] sm:$0xff] %v1239_v22  ;;  %v1260_v4 = vadd.f32 %v2597_v24, %v3431_v44 }
 0x320   :  { %1292 = vst [vmem:[#allocation4 + $0x50] sm:$0xff] %v1123_v2  ;;  %v1127_v7 = vadd.f32 %v1126_v5, %v3421_v36  ;;  %v1251_v27 = vpop.f32.mrf.mxu1 }
 0x321   :  { %v1128_v8 = vpop.f32.mrf.mxu0  ;;  %1314 = vst [vmem:[#allocation4 + $0x100] sm:$0xff] %v1260_v4  ;;  %v1252_v29 = vadd.f32 %v1251_v27, %v3431_v44 }
 0x322   :  { %1294 = vst [vmem:[#allocation4 + $0x60] sm:$0xff] %v1127_v7  ;;  %v1129_v9 = vadd.f32 %v1128_v8, %v3424_v37  ;;  %v2598_v31 = vpop.f32.mrf.mxu1 }
 0x323   :  { %v1130_v11 = vpop.f32.mrf.mxu0  ;;  %1308 = vst [vmem:[#allocation4 + $0xd0] sm:$0xff] %v1252_v29  ;;  %v1263_v33 = vadd.f32 %v2598_v31, %v3431_v44 }
 0x324   :  { %1295 = vst [vmem:[#allocation4 + $0x68] sm:$0xff] %v1129_v9  ;;  %v1131_v13 = vadd.f32 %v1130_v11, %v3421_v36  ;;  %v1254_v38 = vpop.f32.mrf.mxu1 }
 0x325   :  { %v1132_v15 = vpop.f32.mrf.mxu0  ;;  %1317 = vst [vmem:[#allocation4 + $0x118] sm:$0xff] %v1263_v33  ;;  %v1255_v39 = vadd.f32 %v1254_v38, %v3431_v44 }
 0x326   :  { %1297 = vst [vmem:[#allocation4 + $0x78] sm:$0xff] %v1131_v13  ;;  %v1133_v17 = vadd.f32 %v1132_v15, %v3424_v37  ;;  %v2601_v57 = vpop.f32.mrf.mxu1 }
 0x327   :  { %v1136_v19 = vpop.f32.mrf.mxu0  ;;  %1311 = vst [vmem:[#allocation4 + $0xe8] sm:$0xff] %v1255_v39  ;;  %v1276_v42 = vadd.f32 %v2601_v57, %v3431_v44 }
 0x328   :  { %1298 = vst [vmem:[#allocation4 + $0x80] sm:$0xff] %v1133_v17  ;;  %v1137_v21 = vadd.f32 %v1136_v19, %v3421_v36  ;;  %v1267_v45 = vpop.f32.mrf.mxu1 }
 0x329   :  { %v1138_v23 = vpop.f32.mrf.mxu0  ;;  %1326 = vst [vmem:[#allocation4 + $0x160] sm:$0xff] %v1276_v42  ;;  %v1268_v47 = vadd.f32 %v1267_v45, %v3431_v44 }
 0x32a   :  { %1300 = vst [vmem:[#allocation4 + $0x90] sm:$0xff] %v1137_v21  ;;  %v1139_v25 = vadd.f32 %v1138_v23, %v3424_v37  ;;  %v2602_v51 = vpop.f32.mrf.mxu1 }
 0x32b   :  { %v1140_v26 = vpop.f32.mrf.mxu0  ;;  %1320 = vst [vmem:[#allocation4 + $0x130] sm:$0xff] %v1268_v47  ;;  %v1279_v58 = vadd.f32 %v2602_v51, %v3431_v44 }
 0x32c   :  { %1301 = vst [vmem:[#allocation4 + $0x98] sm:$0xff] %v1139_v25  ;;  %v1141_v28 = vadd.f32 %v1140_v26, %v3421_v36  ;;  %v1270_v60 = vpop.f32.mrf.mxu1 }
 0x32d   :  { %v1142_v30 = vpop.f32.mrf.mxu0  ;;  %1329 = vst [vmem:[#allocation4 + $0x178] sm:$0xff] %v1279_v58  ;;  %v1271_v63 = vadd.f32 %v1270_v60, %v3431_v44 }
 0x32e   :  { %1303 = vst [vmem:[#allocation4 + $0xa8] sm:$0xff] %v1141_v28  ;;  %v1143_v32 = vadd.f32 %v1142_v30, %v3424_v37 }
 0x32f   :  { %v1146_v35 = vpop.f32.mrf.mxu0  ;;  %1323 = vst [vmem:[#allocation4 + $0x148] sm:$0xff] %v1271_v63 }
 0x330   :  { %1304 = vst [vmem:[#allocation4 + $0xb0] sm:$0xff] %v1143_v32  ;;  %v1147_v56 = vadd.f32 %v1146_v35, %v3421_v36 }
 0x331   :  { %v1148_v40 = vpop.f32.mrf.mxu0 }
 0x332   :  { %1306 = vst [vmem:[#allocation4 + $0xc0] sm:$0xff] %v1147_v56  ;;  %v1149_v41 = vadd.f32 %v1148_v40, %v3424_v37 }
 0x333   :  { %v1150_v43 = vpop.f32.mrf.mxu0 }
 0x334   :  { %1307 = vst [vmem:[#allocation4 + $0xc8] sm:$0xff] %v1149_v41  ;;  %v1151_v46 = vadd.f32 %v1150_v43, %v3421_v36 }
 0x335   :  { %v1152_v48 = vpop.f32.mrf.mxu0 }
 0x336   :  { %1309 = vst [vmem:[#allocation4 + $0xd8] sm:$0xff] %v1151_v46  ;;  %v1153_v54 = vadd.f32 %v1152_v48, %v3424_v37 }
 0x337   :  { %v1156_v59 = vpop.f32.mrf.mxu0 }
 0x338   :  { %1310 = vst [vmem:[#allocation4 + $0xe0] sm:$0xff] %v1153_v54  ;;  %v1157_v61 = vadd.f32 %v1156_v59, %v3421_v36 }
 0x339   :  { %v1158_v0 = vpop.f32.mrf.mxu0 }
 0x33a   :  { %1312 = vst [vmem:[#allocation4 + $0xf0] sm:$0xff] %v1157_v61  ;;  %v1159_v2 = vadd.f32 %v1158_v0, %v3424_v37 }
 0x33b   :  { %v1160_v3 = vpop.f32.mrf.mxu0 }
 0x33c   :  { %1313 = vst [vmem:[#allocation4 + $0xf8] sm:$0xff] %v1159_v2  ;;  %v1161_v5 = vadd.f32 %v1160_v3, %v3421_v36 }
 0x33d   :  { %v1162_v6 = vpop.f32.mrf.mxu0 }
 0x33e   :  { %1315 = vst [vmem:[#allocation4 + $0x108] sm:$0xff] %v1161_v5  ;;  %v1163_v7 = vadd.f32 %v1162_v6, %v3424_v37 }
 0x33f   :  { %v1166_v50 = vpop.f32.mrf.mxu0 }
 0x340   :  { %1316 = vst [vmem:[#allocation4 + $0x110] sm:$0xff] %v1163_v7  ;;  %v1167_v8 = vadd.f32 %v1166_v50, %v3421_v36 }
 0x341   :  { %v1168_v49 = vpop.f32.mrf.mxu0 }
 0x342   :  { %1318 = vst [vmem:[#allocation4 + $0x120] sm:$0xff] %v1167_v8  ;;  %v1169_v44 = vadd.f32 %v1168_v49, %v3424_v37 }
 0x343   :  { %v1170_v9 = vpop.f32.mrf.mxu0 }
 0x344   :  { %1319 = vst [vmem:[#allocation4 + $0x128] sm:$0xff] %v1169_v44  ;;  %v1171_v10 = vadd.f32 %v1170_v9, %v3421_v36 }
 0x345   :  { %v1172_v11 = vpop.f32.mrf.mxu0 }
 0x346   :  { %1321 = vst [vmem:[#allocation4 + $0x138] sm:$0xff] %v1171_v10  ;;  %v1173_v12 = vadd.f32 %v1172_v11, %v3424_v37 }
 0x347   :  { %v1176_v13 = vpop.f32.mrf.mxu0 }
 0x348   :  { %1322 = vst [vmem:[#allocation4 + $0x140] sm:$0xff] %v1173_v12  ;;  %v1177_v14 = vadd.f32 %v1176_v13, %v3421_v36 }
 0x349   :  { %v1178_v15 = vpop.f32.mrf.mxu0 }
 0x34a   :  { %1324 = vst [vmem:[#allocation4 + $0x150] sm:$0xff] %v1177_v14  ;;  %v1179_v16 = vadd.f32 %v1178_v15, %v3424_v37 }
 0x34b   :  { %v1180_v17 = vpop.f32.mrf.mxu0 }
 0x34c   :  { %1325 = vst [vmem:[#allocation4 + $0x158] sm:$0xff] %v1179_v16  ;;  %v1181_v18 = vadd.f32 %v1180_v17, %v3421_v36 }
 0x34d   :  { %v1182_v19 = vpop.f32.mrf.mxu0 }
 0x34e   :  { %1327 = vst [vmem:[#allocation4 + $0x168] sm:$0xff] %v1181_v18  ;;  %v1183_v20 = vadd.f32 %v1182_v19, %v3424_v37 }
 0x350   :  { %1328 = vst [vmem:[#allocation4 + $0x170] sm:$0xff] %v1183_v20 }
 0x351 LB: > { %v2771_v21 = vld [vmem:[%s3806_s6 + $0xac] ss:$12 sps:$4 sm:$0xff]   ;;  %v2773_v36 = vld [vmem:[%s3806_s6 + $0xa8] ss:$12 sps:$4 sm:$0xff]   ;;  %v2956_v22 = vmov 0.0   ;;  %v2957_v23 = vmov 0   ;;  %s2949_s7 = sphi %s3477_s7, %s1338_s7  }
 0x352   : > { %2603 = vmatprep.subr.bf16.mxu1 %v2956_v22  ;;  %1543 = vmatprep.mubr.bf16.mxu0 %v2957_v23  ;;  %v2774_v37 = vld [vmem:[%s3806_s6 + $0x94] ss:$12 sps:$4 sm:$0xff]   ;;  %vm2958_vm1 = vmmov 0   ;;  %v2776_v24 = vld [vmem:[%s3806_s6 + $0x90] ss:$12 sps:$4 sm:$0xff]   ;;  %s2463_s24 = smul.u32 48, %s2949_s7 }
 0x353   : > { %1511 = vmatprep.subr.bf16.mxu0 %v2771_v21  ;;  %2619 = vmatprep.mubr.msk.bf16.mxu1 %vm2958_vm1, %v2956_v22  ;;  %v2777_v25 = vld [vmem:[%s3806_s6 + $0x7c] ss:$12 sps:$4 sm:$0xff]   ;;  %v2779_v4 = vld [vmem:[%s3806_s6 + $0x78] ss:$12 sps:$4 sm:$0xff]   ;;  %v2782_v28 = vld [vmem:[%s3806_s6 + $0x60] ss:$12 sps:$4 sm:$0xff]  }
 0x354   : > { %1512 = vmatpush1.bf16.msra.mxu0 %v2773_v36  ;;  %v2780_v26 = vld [vmem:[%s3806_s6 + $0x64] ss:$12 sps:$4 sm:$0xff]   ;;  %v2783_v29 = vld [vmem:[%s3806_s6 + $0x4c] ss:$12 sps:$4 sm:$0xff]   ;;  %v2785_v31 = vld [vmem:[%s3806_s6 + $0x48] ss:$12 sps:$4 sm:$0xff]  }
 0x355   : > { %1513 = vmatprep.subr.bf16.mxu0 %v2774_v37  ;;  %v2792_v27 = vld [vmem:[%s3806_s6 + $0xb0] ss:$12 sps:$4 sm:$0xff]   ;;  %v2796_v30 = vld [vmem:[%s3806_s6 + $0x98] ss:$12 sps:$4 sm:$0xff]   ;;  %v2786_v32 = vld [vmem:[%s3806_s6 + $0x34] ss:$12 sps:$4 sm:$0xff]  }
 0x356   : > { %2604 = vmatpush3.bf16.msra.mxu1 %v2792_v27  ;;  %v2797_v33 = vld [vmem:[%s3806_s6 + $0x80] ss:$12 sps:$4 sm:$0xff]   ;;  %v2788_v35 = vld [vmem:[%s3806_s6 + $0x30] ss:$12 sps:$4 sm:$0xff]   ;;  %v2798_v56 = vld [vmem:[%s3806_s6 + $0x68] ss:$12 sps:$4 sm:$0xff]  }
 0x357   : > { %2605 = vmatprep.subr.bf16.mxu1 %v2956_v22  ;;  %v2789_v38 = vld [vmem:[%s3806_s6 + $0x1c] ss:$12 sps:$4 sm:$0xff]   ;;  %v2791_v39 = vld [vmem:[%s3806_s6 + $0x18] ss:$12 sps:$4 sm:$0xff]   ;;  %v2795_v41 = vld [vmem:[%s3806_s6] ss:$12 sps:$4 sm:$0xff]  }
 0x358   : > { %1514 = vmatpush1.bf16.msra.mxu0 %v2776_v24  ;;  %v2793_v40 = vld [vmem:[%s3806_s6 + $0x4] ss:$12 sps:$4 sm:$0xff]   ;;  %v3545_v42 = vld [vmem:[#allocation3 + $0x8] sm:$0xff]  ;;  %v2801_v47 = vld [vmem:[%s3806_s6 + $0x20] ss:$12 sps:$4 sm:$0xff]   ;;  %s3561_s25 = scalar_lea.vmem [#allocation4], %s2463_s24 }
 0x359   : > { %1515 = vmatprep.subr.bf16.mxu0 %v2777_v25  ;;  %v2799_v57 = vld [vmem:[%s3806_s6 + $0x50] ss:$12 sps:$4 sm:$0xff]   ;;  %v2800_v45 = vld [vmem:[%s3806_s6 + $0x38] ss:$12 sps:$4 sm:$0xff]   ;;  %v2802_v48 = vld [vmem:[%s3806_s6 + $0x8] ss:$12 sps:$4 sm:$0xff]  }
 0x35a   : > { %2606 = vmatpush3.bf16.msra.mxu1 %v2796_v30  ;;  %v3547_v43 = vld [vmem:[#allocation3] sm:$0xff]  ;;  %v1344_v51 = vld [vmem:[%s3561_s25] sm:$0xff]  ;;  %v1347_v60 = vld [vmem:[%s3561_s25 + $0x18] sm:$0xff]  ;;  %s1338_s7 = sadd.s32 1, %s2949_s7  }
 0x35b   : > { %2607 = vmatprep.subr.bf16.mxu1 %v2956_v22  ;;  %v1350_v46 = vpack.c.bf16 %v3547_v43, %v3545_v42  ;;  %v1345_v63 = vld [vmem:[%s3561_s25 + $0x8] sm:$0xff]  ;;  %v1348_v6 = vld [vmem:[%s3561_s25 + $0x20] sm:$0xff]  ;;  %v1346_v36 = vld [vmem:[%s3561_s25 + $0x10] sm:$0xff]  ;;  %p1335_p1 = scmp.ge.s32.totalorder %s1338_s7, 8  }
 0x35c   : > { %1516 = vmatpush1.bf16.msra.mxu0 %v2779_v4  ;;  %v1349_v25 = vld [vmem:[%s3561_s25 + $0x28] sm:$0xff] }
 0x35d   : > { %1517 = vmatprep.subr.bf16.mxu0 %v2780_v26 }
 0x35e   : > { %2608 = vmatpush3.bf16.msra.mxu1 %v2797_v33 }
 0x35f   : > { %2609 = vmatprep.subr.bf16.mxu1 %v2956_v22 }
 0x360   : > { %1518 = vmatpush1.bf16.msra.mxu0 %v2782_v28 }
 0x361   : > { %1519 = vmatprep.subr.bf16.mxu0 %v2783_v29 }
 0x362   : > { %2610 = vmatpush3.bf16.msra.mxu1 %v2798_v56 }
 0x363   : > { %2611 = vmatprep.subr.bf16.mxu1 %v2956_v22 }
 0x364   : > { %1520 = vmatpush1.bf16.msra.mxu0 %v2785_v31 }
 0x365   : > { %1521 = vmatprep.subr.bf16.mxu0 %v2786_v32 }
 0x366   : > { %2612 = vmatpush3.bf16.msra.mxu1 %v2799_v57  ;;  %v2823_v57 = vld [vmem:[%s3810_s10 + $0xe4] ss:$16 sps:$4 sm:$0xff] (%p1335_p1)  }
 0x367   : > { %2613 = vmatprep.subr.bf16.mxu1 %v2956_v22 }
 0x368   : > { %1522 = vmatpush1.bf16.msra.mxu0 %v2788_v35 }
 0x369   : > { %1523 = vmatprep.subr.bf16.mxu0 %v2789_v38 }
 0x36a   : > { %2614 = vmatpush3.bf16.msra.mxu1 %v2800_v45  ;;  %v2831_v45 = vld [vmem:[%s3810_s10 + $0xcc] ss:$16 sps:$4 sm:$0xff] (%p1335_p1)  }
 0x36b   : > { %2615 = vmatprep.subr.bf16.mxu1 %v2956_v22 }
 0x36c   : > { %1524 = vmatpush1.bf16.msra.mxu0 %v2791_v39 }
 0x36d   : > { %1525 = vmatprep.subr.bf16.mxu0 %v2793_v40 }
 0x36e   : > { %2616 = vmatpush3.bf16.msra.mxu1 %v2801_v47  ;;  %v2834_v47 = vld [vmem:[%s3810_s10 + $0xc8] ss:$16 sps:$4 sm:$0xff] (%p1335_p1)  }
 0x36f   : > { %2617 = vmatprep.subr.bf16.mxu1 %v2956_v22 }
 0x370   : > { %1526 = vmatpush1.bf16.msra.mxu0 %v2795_v41  ;;  %v2825_v41 = vld [vmem:[%s3810_s10 + $0xec] ss:$16 sps:$4 sm:$0xff] (%p1335_p1)  }
 0x371   :  { %1877 = vmatprep.subr.bf16.mxu0 (%p1335_p1), %v2823_v57  ;;  %v2912_v57 = vld [vmem:[%s3809_s9 + $0x2c] ss:$16 sps:$4 sm:$0xff] (%p1335_p1)  }
 0x372   : > { %2618 = vmatpush3.bf16.msra.mxu1 %v2802_v48  ;;  %v2835_v48 = vld [vmem:[%s3810_s10 + $0xa4] ss:$16 sps:$4 sm:$0xff] (%p1335_p1)  }
 0x373   : > { %1544 = vmatmul.mubr.bf16.vlgmr.msra.gmra.mxu0 %v1350_v46  ;;  %1920 = vmatprep.subr.bf16.mxu1 (%p1335_p1), %v2825_v41  ;;  %v2907_v41 = vld [vmem:[%s3809_s9 + $0x20] ss:$16 sps:$4 sm:$0xff] (%p1335_p1)  }
 0x374   :  { %1909 = vmatprep.mubr.bf16.mxu0 (%p1335_p1), %v2951_v1 }
 0x375   : > { %2620 = vmatmul.mubr.bf16.vlgmr.msra.gmra.mxu1 %v1350_v46  ;;  %v2833_v46 = vld [vmem:[%s3810_s10 + $0xc0] ss:$16 sps:$4 sm:$0xff] (%p1335_p1)  }
 0x376   :  { %1952 = vmatprep.mubr.bf16.mxu1 (%p1335_p1), %v2951_v1 }
 0x433   : > { %v1545_v54 = vpop.f32.mrf.mxu0 }
 0x434   : > { %v1595_v58 = vadd.f32 %v1545_v54, %v1344_v51  ;;  %v2837_v51 = vld [vmem:[%s3810_s10 + $0xac] ss:$16 sps:$4 sm:$0xff] (%p1335_p1)   ;;  %v2839_v54 = vld [vmem:[%s3810_s10 + $0xa0] ss:$16 sps:$4 sm:$0xff] (%p1335_p1)  }
 0x435   : > { %v1547_v59 = vpop.f32.mrf.mxu0  ;;  %v1588_v50 = vpop.f32.mrf.mxu1 }
 0x436   : > { %v2390_v61 = vmul.f32 -1.442695, %v1595_v58  ;;  %v1609_v3 = vadd.f32 %v1547_v59, %v1345_v63  ;;  %v1629_v19 = vadd.f32 %v3415_v34, %v1588_v50  ;;  %v2840_v58 = vld [vmem:[%s3810_s10 + $0xa8] ss:$16 sps:$4 sm:$0xff] (%p1335_p1)   ;;  %v2841_v59 = vld [vmem:[%s3810_s10 + $0x84] ss:$16 sps:$4 sm:$0xff] (%p1335_p1)  }
 0x437   : > { %v1549_v0 = vpop.f32.mrf.mxu0  ;;  %v2621_v44 = vpop.f32.mrf.mxu1  ;;  %v2846_v63 = vld [vmem:[%s3810_s10 + $0x88] ss:$16 sps:$4 sm:$0xff] (%p1335_p1)   ;;  %v2857_v50 = vld [vmem:[%s3810_s10 + $0x40] ss:$16 sps:$4 sm:$0xff] (%p1335_p1)  }
 0x438   : > { %2803 = vpow2.f32 %v2390_v61  ;;  %v1596_v2 = vadd.f32 %v1549_v0, %v1347_v60  ;;  %v2392_v49 = vmul.f32 -1.442695, %v1609_v3  ;;  %v2843_v60 = vld [vmem:[%s3810_s10 + $0x8c] ss:$16 sps:$4 sm:$0xff] (%p1335_p1)   ;;  %v2845_v61 = vld [vmem:[%s3810_s10 + $0x80] ss:$16 sps:$4 sm:$0xff] (%p1335_p1)  }
 0x439   : > { %v1551_v7 = vpop.f32.mrf.mxu0  ;;  %v1591_v9 = vpop.f32.mrf.mxu1  ;;  %v2847_v0 = vld [vmem:[%s3810_s10 + $0x64] ss:$16 sps:$4 sm:$0xff] (%p1335_p1)   ;;  %v2851_v3 = vld [vmem:[%s3810_s10 + $0x60] ss:$16 sps:$4 sm:$0xff] (%p1335_p1)   ;;  %v2861_v44 = vld [vmem:[%s3810_s10 + $0x2c] ss:$16 sps:$4 sm:$0xff] (%p1335_p1)  }
 0x43a   : > { %v2391_v5 = vmul.f32 -1.442695, %v1596_v2  ;;  %v1610_v8 = vadd.f32 %v1551_v7, %v1348_v6  ;;  %v1630_v37 = vadd.f32 %v3415_v34, %v1591_v9  ;;  %v2828_v34 = vld [vmem:[%s3810_s10 + $0xe8] ss:$16 sps:$4 sm:$0xff] (%p1335_p1)   ;;  %v2849_v2 = vld [vmem:[%s3810_s10 + $0x6c] ss:$16 sps:$4 sm:$0xff] (%p1335_p1)  }
 0x43b   : > { %v2622_v11 = vpop.f32.mrf.mxu1  ;;  %1921 = vmatpush1.bf16.msra.mxu1 (%p1335_p1), %v2828_v34  ;;  %v2853_v6 = vld [vmem:[%s3810_s10 + $0x44] ss:$16 sps:$4 sm:$0xff] (%p1335_p1)   ;;  %v2855_v7 = vld [vmem:[%s3810_s10 + $0x4c] ss:$16 sps:$4 sm:$0xff] (%p1335_p1)   ;;  %v2863_v9 = vld [vmem:[%s3810_s10 + $0x20] ss:$16 sps:$4 sm:$0xff] (%p1335_p1)  }
 0x43c   : > { %2805 = vpow2.f32 %v2391_v5  ;;  %v2393_v10 = vmul.f32 -1.442695, %v1610_v8  ;;  %1922 = vmatprep.subr.bf16.mxu1 (%p1335_p1), %v2831_v45  ;;  %v2852_v5 = vld [vmem:[%s3810_s10 + $0x68] ss:$16 sps:$4 sm:$0xff] (%p1335_p1)   ;;  %v2865_v11 = vld [vmem:[%s3810_s10 + $0x4] ss:$16 sps:$4 sm:$0xff] (%p1335_p1)  }
 0x43d   : > { %2807 = vpow2.f32 %v2392_v49  ;;  %v2858_v8 = vld [vmem:[%s3810_s10 + $0x48] ss:$16 sps:$4 sm:$0xff] (%p1335_p1)   ;;  %v2859_v49 = vld [vmem:[%s3810_s10 + $0x24] ss:$16 sps:$4 sm:$0xff] (%p1335_p1)   ;;  %v2913_v45 = vld [vmem:[%s3809_s9] ss:$16 sps:$4 sm:$0xff] (%p1335_p1)  }
 0x43e   : > { %2809 = vpow2.f32 %v2393_v10  ;;  %v2864_v10 = vld [vmem:[%s3810_s10 + $0x28] ss:$16 sps:$4 sm:$0xff] (%p1335_p1)   ;;  %v2915_v34 = vld [vmem:[%s3809_s9 + $0x4] ss:$16 sps:$4 sm:$0xff] (%p1335_p1)  }
 0x43f   :  { %1923 = vmatpush1.bf16.msra.mxu1 (%p1335_p1), %v2834_v47  ;;  %v1647_v47 = vld [vmem:[#allocation2] sm:$0xff] (%p1335_p1) }
 0x440   :  { %1924 = vmatprep.subr.bf16.mxu1 (%p1335_p1), %v2837_v51 }
 0x443   :  { %1925 = vmatpush1.bf16.msra.mxu1 (%p1335_p1), %v2840_v58 }
 0x444   :  { %1926 = vmatprep.subr.bf16.mxu1 (%p1335_p1), %v2843_v60 }
 0x445   : > { %v2804_v12 = vpop.eup %2803 }
 0x446   : > { %v1603_v13 = vadd.f32 1.0, %v2804_v12  ;;  %v2867_v12 = vld [vmem:[%s3810_s10 + $0xc] ss:$16 sps:$4 sm:$0xff] (%p1335_p1)  }
 0x447   :  { %1927 = vmatpush1.bf16.msra.mxu1 (%p1335_p1), %v2846_v63 }
 0x448   : > { %2811 = vrcp.f32 %v1603_v13  ;;  %1928 = vmatprep.subr.bf16.mxu1 (%p1335_p1), %v2849_v2  ;;  %v2869_v13 = vld [vmem:[%s3810_s10] ss:$16 sps:$4 sm:$0xff] (%p1335_p1)   ;;  %v2225_v2 = vsub.s32 (%p1335_p1), 3, %v3159_v52 }
 0x449   : > { %v2806_v14 = vpop.eup %2805 }
 0x44a   : > { %v1604_v15 = vadd.f32 1.0, %v2806_v14  ;;  %v2808_v16 = vpop.eup %2807  ;;  %v2870_v14 = vld [vmem:[%s3810_s10 + $0x8] ss:$16 sps:$4 sm:$0xff] (%p1335_p1)  }
 0x44b   : > { %v2810_v17 = vpop.eup %2809  ;;  %v1617_v18 = vadd.f32 1.0, %v2808_v16  ;;  %1929 = vmatpush1.bf16.msra.mxu1 (%p1335_p1), %v2852_v5 }
 0x44c   : > { %2813 = vrcp.f32 %v1604_v15  ;;  %v1618_v21 = vadd.f32 1.0, %v2810_v17  ;;  %1930 = vmatprep.subr.bf16.mxu1 (%p1335_p1), %v2855_v7  ;;  %v2873_v17 = vld [vmem:[%s3809_s9 + $0xe4] ss:$16 sps:$4 sm:$0xff] (%p1335_p1)  }
 0x44d   : > { %2815 = vrcp.f32 %v1617_v18  ;;  %v2876_v18 = vld [vmem:[%s3809_s9 + $0xec] ss:$16 sps:$4 sm:$0xff] (%p1335_p1)  }
 0x44e   : > { %2817 = vrcp.f32 %v1618_v21  ;;  %v2874_v21 = vld [vmem:[%s3809_s9 + $0xe8] ss:$16 sps:$4 sm:$0xff] (%p1335_p1)  }
 0x44f   :  { %1931 = vmatpush1.bf16.msra.mxu1 (%p1335_p1), %v2858_v8 }
 0x450   :  { %1932 = vmatprep.subr.bf16.mxu1 (%p1335_p1), %v2861_v44 }
 0x453   :  { %1933 = vmatpush1.bf16.msra.mxu1 (%p1335_p1), %v2864_v10 }
 0x454   :  { %1934 = vmatprep.subr.bf16.mxu1 (%p1335_p1), %v2867_v12 }
 0x455   : > { %v2812_v20 = vpop.eup %2811 }
 0x456   : > { %v1631_v22 = vmul.f32 %v2812_v20, %v1629_v19  ;;  %v2871_v20 = vld [vmem:[%s3809_s9 + $0xe0] ss:$16 sps:$4 sm:$0xff] (%p1335_p1)  }
 0x457   :  { %1935 = vmatpush1.bf16.msra.mxu1 (%p1335_p1), %v2870_v14 }
 0x458   : > { %v1633_v23 = vadd.f32 %v1631_v22, %v1346_v36  ;;  %2166 = vmatprep.subr.bf16.mxu1 (%p1335_p1), %v2876_v18  ;;  %v2879_v36 = vld [vmem:[%s3809_s9 + $0xc4] ss:$16 sps:$4 sm:$0xff] (%p1335_p1)   ;;  %v2882_v22 = vld [vmem:[%s3809_s9 + $0xcc] ss:$16 sps:$4 sm:$0xff] (%p1335_p1)  }
 0x459   : > { %v2814_v24 = vpop.eup %2813 }
 0x45a   : > { %2819 = vtanh.f32 %v1633_v23  ;;  %v1632_v4 = vmul.f32 %v2814_v24, %v1630_v37  ;;  %v2816_v27 = vpop.eup %2815  ;;  %v2877_v23 = vld [vmem:[%s3809_s9 + $0xc0] ss:$16 sps:$4 sm:$0xff] (%p1335_p1)   ;;  %v2880_v37 = vld [vmem:[%s3809_s9 + $0xc8] ss:$16 sps:$4 sm:$0xff] (%p1335_p1)   ;;  %v2885_v24 = vld [vmem:[%s3809_s9 + $0xa4] ss:$16 sps:$4 sm:$0xff] (%p1335_p1)  }
 0x45b   : > { %v2818_v28 = vpop.eup %2817  ;;  %v1637_v29 = vsub.f32 1.0, %v2816_v27  ;;  %v1641_v31 = vmul.f32 %v2816_v27, %v3545_v42  ;;  %v2827_v42 = vld [vmem:[%s3810_s10 + $0xe0] ss:$16 sps:$4 sm:$0xff] (%p1335_p1)   ;;  %v2891_v27 = vld [vmem:[%s3809_s9 + $0x84] ss:$16 sps:$4 sm:$0xff] (%p1335_p1)  }
 0x45c   : > { %v1634_v26 = vadd.f32 %v1632_v4, %v1349_v25  ;;  %v1638_v33 = vsub.f32 1.0, %v2818_v28  ;;  %v1642_v56 = vmul.f32 %v2818_v28, %v3547_v43  ;;  %v2829_v43 = vld [vmem:[%s3810_s10 + $0xc4] ss:$16 sps:$4 sm:$0xff] (%p1335_p1)   ;;  %1878 = vmatpush1.bf16.msra.mxu0 (%p1335_p1), %v2827_v42  ;;  %v2888_v25 = vld [vmem:[%s3809_s9 + $0xac] ss:$16 sps:$4 sm:$0xff] (%p1335_p1)  }
 0x45d   :  { %1879 = vmatprep.subr.bf16.mxu0 (%p1335_p1), %v2829_v43  ;;  %v2883_v4 = vld [vmem:[%s3809_s9 + $0xa0] ss:$16 sps:$4 sm:$0xff] (%p1335_p1)   ;;  %v2910_v42 = vld [vmem:[%s3809_s9 + $0x28] ss:$16 sps:$4 sm:$0xff] (%p1335_p1)   ;;  %v2918_v43 = vld [vmem:[%s3809_s9 + $0xc] ss:$16 sps:$4 sm:$0xff] (%p1335_p1)  }
 0x45e   : > { %2821 = vtanh.f32 %v1634_v26  ;;  %v2886_v26 = vld [vmem:[%s3809_s9 + $0xa8] ss:$16 sps:$4 sm:$0xff] (%p1335_p1)   ;;  %v2889_v28 = vld [vmem:[%s3809_s9 + $0x80] ss:$16 sps:$4 sm:$0xff] (%p1335_p1)  }
 0x460   :  { %1880 = vmatpush1.bf16.msra.mxu0 (%p1335_p1), %v2833_v46  ;;  %v2916_v46 = vld [vmem:[%s3809_s9 + $0x8] ss:$16 sps:$4 sm:$0xff] (%p1335_p1)  }
 0x461   :  { %1881 = vmatprep.subr.bf16.mxu0 (%p1335_p1), %v2835_v48  ;;  %v1648_v48 = vld [vmem:[#allocation2 + $0x8] sm:$0xff] (%p1335_p1) }
 0x462   :  { %v1649_v51 = vpack.c.bf16 (%p1335_p1), %v1648_v48, %v1647_v47 }
 0x464   :  { %1882 = vmatpush1.bf16.msra.mxu0 (%p1335_p1), %v2839_v54 }
 0x465   :  { %1883 = vmatprep.subr.bf16.mxu0 (%p1335_p1), %v2841_v59 }
 0x467   : > { %v2820_v30 = vpop.eup %2819 }
 0x468   : > { %v1639_v32 = vmul.f32 %v2820_v30, %v1637_v29  ;;  %1884 = vmatpush1.bf16.msra.mxu0 (%p1335_p1), %v2845_v61  ;;  %v2892_v29 = vld [vmem:[%s3809_s9 + $0x88] ss:$16 sps:$4 sm:$0xff] (%p1335_p1)   ;;  %v2897_v30 = vld [vmem:[%s3809_s9 + $0x64] ss:$16 sps:$4 sm:$0xff] (%p1335_p1)  }
 0x469   :  { %1885 = vmatprep.subr.bf16.mxu0 (%p1335_p1), %v2847_v0  ;;  %v2209_v0 = vld [vmem:[%s3811_s11] sm:$0xf] (%p1335_p1) }
 0x46a   : > { %v1643_v35 = vadd.f32 %v1641_v31, %v1639_v32  ;;  %v2900_v31 = vld [vmem:[%s3809_s9 + $0x6c] ss:$16 sps:$4 sm:$0xff] (%p1335_p1)   ;;  %v2895_v32 = vld [vmem:[%s3809_s9 + $0x60] ss:$16 sps:$4 sm:$0xff] (%p1335_p1)   ;;  %v2222_v7 = vrot.slane (%p1335_p1), %v2209_v0, %v3179_v62  ;;  %v2226_v10 = vrot.slane (%p1335_p1), %v2209_v0, %v2225_v2 }
 0x46b   : > { %v2822_v38 = vpop.eup %2821 }
 0x46c   : > { %1645 = vst [vmem:[#allocation3 + $0x8] sm:$0xff] %v1643_v35  ;;  %v1640_v39 = vmul.f32 %v2822_v38, %v1638_v33  ;;  %1337 = sbr.rel (!%p1335_p1) target bundleno = 849 (0x351), region = 96  ;;  %1886 = vmatpush1.bf16.msra.mxu0 (%p1335_p1), %v2851_v3  ;;  %v2898_v33 = vld [vmem:[%s3809_s9 + $0x68] ss:$16 sps:$4 sm:$0xff] (%p1335_p1)   ;;  %v2903_v35 = vld [vmem:[%s3809_s9 + $0x44] ss:$16 sps:$4 sm:$0xff] (%p1335_p1)  }
 0x46d   :  { %1887 = vmatprep.subr.bf16.mxu0 (%p1335_p1), %v2853_v6  ;;  %v2906_v38 = vld [vmem:[%s3809_s9 + $0x4c] ss:$16 sps:$4 sm:$0xff] (%p1335_p1)   ;;  %v2214_v6 = vrot.slane (%p1335_p1), %v2209_v0, %v3162_v53 }
 0x46e   : > { %v1644_v40 = vadd.f32 %v1642_v56, %v1640_v39  ;;  %v2901_v56 = vld [vmem:[%s3809_s9 + $0x40] ss:$16 sps:$4 sm:$0xff] (%p1335_p1)   ;;  %v2904_v39 = vld [vmem:[%s3809_s9 + $0x48] ss:$16 sps:$4 sm:$0xff] (%p1335_p1)  }
 0x470   : > { %1646 = vst [vmem:[#allocation3] sm:$0xff] %v1644_v40  ;;  %1888 = vmatpush1.bf16.msra.mxu0 (%p1335_p1), %v2857_v50  ;;  %v2909_v40 = vld [vmem:[%s3809_s9 + $0x24] ss:$16 sps:$4 sm:$0xff] (%p1335_p1)  }
 0x471   :  { %1889 = vmatprep.subr.bf16.mxu0 %v2859_v49 }
 0x473   :  { %v1682_v15 = vld [vmem:[#allocation3 + $0x8] sm:$0xff] }
 0x474   :  { %1890 = vmatpush1.bf16.msra.mxu0 %v2863_v9  ;;  %v2218_v9 = vrot.slane %v2209_v0, %v3168_v55 }
 0x475   :  { %1891 = vmatprep.subr.bf16.mxu0 %v2865_v11 }
 0x477   :  { %v1683_v16 = vld [vmem:[#allocation3] sm:$0xff] }
 0x478   :  { %v1684_v19 = vpack.c.bf16 %v1683_v16, %v1682_v15  ;;  %1892 = vmatpush1.bf16.msra.mxu0 %v2869_v13 }
 0x479   :  { %2123 = vmatprep.subr.bf16.mxu0 %v2873_v17 }
 0x47a   :  { %1953 = vmatmul.mubr.bf16.vlgmr.msra.gmra.mxu1 %v1684_v19 }
 0x47b   :  { %1910 = vmatmul.mubr.bf16.vlgmr.msra.gmra.mxu0 %v1684_v19  ;;  %2167 = vmatpush1.bf16.msra.mxu1 %v2874_v21 }
 0x47c   :  { %2124 = vmatpush1.bf16.msra.mxu0 %v2871_v20  ;;  %2168 = vmatprep.subr.bf16.mxu1 %v2882_v22 }
 0x47d   :  { %2125 = vmatprep.subr.bf16.mxu0 %v2879_v36  ;;  %2155 = vmatprep.mubr.bf16.mxu0 %v2951_v1 }
 0x47e   :  { %2198 = vmatprep.mubr.bf16.mxu1 %v2951_v1  ;;  %v2894_v1 = vld [vmem:[%s3809_s9 + $0x8c] ss:$16 sps:$4 sm:$0xff]  }
 0x47f   :  { %2169 = vmatpush1.bf16.msra.mxu1 %v2880_v37 }
 0x480   :  { %2126 = vmatpush1.bf16.msra.mxu0 %v2877_v23  ;;  %2170 = vmatprep.subr.bf16.mxu1 %v2888_v25 }
 0x481   :  { %2127 = vmatprep.subr.bf16.mxu0 %v2885_v24 }
 0x483   :  { %2171 = vmatpush1.bf16.msra.mxu1 %v2886_v26 }
 0x484   :  { %2128 = vmatpush1.bf16.msra.mxu0 %v2883_v4  ;;  %2172 = vmatprep.subr.bf16.mxu1 %v2894_v1 }
 0x485   :  { %2129 = vmatprep.subr.bf16.mxu0 %v2891_v27 }
 0x487   :  { %2173 = vmatpush1.bf16.msra.mxu1 %v2892_v29 }
 0x488   :  { %2130 = vmatpush1.bf16.msra.mxu0 %v2889_v28  ;;  %2174 = vmatprep.subr.bf16.mxu1 %v2900_v31 }
 0x489   :  { %2131 = vmatprep.subr.bf16.mxu0 %v2897_v30 }
 0x48b   :  { %2175 = vmatpush1.bf16.msra.mxu1 %v2898_v33 }
 0x48c   :  { %2132 = vmatpush1.bf16.msra.mxu0 %v2895_v32  ;;  %2176 = vmatprep.subr.bf16.mxu1 %v2906_v38 }
 0x48d   :  { %2133 = vmatprep.subr.bf16.mxu0 %v2903_v35 }
 0x48f   :  { %2177 = vmatpush1.bf16.msra.mxu1 %v2904_v39 }
 0x490   :  { %2134 = vmatpush1.bf16.msra.mxu0 %v2901_v56  ;;  %2178 = vmatprep.subr.bf16.mxu1 %v2912_v57 }
 0x491   :  { %2135 = vmatprep.subr.bf16.mxu0 %v2909_v40 }
 0x493   :  { %2179 = vmatpush1.bf16.msra.mxu1 %v2910_v42 }
 0x494   :  { %2136 = vmatpush1.bf16.msra.mxu0 %v2907_v41  ;;  %2180 = vmatprep.subr.bf16.mxu1 %v2918_v43 }
 0x495   :  { %2137 = vmatprep.subr.bf16.mxu0 %v2915_v34 }
 0x497   :  { %2181 = vmatpush1.bf16.msra.mxu1 %v2916_v46 }
 0x498   :  { %2138 = vmatpush1.bf16.msra.mxu0 %v2913_v45 }
 0x49a   :  { %2199 = vmatmul.mubr.bf16.vlgmr.msra.gmra.mxu1 %v1649_v51 }
 0x49b   :  { %2156 = vmatmul.mubr.bf16.vlgmr.msra.gmra.mxu0 %v1649_v51 }
 0x53a   :  { %v1954_v58 = vpop.f32.mrf.mxu1 }
 0x53b   :  { %v1911_v54 = vpop.f32.mrf.mxu0 }
 0x53c   :  { %v1956_v60 = vpop.f32.mrf.mxu1 }
 0x53d   :  { %v1913_v59 = vpop.f32.mrf.mxu0 }
 0x53e   :  { %v1958_v63 = vpop.f32.mrf.mxu1 }
 0x53f   :  { %v1915_v61 = vpop.f32.mrf.mxu0 }
 0x540   :  { %v1960_v5 = vpop.f32.mrf.mxu1 }
 0x541   :  { %v1917_v3 = vpop.f32.mrf.mxu0 }
 0x55a   :  { %v2200_v8 = vpop.f32.mrf.mxu1 }
 0x55b   :  { %v2157_v50 = vpop.f32.mrf.mxu0  ;;  %v2201_v44 = vadd.f32 %v2200_v8, %v1954_v58 }
 0x55c   :  { %v2158_v49 = vadd.f32 %v2157_v50, %v1911_v54  ;;  %v2202_v12 = vpop.f32.mrf.mxu1 }
 0x55d   :  { %v2159_v11 = vpop.f32.mrf.mxu0  ;;  %v2233_v14 = vadd.f32 %v2222_v7, %v2201_v44  ;;  %v2203_v16 = vadd.f32 %v2202_v12, %v1956_v60 }
 0x55e   :  { %v2231_v13 = vadd.f32 %v2214_v6, %v2158_v49  ;;  %v2160_v15 = vadd.f32 %v2159_v11, %v1913_v59  ;;  %v2204_v17 = vpop.f32.mrf.mxu1 }
 0x55f   :  { %v2161_v52 = vpop.f32.mrf.mxu0  ;;  %v2234_v53 = vadd.f32 %v2226_v10, %v2203_v16  ;;  %v2205_v62 = vadd.f32 %v2204_v17, %v1958_v63 }
 0x560   :  { %2919 = vtanh.f32 %v2231_v13  ;;  %v2232_v18 = vadd.f32 %v2218_v9, %v2160_v15  ;;  %v2162_v19 = vadd.f32 %v2161_v52, %v1915_v61  ;;  %v2206_v21 = vpop.f32.mrf.mxu1 }
 0x561   :  { %2921 = vtanh.f32 %v2233_v14  ;;  %v2163_v20 = vpop.f32.mrf.mxu0  ;;  %v2207_v22 = vadd.f32 %v2206_v21, %v1960_v5  ;;  %v2237_v23 = vadd.f32 %v2222_v7, %v2205_v62 }
 0x562   :  { %2923 = vtanh.f32 %v2232_v18  ;;  %v2235_v36 = vadd.f32 %v2214_v6, %v2162_v19  ;;  %v2164_v55 = vadd.f32 %v2163_v20, %v1917_v3 }
 0x563   :  { %2925 = vtanh.f32 %v2234_v53  ;;  %v2238_v24 = vadd.f32 %v2226_v10, %v2207_v22 }
 0x564   :  { %2927 = vtanh.f32 %v2235_v36  ;;  %v2236_v37 = vadd.f32 %v2218_v9, %v2164_v55 }
 0x565   :  { %2929 = vtanh.f32 %v2237_v23 }
 0x566   :  { %2931 = vtanh.f32 %v2236_v37 }
 0x567   :  { %2933 = vtanh.f32 %v2238_v24 }
 0x56d   :  { %v2920_v25 = vpop.eup %2919 }
 0x56e   :  { %v2922_v4 = vpop.eup %2921  ;;  %2247 = vst [vmem:[%s3812_s12] sm:$0xff] %v2920_v25 }
 0x56f   :  { %v2924_v26 = vpop.eup %2923  ;;  %2249 = vst [vmem:[%s3812_s12 + $0x10] sm:$0xff] %v2922_v4 }
 0x570   :  { %v2926_v27 = vpop.eup %2925  ;;  %2248 = vst [vmem:[%s3812_s12 + $0x8] sm:$0xff] %v2924_v26 }
 0x571   :  { %v2928_v1 = vpop.eup %2927  ;;  %2250 = vst [vmem:[%s3812_s12 + $0x18] sm:$0xff] %v2926_v27 }
 0x572   :  { %v2930_v28 = vpop.eup %2929  ;;  %2251 = vst [vmem:[%s3812_s12 + $0x20] sm:$0xff] %v2928_v1 }
 0x573   :  { %v2932_v29 = vpop.eup %2931  ;;  %2253 = vst [vmem:[%s3812_s12 + $0x30] sm:$0xff] %v2930_v28 }
 0x574   :  { %v2934_v30 = vpop.eup %2933  ;;  %2252 = vst [vmem:[%s3812_s12 + $0x28] sm:$0xff] %v2932_v29 }
 0x575   :  { %2254 = vst [vmem:[%s3812_s12 + $0x38] sm:$0xff] %v2934_v30 }

// kernel: forward.3
= control target key start
LH: loop header
LB: loop body
LE: loop exit
PB: predicated region body
PF: predicated region fallthrough
CT: control target
= control target key end

     0   :  { %v6092_v3 = vmov 0   ;;  %s7984_s1 = inlined_call_operand.vmem [shape: f32[16,512], index: 1, kind: input, shape index: {}]   ;;  %s7985_s3 = inlined_call_operand.vmem [shape: bf16[128,384], index: 3, kind: input, shape index: {}]   ;;  %s7986_s7 = inlined_call_operand.vmem [shape: bf16[128,384], index: 7, kind: input, shape index: {}]   ;;  %s7987_s10 = inlined_call_operand.vmem [shape: bf16[128,384], index: 10, kind: input, shape index: {}]   ;;  %s7988_s11 = inlined_call_operand.vmem [shape: bf16[128,384], index: 11, kind: input, shape index: {}]   ;;  %s7989_s12 = inlined_call_operand.vmem [shape: bf16[128,384], index: 12, kind: input, shape index: {}]   ;;  %s7990_s13 = inlined_call_operand.vmem [shape: f32[1,384], index: 13, kind: input, shape index: {}]   ;;  %s7991_s14 = inlined_call_operand.vmem [shape: f32[1,128], index: 14, kind: input, shape index: {}]   ;;  %s7992_s15 = inlined_call_operand.vmem [shape: bf16[128,384], index: 15, kind: input, shape index: {}]   ;;  %s7993_s16 = inlined_call_operand.vmem [shape: bf16[128,384], index: 16, kind: input, shape index: {}]   ;;  %s7994_s17 = inlined_call_operand.vmem [shape: bf16[128,384], index: 17, kind: input, shape index: {}]   ;;  %s7995_s18 = inlined_call_operand.vmem [shape: f32[1,384], index: 18, kind: input, shape index: {}]   ;;  %s7996_s19 = inlined_call_operand.vmem [shape: f32[1,128], index: 19, kind: input, shape index: {}]   ;;  %s7997_s20 = inlined_call_operand.vmem [shape: bf16[128,128], index: 20, kind: input, shape index: {}]   ;;  %s7998_s21 = inlined_call_operand.vmem [shape: bf16[128,128], index: 21, kind: input, shape index: {}]   ;;  %s7999_s22 = inlined_call_operand.vmem [shape: f32[1,128], index: 22, kind: input, shape index: {}]   ;;  %s8000_s23 = inlined_call_operand.vmem [shape: f32[8,16,128], index: 23, kind: output, shape index: {}]   ;;  %s8001_s2 = inlined_call_operand.vmem [shape: bf16[128,384], index: 2, kind: input, shape index: {}]   ;;  %s8002_s0 = inlined_call_operand.vmem [shape: f32[8,16,128], index: 0, kind: input, shape index: {}]   ;;  %s8003_s6 = inlined_call_operand.vmem [shape: bf16[128,384], index: 6, kind: input, shape index: {}]   ;;  %s8004_s4 = inlined_call_operand.vmem [shape: f32[1,384], index: 4, kind: input, shape index: {}]   ;;  %s8005_s8 = inlined_call_operand.vmem [shape: f32[1,384], index: 8, kind: input, shape index: {}]   ;;  %s8006_s5 = inlined_call_operand.vmem [shape: f32[1,128], index: 5, kind: input, shape index: {}]   ;;  %s8007_s9 = inlined_call_operand.vmem [shape: f32[1,128], index: 9, kind: input, shape index: {}]  }
   0x1   :  { %8014 = sst [smem:[#allocation10_spill]] %s7984_s1  ;;  %324 = vmatprep.mubr.bf16.mxu0 %v6092_v3  ;;  %v5596_v9 = vld [vmem:[%s8001_s2 + $0xac] ss:$12 sps:$4 sm:$0xff]   ;;  %v5598_v10 = vld [vmem:[%s8001_s2 + $0xb0] ss:$12 sps:$4 sm:$0xff]   ;;  %v91_v26 = vld [vmem:[%s8002_s0] sm:$0xff] }
   0x2   :  { %8015 = sst [smem:[#allocation11_spill]] %s7985_s3  ;;  %v5599_v11 = vld [vmem:[%s8001_s2 + $0xa8] ss:$12 sps:$4 sm:$0xff]   ;;  %292 = vmatprep.subr.bf16.mxu0 %v5596_v9  ;;  %5237 = vmatprep.subr.bf16.mxu1 %v5598_v10  ;;  %v5602_v13 = vld [vmem:[%s8001_s2 + $0x98] ss:$12 sps:$4 sm:$0xff]  }
   0x3   :  { %8016 = sst [smem:[#allocation12_spill]] %s7986_s7  ;;  %v5600_v12 = vld [vmem:[%s8001_s2 + $0x94] ss:$12 sps:$4 sm:$0xff]   ;;  %293 = vmatpush1.bf16.msra.mxu0 %v5599_v11  ;;  %5238 = vmatpush3.bf16.msra.mxu1 %v5598_v10  ;;  %v5603_v14 = vld [vmem:[%s8001_s2 + $0x90] ss:$12 sps:$4 sm:$0xff]   ;;  %v92_v27 = vld [vmem:[%s8002_s0 + $0x8] sm:$0xff] }
   0x4   :  { %8017 = sst [smem:[#allocation13_spill]] %s7987_s10  ;;  %294 = vmatprep.subr.bf16.mxu0 %v5600_v12  ;;  %5239 = vmatprep.subr.bf16.mxu1 %v5602_v13  ;;  %v5604_v15 = vld [vmem:[%s8001_s2 + $0x7c] ss:$12 sps:$4 sm:$0xff]   ;;  %v5606_v16 = vld [vmem:[%s8001_s2 + $0x80] ss:$12 sps:$4 sm:$0xff]   ;;  %v6304_v29 = vpack.c.bf16 %v92_v27, %v91_v26  ;;  %v93_v36 = vld [vmem:[%s8002_s0 + $0x10] sm:$0xff] }
   0x5   :  { %8018 = sst [smem:[#allocation14_spill]] %s7988_s11  ;;  %v5607_v17 = vld [vmem:[%s8001_s2 + $0x78] ss:$12 sps:$4 sm:$0xff]   ;;  %v5610_v19 = vld [vmem:[%s8001_s2 + $0x68] ss:$12 sps:$4 sm:$0xff]  }
   0x6   :  { %8019 = sst [smem:[#allocation15_spill]] %s7989_s12  ;;  %v5608_v18 = vld [vmem:[%s8001_s2 + $0x64] ss:$12 sps:$4 sm:$0xff]   ;;  %v5611_v20 = vld [vmem:[%s8001_s2 + $0x60] ss:$12 sps:$4 sm:$0xff]   ;;  %5253 = vmatprep.mubr.bf16.mxu1 %v6304_v29  ;;  %v94_v37 = vld [vmem:[%s8002_s0 + $0x18] sm:$0xff] }
   0x7   :  { %8020 = sst [smem:[#allocation16_spill]] %s7990_s13  ;;  %295 = vmatpush1.bf16.msra.mxu0 %v5603_v14  ;;  %5240 = vmatpush3.bf16.msra.mxu1 %v5602_v13  ;;  %v5612_v21 = vld [vmem:[%s8001_s2 + $0x4c] ss:$12 sps:$4 sm:$0xff]   ;;  %v5614_v22 = vld [vmem:[%s8001_s2 + $0x50] ss:$12 sps:$4 sm:$0xff]   ;;  %v95_v40 = vld [vmem:[%s8002_s0 + $0x20] sm:$0xff]  ;;  %v6343_v42 = vpack.c.bf16 %v94_v37, %v93_v36 }
   0x8   :  { %8021 = sst [smem:[#allocation17_spill]] %s7991_s14  ;;  %296 = vmatprep.subr.bf16.mxu0 %v5604_v15  ;;  %5241 = vmatprep.subr.bf16.mxu1 %v5606_v16  ;;  %v5615_v23 = vld [vmem:[%s8001_s2 + $0x48] ss:$12 sps:$4 sm:$0xff]   ;;  %v5618_v25 = vld [vmem:[%s8001_s2 + $0x38] ss:$12 sps:$4 sm:$0xff]  }
   0x9   :  { %s8022_s24 = sld [smem:[#allocation10_spill]]  ;;  %v5616_v24 = vld [vmem:[%s8001_s2 + $0x34] ss:$12 sps:$4 sm:$0xff]   ;;  %v5619_v28 = vld [vmem:[%s8001_s2 + $0x30] ss:$12 sps:$4 sm:$0xff]   ;;  %v96_v41 = vld [vmem:[%s8002_s0 + $0x28] sm:$0xff] }
   0xa   :  { %v5620_v30 = vld [vmem:[%s8001_s2 + $0x1c] ss:$12 sps:$4 sm:$0xff]   ;;  %v5622_v31 = vld [vmem:[%s8001_s2 + $0x20] ss:$12 sps:$4 sm:$0xff]   ;;  %v5623_v32 = vld [vmem:[%s8001_s2 + $0x18] ss:$12 sps:$4 sm:$0xff]   ;;  %v6351_v45 = vpack.c.bf16 %v96_v41, %v95_v40 }
   0xb   :  { %297 = vmatpush1.bf16.msra.mxu0 %v5607_v17  ;;  %5242 = vmatpush3.bf16.msra.mxu1 %v5606_v16  ;;  %v5624_v33 = vld [vmem:[%s8001_s2 + $0x4] ss:$12 sps:$4 sm:$0xff]   ;;  %v5626_v34 = vld [vmem:[%s8001_s2 + $0x8] ss:$12 sps:$4 sm:$0xff]   ;;  %v5627_v35 = vld [vmem:[%s8001_s2] ss:$12 sps:$4 sm:$0xff]  }
   0xc   :  { %298 = vmatprep.subr.bf16.mxu0 %v5608_v18  ;;  %5243 = vmatprep.subr.bf16.mxu1 %v5610_v19  ;;  %v5631_v38 = vld [vmem:[%s8003_s6 + $0xb0] ss:$12 sps:$4 sm:$0xff]   ;;  %v5630_v39 = vld [vmem:[%s8003_s6 + $0xac] ss:$12 sps:$4 sm:$0xff]   ;;  %v5628_v43 = vld [vmem:[%s8003_s6 + $0xa8] ss:$12 sps:$4 sm:$0xff]   ;;  %v149_v18 = vlaneseq }
   0xd   :  { %v5634_v44 = vld [vmem:[%s8003_s6 + $0x94] ss:$12 sps:$4 sm:$0xff]   ;;  %v5632_v46 = vld [vmem:[%s8003_s6 + $0x90] ss:$12 sps:$4 sm:$0xff]   ;;  %v5638_v49 = vld [vmem:[%s8003_s6 + $0x98] ss:$12 sps:$4 sm:$0xff]  }
   0xe   :  { %v97_v47 = vld [vmem:[%s8002_s0 + $0x30] sm:$0xff]  ;;  %v98_v48 = vld [vmem:[%s8002_s0 + $0x38] sm:$0xff]  ;;  %v99_v51 = vld [vmem:[%s8002_s0 + $0x40] sm:$0xff] }
   0xf   :  { %v75_v0 = vld [vmem:[%s8022_s24] sm:$0xff]  ;;  %v76_v1 = vld [vmem:[%s8022_s24 + $0x8] sm:$0xff]  ;;  %v77_v2 = vld [vmem:[%s8022_s24 + $0x10] sm:$0xff]  ;;  %299 = vmatpush1.bf16.msra.mxu0 %v5611_v20  ;;  %5244 = vmatpush3.bf16.msra.mxu1 %v5610_v19  ;;  %v6381_v54 = vpack.c.bf16 %v98_v48, %v97_v47  ;;  %v150_v19 = vshrl.u32 %v149_v18, 7 }
  0x10   :  { %v78_v4 = vld [vmem:[%s8022_s24 + $0x18] sm:$0xff]  ;;  %v79_v5 = vld [vmem:[%s8022_s24 + $0x20] sm:$0xff]  ;;  %v80_v6 = vld [vmem:[%s8022_s24 + $0x28] sm:$0xff]  ;;  %83 = vst [vmem:[#allocation2] sm:$0xff] %v75_v0  ;;  %300 = vmatprep.subr.bf16.mxu0 %v5612_v21  ;;  %5245 = vmatprep.subr.bf16.mxu1 %v5614_v22 }
  0x11   :  { %85 = vst [vmem:[#allocation3 + $0x8] sm:$0xff] %v76_v1  ;;  %87 = vst [vmem:[#allocation4 + $0x8] sm:$0xff] %v77_v2  ;;  %v81_v7 = vld [vmem:[%s8022_s24 + $0x30] sm:$0xff]  ;;  %v82_v8 = vld [vmem:[%s8022_s24 + $0x38] sm:$0xff]  ;;  %v6485_v20 = vsub.s32 0, %v150_v19 }
  0x12   :  { %84 = vst [vmem:[#allocation2 + $0x8] sm:$0xff] %v79_v5  ;;  %86 = vst [vmem:[#allocation3] sm:$0xff] %v80_v6  ;;  %v5637_v50 = vld [vmem:[%s8003_s6 + $0x7c] ss:$12 sps:$4 sm:$0xff]   ;;  %v5645_v52 = vld [vmem:[%s8003_s6 + $0x80] ss:$12 sps:$4 sm:$0xff]  }
  0x13   :  { %89 = vst [vmem:[#allocation5] sm:$0xff] %v78_v4  ;;  %88 = vst [vmem:[#allocation4] sm:$0xff] %v81_v7  ;;  %301 = vmatpush1.bf16.msra.mxu0 %v5615_v23  ;;  %5246 = vmatpush3.bf16.msra.mxu1 %v5614_v22  ;;  %v100_v53 = vld [vmem:[%s8002_s0 + $0x48] sm:$0xff]  ;;  %v5635_v55 = vld [vmem:[%s8003_s6 + $0x78] ss:$12 sps:$4 sm:$0xff]   ;;  %v6495_v23 = vsub.s32 2, %v150_v19 }
  0x14   :  { %90 = vst [vmem:[#allocation5 + $0x8] sm:$0xff] %v82_v8  ;;  %302 = vmatprep.subr.bf16.mxu0 %v5616_v24  ;;  %5247 = vmatprep.subr.bf16.mxu1 %v5618_v25  ;;  %v6386_v56 = vpack.c.bf16 %v100_v53, %v99_v51  ;;  %v5641_v57 = vld [vmem:[%s8003_s6 + $0x64] ss:$12 sps:$4 sm:$0xff]   ;;  %v5652_v58 = vld [vmem:[%s8003_s6 + $0x68] ss:$12 sps:$4 sm:$0xff]   ;;  %v102_v61 = vld [vmem:[%s8002_s0 + $0x58] sm:$0xff] }
  0x15   :  { %v5639_v59 = vld [vmem:[%s8003_s6 + $0x60] ss:$12 sps:$4 sm:$0xff]   ;;  %v101_v60 = vld [vmem:[%s8002_s0 + $0x50] sm:$0xff]  ;;  %v5657_v7 = vld [vmem:[%s8003_s6 + $0x38] ss:$12 sps:$4 sm:$0xff]   ;;  %v6497_v24 = vsub.s32 1, %v150_v19 }
  0x16   :  { %v5644_v62 = vld [vmem:[%s8003_s6 + $0x4c] ss:$12 sps:$4 sm:$0xff]   ;;  %v103_v63 = vld [vmem:[%s8002_s0 + $0x60] sm:$0xff]  ;;  %v5656_v1 = vld [vmem:[%s8003_s6 + $0x50] ss:$12 sps:$4 sm:$0xff]   ;;  %v6419_v2 = vpack.c.bf16 %v102_v61, %v101_v60 }
  0x17   :  { %303 = vmatpush1.bf16.msra.mxu0 %v5619_v28  ;;  %5248 = vmatpush3.bf16.msra.mxu1 %v5618_v25  ;;  %v104_v0 = vld [vmem:[%s8002_s0 + $0x68] sm:$0xff]  ;;  %v5648_v6 = vld [vmem:[%s8003_s6 + $0x34] ss:$12 sps:$4 sm:$0xff]   ;;  %v5646_v8 = vld [vmem:[%s8003_s6 + $0x30] ss:$12 sps:$4 sm:$0xff]  }
  0x18   :  { %304 = vmatprep.subr.bf16.mxu0 %v5620_v30  ;;  %5249 = vmatprep.subr.bf16.mxu1 %v5622_v31  ;;  %v5642_v4 = vld [vmem:[%s8003_s6 + $0x48] ss:$12 sps:$4 sm:$0xff]   ;;  %v6424_v5 = vpack.c.bf16 %v104_v0, %v103_v63  ;;  %v106_v10 = vld [vmem:[%s8002_s0 + $0x78] sm:$0xff]  ;;  %v5658_v12 = vld [vmem:[%s8003_s6 + $0x20] ss:$12 sps:$4 sm:$0xff]  }
  0x19   :  { %v105_v9 = vld [vmem:[%s8002_s0 + $0x70] sm:$0xff]  ;;  %v5651_v11 = vld [vmem:[%s8003_s6 + $0x1c] ss:$12 sps:$4 sm:$0xff]   ;;  %v5649_v14 = vld [vmem:[%s8003_s6 + $0x18] ss:$12 sps:$4 sm:$0xff]  }
  0x1a   :  { %v6451_v13 = vpack.c.bf16 %v106_v10, %v105_v9  ;;  %v5655_v15 = vld [vmem:[%s8003_s6 + $0x4] ss:$12 sps:$4 sm:$0xff]   ;;  %v5659_v16 = vld [vmem:[%s8003_s6 + $0x8] ss:$12 sps:$4 sm:$0xff]   ;;  %v5653_v17 = vld [vmem:[%s8003_s6] ss:$12 sps:$4 sm:$0xff]  }
  0x1b   :  { %305 = vmatpush1.bf16.msra.mxu0 %v5623_v32  ;;  %5250 = vmatpush3.bf16.msra.mxu1 %v5622_v31  ;;  %v985_v21 = vld [vmem:[%s8004_s4] sm:$0x7] }
  0x1c   :  { %306 = vmatprep.subr.bf16.mxu0 %v5624_v33  ;;  %5251 = vmatprep.subr.bf16.mxu1 %v5626_v34  ;;  %v990_v22 = vrot.slane %v985_v21, %v6485_v20  ;;  %v998_v25 = vrot.slane %v985_v21, %v6495_v23  ;;  %v147_v26 = vld [vmem:[%s8004_s4] sm:$0x7]  ;;  %v994_v28 = vrot.slane %v985_v21, %v6497_v24 }
  0x1d   :  { %v6504_v27 = vrot.slane %v147_v26, %v6497_v24  ;;  %v1008_v30 = vld [vmem:[%s8005_s8] sm:$0x7]  ;;  %v6543_v37 = vrot.slane %v147_v26, %v6495_v23 }
  0x1e   :  { %1002 = vst [vmem:[#allocation6] sm:$0xff] %v990_v22  ;;  %1005 = vst [vmem:[#allocation6 + $0x18] sm:$0xff] %v990_v22  ;;  %v1013_v31 = vrot.slane %v1008_v30, %v6485_v20  ;;  %v1017_v33 = vrot.slane %v1008_v30, %v6497_v24  ;;  %v6540_v36 = vld [vmem:[%s8007_s9] ss:$0 sm:$0xff] }
  0x1f   :  { %307 = vmatpush1.bf16.msra.mxu0 %v5627_v35  ;;  %5252 = vmatpush3.bf16.msra.mxu1 %v5626_v34  ;;  %1004 = vst [vmem:[#allocation6 + $0x10] sm:$0xff] %v998_v25  ;;  %1007 = vst [vmem:[#allocation6 + $0x28] sm:$0xff] %v998_v25  ;;  %v1021_v34 = vrot.slane %v1008_v30, %v6495_v23  ;;  %v6535_v35 = vld [vmem:[%s8006_s5] ss:$0 sm:$0xff]  ;;  %s6640_s5 = smov 0  }
  0x20   :  { %5269 = vmatprep.subr.bf16.mxu0 %v5631_v38  ;;  %727 = vmatprep.subr.bf16.mxu1 %v5630_v39  ;;  %1003 = vst [vmem:[#allocation6 + $0x8] sm:$0xff] %v994_v28  ;;  %1006 = vst [vmem:[#allocation6 + $0x20] sm:$0xff] %v994_v28 }
  0x21   :  { %1025 = vst [vmem:[#allocation7] sm:$0xff] %v1013_v31  ;;  %1026 = vst [vmem:[#allocation7 + $0x8] sm:$0xff] %v1017_v33 }
  0x22   :  { %325 = vmatmul.mubr.bf16.vlgmr.msra.gmra.mxu0 %v6304_v29  ;;  %5254 = vmatmul.mubr.bf16.vlgmr.msra.gmra.mxu1 %v6343_v42  ;;  %1028 = vst [vmem:[#allocation7 + $0x18] sm:$0xff] %v1013_v31  ;;  %1029 = vst [vmem:[#allocation7 + $0x20] sm:$0xff] %v1017_v33 }
  0x23   :  { %5270 = vmatpush3.bf16.msra.mxu0 %v5631_v38  ;;  %728 = vmatpush1.bf16.msra.mxu1 %v5628_v43  ;;  %1027 = vst [vmem:[#allocation7 + $0x10] sm:$0xff] %v1021_v34  ;;  %1030 = vst [vmem:[#allocation7 + $0x28] sm:$0xff] %v1021_v34 }
  0x24   :  { %334 = vmatprep.mubr.bf16.mxu0 %v6092_v3  ;;  %729 = vmatprep.subr.bf16.mxu1 %v5634_v44  ;;  %v6547_v44 = vrot.slane %v147_v26, %v6485_v20 }
  0x25   :  { %5257 = vmatprep.mubr.bf16.mxu1 %v6351_v45  ;;  %5271 = vmatprep.subr.bf16.mxu0 %v5638_v49 }
  0x27   :  { %5272 = vmatpush3.bf16.msra.mxu0 %v5638_v49  ;;  %730 = vmatpush1.bf16.msra.mxu1 %v5632_v46 }
  0x28   :  { %5273 = vmatprep.subr.bf16.mxu0 %v5645_v52  ;;  %731 = vmatprep.subr.bf16.mxu1 %v5637_v50 }
  0x2a   :  { %335 = vmatmul.mubr.bf16.gmra.mxu0 %v6343_v42  ;;  %5258 = vmatmul.mubr.bf16.gmra.mxu1 %v6381_v54 }
  0x2b   :  { %344 = vmatprep.mubr.bf16.mxu0 %v6092_v3  ;;  %732 = vmatpush1.bf16.msra.mxu1 %v5635_v55 }
  0x2c   :  { %5261 = vmatprep.mubr.bf16.mxu1 %v6386_v56  ;;  %733 = vmatprep.subr.bf16.mxu1 %v5641_v57 }
  0x2d   :  { %5274 = vmatpush3.bf16.msra.mxu0 %v5645_v52 }
  0x2e   :  { %5275 = vmatprep.subr.bf16.mxu0 %v5652_v58 }
  0x2f   :  { %734 = vmatpush1.bf16.msra.mxu1 %v5639_v59 }
  0x30   :  { %735 = vmatprep.subr.bf16.mxu1 %v5644_v62 }
  0x31   :  { %5276 = vmatpush3.bf16.msra.mxu0 %v5652_v58 }
  0x32   :  { %345 = vmatmul.mubr.bf16.gmra.mxu0 %v6351_v45  ;;  %5277 = vmatprep.subr.bf16.mxu0 %v5656_v1 }
  0x33   :  { %5262 = vmatmul.mubr.bf16.gmra.mxu1 %v6419_v2  ;;  %354 = vmatprep.mubr.bf16.mxu0 %v6092_v3 }
  0x34   :  { %736 = vmatpush1.bf16.msra.mxu1 %v5642_v4  ;;  %5265 = vmatprep.mubr.bf16.mxu1 %v6424_v5 }
  0x35   :  { %737 = vmatprep.subr.bf16.mxu1 %v5648_v6  ;;  %5278 = vmatpush3.bf16.msra.mxu0 %v5656_v1 }
  0x36   :  { %5279 = vmatprep.subr.bf16.mxu0 %v5657_v7 }
  0x38   :  { %738 = vmatpush1.bf16.msra.mxu1 %v5646_v8 }
  0x39   :  { %739 = vmatprep.subr.bf16.mxu1 %v5651_v11  ;;  %5280 = vmatpush3.bf16.msra.mxu0 %v5657_v7 }
  0x3a   :  { %355 = vmatmul.mubr.bf16.gmra.mxu0 %v6381_v54  ;;  %5281 = vmatprep.subr.bf16.mxu0 %v5658_v12 }
  0x3b   :  { %5266 = vmatmul.mubr.bf16.gmra.mxu1 %v6451_v13  ;;  %364 = vmatprep.mubr.bf16.mxu0 %v6092_v3 }
  0x3c   :  { %740 = vmatpush1.bf16.msra.mxu1 %v5649_v14  ;;  %759 = vmatprep.mubr.bf16.mxu1 %v6092_v3 }
  0x3d   :  { %741 = vmatprep.subr.bf16.mxu1 %v5655_v15  ;;  %5282 = vmatpush3.bf16.msra.mxu0 %v5658_v12 }
  0x3e   :  { %5283 = vmatprep.subr.bf16.mxu0 %v5659_v16 }
  0x40   :  { %742 = vmatpush1.bf16.msra.mxu1 %v5653_v17 }
  0x41   :  { %5284 = vmatpush3.bf16.msra.mxu0 %v5659_v16 }
  0x42   :  { %365 = vmatmul.mubr.bf16.gmra.mxu0 %v6386_v56 }
  0x43   :  { %760 = vmatmul.mubr.bf16.vlgmr.msra.gmra.mxu1 %v6304_v29  ;;  %374 = vmatprep.mubr.bf16.mxu0 %v6092_v3 }
  0x44   :  { %769 = vmatprep.mubr.bf16.mxu1 %v6092_v3 }
  0x4a   :  { %375 = vmatmul.mubr.bf16.gmra.mxu0 %v6419_v2 }
  0x4b   :  { %770 = vmatmul.mubr.bf16.gmra.mxu1 %v6343_v42  ;;  %384 = vmatprep.mubr.bf16.mxu0 %v6092_v3 }
  0x4c   :  { %779 = vmatprep.mubr.bf16.mxu1 %v6092_v3 }
  0x52   :  { %385 = vmatmul.mubr.bf16.gmra.mxu0 %v6424_v5 }
  0x53   :  { %780 = vmatmul.mubr.bf16.gmra.mxu1 %v6351_v45  ;;  %394 = vmatprep.mubr.bf16.mxu0 %v6092_v3 }
  0x54   :  { %789 = vmatprep.mubr.bf16.mxu1 %v6092_v3 }
  0x5a   :  { %395 = vmatmul.mubr.bf16.gmra.mxu0 %v6451_v13 }
  0x5b   :  { %790 = vmatmul.mubr.bf16.gmra.mxu1 %v6381_v54  ;;  %5285 = vmatprep.mubr.bf16.mxu0 %v6304_v29  ;;  %v6520_v29 = vld [vmem:[%s8005_s8] sm:$0x7] }
  0x5c   :  { %799 = vmatprep.mubr.bf16.mxu1 %v6092_v3  ;;  %v6528_v32 = vrot.slane %v6520_v29, %v6497_v24 }
  0x62   :  { %5286 = vmatmul.mubr.bf16.vlgmr.msra.gmra.mxu0 %v6343_v42 }
  0x63   :  { %800 = vmatmul.mubr.bf16.gmra.mxu1 %v6386_v56  ;;  %5289 = vmatprep.mubr.bf16.mxu0 %v6351_v45 }
  0x64   :  { %809 = vmatprep.mubr.bf16.mxu1 %v6092_v3 }
  0x6a   :  { %5290 = vmatmul.mubr.bf16.gmra.mxu0 %v6381_v54 }
  0x6b   :  { %810 = vmatmul.mubr.bf16.gmra.mxu1 %v6419_v2  ;;  %5293 = vmatprep.mubr.bf16.mxu0 %v6386_v56 }
  0x6c   :  { %819 = vmatprep.mubr.bf16.mxu1 %v6092_v3 }
  0x72   :  { %5294 = vmatmul.mubr.bf16.gmra.mxu0 %v6419_v2 }
  0x73   :  { %820 = vmatmul.mubr.bf16.gmra.mxu1 %v6424_v5  ;;  %5297 = vmatprep.mubr.bf16.mxu0 %v6424_v5 }
  0x74   :  { %829 = vmatprep.mubr.bf16.mxu1 %v6092_v3 }
  0x7a   :  { %5298 = vmatmul.mubr.bf16.gmra.mxu0 %v6451_v13 }
  0x7b   :  { %830 = vmatmul.mubr.bf16.gmra.mxu1 %v6451_v13 }
  0xe2   :  { %v326_v38 = vpop.f32.mrf.mxu0  ;;  %v5255_v39 = vpop.f32.mrf.mxu1 }
  0xe3   :  { %v448_v40 = vadd.f32 %v5255_v39, %v6543_v37 }
  0xe4   :  { %v328_v41 = vpop.f32.mrf.mxu0  ;;  %v439_v42 = vpop.f32.mrf.mxu1 }
  0xe5   :  { %510 = vst [vmem:[#allocation6 + $0x40] sm:$0xff] %v448_v40 }
  0xe6   :  { %v330_v43 = vpop.f32.mrf.mxu0  ;;  %v5256_v45 = vpop.f32.mrf.mxu1 }
  0xe7   :  { %v451_v46 = vadd.f32 %v5256_v45, %v6543_v37 }
  0xe8   :  { %v332_v47 = vpop.f32.mrf.mxu0  ;;  %v442_v48 = vpop.f32.mrf.mxu1 }
  0xe9   :  { %513 = vst [vmem:[#allocation6 + $0x58] sm:$0xff] %v451_v46 }
  0xea   :  { %v336_v49 = vpop.f32.mrf.mxu0  ;;  %v5259_v51 = vpop.f32.mrf.mxu1 }
  0xeb   :  { %v337_v50 = vadd.f32 %v336_v49, %v6547_v44  ;;  %v464_v52 = vadd.f32 %v5259_v51, %v6543_v37 }
  0xec   :  { %v338_v53 = vpop.f32.mrf.mxu0  ;;  %v455_v55 = vpop.f32.mrf.mxu1 }
  0xed   :  { %508 = vst [vmem:[#allocation6 + $0x30] sm:$0xff] %v337_v50  ;;  %v339_v54 = vadd.f32 %v338_v53, %v6504_v27  ;;  %522 = vst [vmem:[#allocation6 + $0xa0] sm:$0xff] %v464_v52  ;;  %v456_v56 = vadd.f32 %v455_v55, %v6543_v37  ;;  %v6579_v53 = vrot.slane %v6520_v29, %v6485_v20 }
  0xee   :  { %v340_v57 = vpop.f32.mrf.mxu0  ;;  %v5260_v59 = vpop.f32.mrf.mxu1 }
  0xef   :  { %509 = vst [vmem:[#allocation6 + $0x38] sm:$0xff] %v339_v54  ;;  %v341_v58 = vadd.f32 %v340_v57, %v6547_v44  ;;  %516 = vst [vmem:[#allocation6 + $0x70] sm:$0xff] %v456_v56  ;;  %v467_v60 = vadd.f32 %v5260_v59, %v6543_v37 }
  0xf0   :  { %v342_v61 = vpop.f32.mrf.mxu0  ;;  %v458_v63 = vpop.f32.mrf.mxu1 }
  0xf1   :  { %511 = vst [vmem:[#allocation6 + $0x48] sm:$0xff] %v341_v58  ;;  %v343_v62 = vadd.f32 %v342_v61, %v6504_v27  ;;  %525 = vst [vmem:[#allocation6 + $0xb8] sm:$0xff] %v467_v60  ;;  %v459_v0 = vadd.f32 %v458_v63, %v6543_v37 }
  0xf2   :  { %v346_v1 = vpop.f32.mrf.mxu0 }
  0xf3   :  { %512 = vst [vmem:[#allocation6 + $0x50] sm:$0xff] %v343_v62  ;;  %v347_v2 = vadd.f32 %v346_v1, %v6547_v44  ;;  %v5263_v4 = vpop.f32.mrf.mxu1  ;;  %519 = vst [vmem:[#allocation6 + $0x88] sm:$0xff] %v459_v0 }
  0xf4   :  { %v480_v5 = vadd.f32 %v5263_v4, %v6543_v37  ;;  %v348_v6 = vpop.f32.mrf.mxu0 }
  0xf5   :  { %514 = vst [vmem:[#allocation6 + $0x60] sm:$0xff] %v347_v2  ;;  %v349_v7 = vadd.f32 %v348_v6, %v6504_v27  ;;  %v471_v8 = vpop.f32.mrf.mxu1 }
  0xf6   :  { %534 = vst [vmem:[#allocation6 + $0x100] sm:$0xff] %v480_v5  ;;  %v472_v9 = vadd.f32 %v471_v8, %v6543_v37  ;;  %v350_v10 = vpop.f32.mrf.mxu0 }
  0xf7   :  { %515 = vst [vmem:[#allocation6 + $0x68] sm:$0xff] %v349_v7  ;;  %v351_v11 = vadd.f32 %v350_v10, %v6547_v44  ;;  %v5264_v12 = vpop.f32.mrf.mxu1 }
  0xf8   :  { %528 = vst [vmem:[#allocation6 + $0xd0] sm:$0xff] %v472_v9  ;;  %v483_v13 = vadd.f32 %v5264_v12, %v6543_v37  ;;  %v352_v14 = vpop.f32.mrf.mxu0 }
  0xf9   :  { %517 = vst [vmem:[#allocation6 + $0x78] sm:$0xff] %v351_v11  ;;  %v353_v15 = vadd.f32 %v352_v14, %v6504_v27  ;;  %v474_v16 = vpop.f32.mrf.mxu1 }
  0xfa   :  { %537 = vst [vmem:[#allocation6 + $0x118] sm:$0xff] %v483_v13  ;;  %v475_v17 = vadd.f32 %v474_v16, %v6543_v37  ;;  %v356_v18 = vpop.f32.mrf.mxu0 }
  0xfb   :  { %518 = vst [vmem:[#allocation6 + $0x80] sm:$0xff] %v353_v15  ;;  %v357_v19 = vadd.f32 %v356_v18, %v6547_v44  ;;  %v5267_v21 = vpop.f32.mrf.mxu1 }
  0xfc   :  { %531 = vst [vmem:[#allocation6 + $0xe8] sm:$0xff] %v475_v17  ;;  %v496_v22 = vadd.f32 %v5267_v21, %v6543_v37  ;;  %v358_v25 = vpop.f32.mrf.mxu0 }
  0xfd   :  { %520 = vst [vmem:[#allocation6 + $0x90] sm:$0xff] %v357_v19  ;;  %v359_v26 = vadd.f32 %v358_v25, %v6504_v27  ;;  %v487_v28 = vpop.f32.mrf.mxu1 }
  0xfe   :  { %546 = vst [vmem:[#allocation6 + $0x160] sm:$0xff] %v496_v22  ;;  %v488_v30 = vadd.f32 %v487_v28, %v6543_v37  ;;  %v360_v31 = vpop.f32.mrf.mxu0 }
  0xff   :  { %521 = vst [vmem:[#allocation6 + $0x98] sm:$0xff] %v359_v26  ;;  %v361_v33 = vadd.f32 %v360_v31, %v6547_v44  ;;  %v5268_v34 = vpop.f32.mrf.mxu1 }
 0x100   :  { %540 = vst [vmem:[#allocation6 + $0x130] sm:$0xff] %v488_v30  ;;  %v499_v38 = vadd.f32 %v5268_v34, %v6543_v37  ;;  %v362_v39 = vpop.f32.mrf.mxu0 }
 0x101   :  { %523 = vst [vmem:[#allocation6 + $0xa8] sm:$0xff] %v361_v33  ;;  %v363_v40 = vadd.f32 %v362_v39, %v6504_v27  ;;  %v490_v41 = vpop.f32.mrf.mxu1 }
 0x102   :  { %549 = vst [vmem:[#allocation6 + $0x178] sm:$0xff] %v499_v38  ;;  %v491_v42 = vadd.f32 %v490_v41, %v6543_v37  ;;  %v366_v43 = vpop.f32.mrf.mxu0 }
 0x103   :  { %524 = vst [vmem:[#allocation6 + $0xb0] sm:$0xff] %v363_v40  ;;  %v367_v45 = vadd.f32 %v366_v43, %v6547_v44  ;;  %v761_v46 = vpop.f32.mrf.mxu1 }
 0x104   :  { %543 = vst [vmem:[#allocation6 + $0x148] sm:$0xff] %v491_v42  ;;  %v368_v47 = vpop.f32.mrf.mxu0  ;;  %v6605_v46 = vrot.slane %v6520_v29, %v6495_v23 }
 0x105   :  { %526 = vst [vmem:[#allocation6 + $0xc0] sm:$0xff] %v367_v45  ;;  %v369_v48 = vadd.f32 %v368_v47, %v6504_v27  ;;  %v763_v49 = vpop.f32.mrf.mxu1 }
 0x106   :  { %v370_v50 = vpop.f32.mrf.mxu0 }
 0x107   :  { %527 = vst [vmem:[#allocation6 + $0xc8] sm:$0xff] %v369_v48  ;;  %v371_v51 = vadd.f32 %v370_v50, %v6547_v44  ;;  %v765_v52 = vpop.f32.mrf.mxu1 }
 0x108   :  { %v372_v37 = vpop.f32.mrf.mxu0 }
 0x109   :  { %529 = vst [vmem:[#allocation6 + $0xd8] sm:$0xff] %v371_v51  ;;  %v373_v54 = vadd.f32 %v372_v37, %v6504_v27  ;;  %v767_v55 = vpop.f32.mrf.mxu1 }
 0x10a   :  { %v376_v56 = vpop.f32.mrf.mxu0 }
 0x10b   :  { %530 = vst [vmem:[#allocation6 + $0xe0] sm:$0xff] %v373_v54  ;;  %v377_v57 = vadd.f32 %v376_v56, %v6547_v44  ;;  %v771_v58 = vpop.f32.mrf.mxu1 }
 0x10c   :  { %v772_v59 = vadd.f32 %v771_v58, %v6579_v53  ;;  %v378_v60 = vpop.f32.mrf.mxu0 }
 0x10d   :  { %532 = vst [vmem:[#allocation6 + $0xf0] sm:$0xff] %v377_v57  ;;  %v379_v61 = vadd.f32 %v378_v60, %v6504_v27  ;;  %v773_v62 = vpop.f32.mrf.mxu1 }
 0x10e   :  { %943 = vst [vmem:[#allocation7 + $0x30] sm:$0xff] %v772_v59  ;;  %v774_v63 = vadd.f32 %v773_v62, %v6528_v32  ;;  %v380_v0 = vpop.f32.mrf.mxu0 }
 0x10f   :  { %533 = vst [vmem:[#allocation6 + $0xf8] sm:$0xff] %v379_v61  ;;  %v381_v1 = vadd.f32 %v380_v0, %v6547_v44  ;;  %v775_v2 = vpop.f32.mrf.mxu1 }
 0x110   :  { %944 = vst [vmem:[#allocation7 + $0x38] sm:$0xff] %v774_v63  ;;  %v776_v4 = vadd.f32 %v775_v2, %v6579_v53  ;;  %v382_v5 = vpop.f32.mrf.mxu0 }
 0x111   :  { %535 = vst [vmem:[#allocation6 + $0x108] sm:$0xff] %v381_v1  ;;  %v383_v6 = vadd.f32 %v382_v5, %v6504_v27  ;;  %v777_v7 = vpop.f32.mrf.mxu1 }
 0x112   :  { %946 = vst [vmem:[#allocation7 + $0x48] sm:$0xff] %v776_v4  ;;  %v778_v8 = vadd.f32 %v777_v7, %v6528_v32  ;;  %v386_v9 = vpop.f32.mrf.mxu0 }
 0x113   :  { %536 = vst [vmem:[#allocation6 + $0x110] sm:$0xff] %v383_v6  ;;  %v387_v10 = vadd.f32 %v386_v9, %v6547_v44  ;;  %v781_v11 = vpop.f32.mrf.mxu1 }
 0x114   :  { %947 = vst [vmem:[#allocation7 + $0x50] sm:$0xff] %v778_v8  ;;  %v782_v12 = vadd.f32 %v781_v11, %v6579_v53  ;;  %v388_v13 = vpop.f32.mrf.mxu0 }
 0x115   :  { %538 = vst [vmem:[#allocation6 + $0x120] sm:$0xff] %v387_v10  ;;  %v389_v14 = vadd.f32 %v388_v13, %v6504_v27  ;;  %v783_v15 = vpop.f32.mrf.mxu1 }
 0x116   :  { %949 = vst [vmem:[#allocation7 + $0x60] sm:$0xff] %v782_v12  ;;  %v784_v16 = vadd.f32 %v783_v15, %v6528_v32  ;;  %v390_v17 = vpop.f32.mrf.mxu0 }
 0x117   :  { %539 = vst [vmem:[#allocation6 + $0x128] sm:$0xff] %v389_v14  ;;  %v391_v18 = vadd.f32 %v390_v17, %v6547_v44  ;;  %v785_v19 = vpop.f32.mrf.mxu1 }
 0x118   :  { %950 = vst [vmem:[#allocation7 + $0x68] sm:$0xff] %v784_v16  ;;  %v786_v21 = vadd.f32 %v785_v19, %v6579_v53  ;;  %v392_v22 = vpop.f32.mrf.mxu0 }
 0x119   :  { %541 = vst [vmem:[#allocation6 + $0x138] sm:$0xff] %v391_v18  ;;  %v393_v25 = vadd.f32 %v392_v22, %v6504_v27  ;;  %v787_v26 = vpop.f32.mrf.mxu1 }
 0x11a   :  { %952 = vst [vmem:[#allocation7 + $0x78] sm:$0xff] %v786_v21  ;;  %v788_v28 = vadd.f32 %v787_v26, %v6528_v32  ;;  %v396_v30 = vpop.f32.mrf.mxu0 }
 0x11b   :  { %542 = vst [vmem:[#allocation6 + $0x140] sm:$0xff] %v393_v25  ;;  %v397_v31 = vadd.f32 %v396_v30, %v6547_v44  ;;  %v791_v33 = vpop.f32.mrf.mxu1 }
 0x11c   :  { %953 = vst [vmem:[#allocation7 + $0x80] sm:$0xff] %v788_v28  ;;  %v792_v34 = vadd.f32 %v791_v33, %v6579_v53  ;;  %v398_v38 = vpop.f32.mrf.mxu0 }
 0x11d   :  { %544 = vst [vmem:[#allocation6 + $0x150] sm:$0xff] %v397_v31  ;;  %v399_v39 = vadd.f32 %v398_v38, %v6504_v27  ;;  %v793_v40 = vpop.f32.mrf.mxu1 }
 0x11e   :  { %955 = vst [vmem:[#allocation7 + $0x90] sm:$0xff] %v792_v34  ;;  %v794_v41 = vadd.f32 %v793_v40, %v6528_v32  ;;  %v400_v42 = vpop.f32.mrf.mxu0 }
 0x11f   :  { %545 = vst [vmem:[#allocation6 + $0x158] sm:$0xff] %v399_v39  ;;  %v401_v43 = vadd.f32 %v400_v42, %v6547_v44  ;;  %v795_v45 = vpop.f32.mrf.mxu1 }
 0x120   :  { %956 = vst [vmem:[#allocation7 + $0x98] sm:$0xff] %v794_v41  ;;  %v796_v47 = vadd.f32 %v795_v45, %v6579_v53  ;;  %v402_v48 = vpop.f32.mrf.mxu0 }
 0x121   :  { %547 = vst [vmem:[#allocation6 + $0x168] sm:$0xff] %v401_v43  ;;  %v403_v49 = vadd.f32 %v402_v48, %v6504_v27  ;;  %v797_v50 = vpop.f32.mrf.mxu1 }
 0x122   :  { %958 = vst [vmem:[#allocation7 + $0xa8] sm:$0xff] %v796_v47  ;;  %v798_v51 = vadd.f32 %v797_v50, %v6528_v32  ;;  %v5287_v52 = vpop.f32.mrf.mxu0 }
 0x123   :  { %548 = vst [vmem:[#allocation6 + $0x170] sm:$0xff] %v403_v49  ;;  %v801_v37 = vpop.f32.mrf.mxu1  ;;  %v883_v44 = vadd.f32 %v5287_v52, %v6605_v46 }
 0x124   :  { %959 = vst [vmem:[#allocation7 + $0xb0] sm:$0xff] %v798_v51  ;;  %v802_v29 = vadd.f32 %v801_v37, %v6579_v53  ;;  %v874_v54 = vpop.f32.mrf.mxu0 }
 0x125   :  { %945 = vst [vmem:[#allocation7 + $0x40] sm:$0xff] %v883_v44  ;;  %v803_v55 = vpop.f32.mrf.mxu1 }
 0x126   :  { %961 = vst [vmem:[#allocation7 + $0xc0] sm:$0xff] %v802_v29  ;;  %v804_v56 = vadd.f32 %v803_v55, %v6528_v32  ;;  %v5288_v57 = vpop.f32.mrf.mxu0 }
 0x127   :  { %v805_v27 = vpop.f32.mrf.mxu1  ;;  %v886_v58 = vadd.f32 %v5288_v57, %v6605_v46 }
 0x128   :  { %962 = vst [vmem:[#allocation7 + $0xc8] sm:$0xff] %v804_v56  ;;  %v806_v59 = vadd.f32 %v805_v27, %v6579_v53  ;;  %v877_v60 = vpop.f32.mrf.mxu0 }
 0x129   :  { %948 = vst [vmem:[#allocation7 + $0x58] sm:$0xff] %v886_v58  ;;  %v807_v61 = vpop.f32.mrf.mxu1 }
 0x12a   :  { %964 = vst [vmem:[#allocation7 + $0xd8] sm:$0xff] %v806_v59  ;;  %v808_v62 = vadd.f32 %v807_v61, %v6528_v32  ;;  %v5291_v63 = vpop.f32.mrf.mxu0 }
 0x12b   :  { %v811_v0 = vpop.f32.mrf.mxu1  ;;  %v899_v1 = vadd.f32 %v5291_v63, %v6605_v46 }
 0x12c   :  { %965 = vst [vmem:[#allocation7 + $0xe0] sm:$0xff] %v808_v62  ;;  %v812_v2 = vadd.f32 %v811_v0, %v6579_v53  ;;  %v890_v4 = vpop.f32.mrf.mxu0 }
 0x12d   :  { %957 = vst [vmem:[#allocation7 + $0xa0] sm:$0xff] %v899_v1  ;;  %v813_v5 = vpop.f32.mrf.mxu1  ;;  %v891_v6 = vadd.f32 %v890_v4, %v6605_v46 }
 0x12e   :  { %967 = vst [vmem:[#allocation7 + $0xf0] sm:$0xff] %v812_v2  ;;  %v814_v7 = vadd.f32 %v813_v5, %v6528_v32  ;;  %v5292_v8 = vpop.f32.mrf.mxu0 }
 0x12f   :  { %951 = vst [vmem:[#allocation7 + $0x70] sm:$0xff] %v891_v6  ;;  %v815_v9 = vpop.f32.mrf.mxu1  ;;  %v902_v10 = vadd.f32 %v5292_v8, %v6605_v46 }
 0x130   :  { %968 = vst [vmem:[#allocation7 + $0xf8] sm:$0xff] %v814_v7  ;;  %v816_v11 = vadd.f32 %v815_v9, %v6579_v53  ;;  %v893_v12 = vpop.f32.mrf.mxu0 }
 0x131   :  { %960 = vst [vmem:[#allocation7 + $0xb8] sm:$0xff] %v902_v10  ;;  %v817_v13 = vpop.f32.mrf.mxu1  ;;  %v894_v14 = vadd.f32 %v893_v12, %v6605_v46 }
 0x132   :  { %970 = vst [vmem:[#allocation7 + $0x108] sm:$0xff] %v816_v11  ;;  %v818_v15 = vadd.f32 %v817_v13, %v6528_v32  ;;  %v5295_v16 = vpop.f32.mrf.mxu0 }
 0x133   :  { %954 = vst [vmem:[#allocation7 + $0x88] sm:$0xff] %v894_v14  ;;  %v821_v17 = vpop.f32.mrf.mxu1  ;;  %v915_v18 = vadd.f32 %v5295_v16, %v6605_v46 }
 0x134   :  { %971 = vst [vmem:[#allocation7 + $0x110] sm:$0xff] %v818_v15  ;;  %v822_v19 = vadd.f32 %v821_v17, %v6579_v53  ;;  %v906_v21 = vpop.f32.mrf.mxu0 }
 0x135   :  { %969 = vst [vmem:[#allocation7 + $0x100] sm:$0xff] %v915_v18  ;;  %v823_v22 = vpop.f32.mrf.mxu1  ;;  %v907_v25 = vadd.f32 %v906_v21, %v6605_v46 }
 0x136   :  { %973 = vst [vmem:[#allocation7 + $0x120] sm:$0xff] %v822_v19  ;;  %v824_v26 = vadd.f32 %v823_v22, %v6528_v32  ;;  %v5296_v28 = vpop.f32.mrf.mxu0 }
 0x137   :  { %963 = vst [vmem:[#allocation7 + $0xd0] sm:$0xff] %v907_v25  ;;  %v825_v30 = vpop.f32.mrf.mxu1  ;;  %v918_v31 = vadd.f32 %v5296_v28, %v6605_v46 }
 0x138   :  { %974 = vst [vmem:[#allocation7 + $0x128] sm:$0xff] %v824_v26  ;;  %v826_v33 = vadd.f32 %v825_v30, %v6579_v53  ;;  %v909_v34 = vpop.f32.mrf.mxu0 }
 0x139   :  { %972 = vst [vmem:[#allocation7 + $0x118] sm:$0xff] %v918_v31  ;;  %v827_v38 = vpop.f32.mrf.mxu1  ;;  %v910_v39 = vadd.f32 %v909_v34, %v6605_v46 }
 0x13a   :  { %976 = vst [vmem:[#allocation7 + $0x138] sm:$0xff] %v826_v33  ;;  %v828_v40 = vadd.f32 %v827_v38, %v6528_v32  ;;  %v5299_v41 = vpop.f32.mrf.mxu0 }
 0x13b   :  { %966 = vst [vmem:[#allocation7 + $0xe8] sm:$0xff] %v910_v39  ;;  %v831_v42 = vpop.f32.mrf.mxu1  ;;  %v931_v43 = vadd.f32 %v5299_v41, %v6605_v46 }
 0x13c   :  { %977 = vst [vmem:[#allocation7 + $0x140] sm:$0xff] %v828_v40  ;;  %v832_v45 = vadd.f32 %v831_v42, %v6579_v53  ;;  %v922_v47 = vpop.f32.mrf.mxu0 }
 0x13d   :  { %981 = vst [vmem:[#allocation7 + $0x160] sm:$0xff] %v931_v43  ;;  %v833_v48 = vpop.f32.mrf.mxu1  ;;  %v923_v49 = vadd.f32 %v922_v47, %v6605_v46 }
 0x13e   :  { %979 = vst [vmem:[#allocation7 + $0x150] sm:$0xff] %v832_v45  ;;  %v834_v50 = vadd.f32 %v833_v48, %v6528_v32  ;;  %v5300_v51 = vpop.f32.mrf.mxu0 }
 0x13f   :  { %975 = vst [vmem:[#allocation7 + $0x130] sm:$0xff] %v923_v49  ;;  %v835_v52 = vpop.f32.mrf.mxu1  ;;  %v934_v37 = vadd.f32 %v5300_v51, %v6605_v46 }
 0x140   :  { %980 = vst [vmem:[#allocation7 + $0x158] sm:$0xff] %v834_v50  ;;  %v836_v44 = vadd.f32 %v835_v52, %v6579_v53  ;;  %v925_v29 = vpop.f32.mrf.mxu0 }
 0x141   :  { %984 = vst [vmem:[#allocation7 + $0x178] sm:$0xff] %v934_v37  ;;  %v837_v54 = vpop.f32.mrf.mxu1  ;;  %v926_v55 = vadd.f32 %v925_v29, %v6605_v46 }
 0x142   :  { %982 = vst [vmem:[#allocation7 + $0x168] sm:$0xff] %v836_v44  ;;  %v838_v56 = vadd.f32 %v837_v54, %v6528_v32 }
 0x143   :  { %978 = vst [vmem:[#allocation7 + $0x148] sm:$0xff] %v926_v55 }
 0x144   :  { %983 = vst [vmem:[#allocation7 + $0x170] sm:$0xff] %v838_v56 }
 0x145 LB: > { %s8023_s1 = sld [smem:[#allocation11_spill]]  ;;  %v6093_v57 = vmov 0.0   ;;  %v6094_v32 = vmov 0   ;;  %vm6095_vm0 = vmmov 0   ;;  %v6716_v13 = vld [vmem:[#allocation2] sm:$0xff]  ;;  %v6718_v14 = vld [vmem:[#allocation2 + $0x8] sm:$0xff]  ;;  %s6086_s5 = sphi %s6640_s5, %s8025_s5  }
 0x146   : > { %5301 = vmatprep.subr.bf16.mxu1 %v6093_v57  ;;  %1249 = vmatprep.mubr.bf16.mxu0 %v6094_v32  ;;  %s8024_s30 = sld [smem:[#allocation12_spill]]  ;;  %v1056_v17 = vpack.c.bf16 %v6718_v14, %v6716_v13  ;;  %v6805_v51 = vld [vmem:[#allocation3 + $0x8] sm:$0xff]  ;;  %v6807_v52 = vld [vmem:[#allocation3] sm:$0xff]  ;;  %p1039_p0 = scmp.eq.s32.totalorder %s6086_s5, 0 }
 0x147   : > { %5317 = vmatprep.mubr.msk.bf16.mxu1 %vm6095_vm0, %v6093_v57  ;;  %v1362_v44 = vpack.c.bf16 %v6807_v52, %v6805_v51  ;;  %s1040_s29 = ssub.s32 8, %s6086_s5  ;;  %p1042_p1 = scmp.eq.s32.totalorder %s6086_s5, 7 }
 0x148   : > { %s8032_s29 = smov (%p1039_p0, %s1040_s29), 0  ;;  %s6833_s0 = sadd.s32 1, %s6086_s5  }
 0x149   : > { %s5037_s9 = smul.u32 48, %s8032_s29  ;;  %s5041_s12 = sshll.u32 %s6086_s5, 3 }
 0x14a   : > { %s1044_s11 = scalar_select %p1042_p1, 0, %s6833_s0 }
 0x14b   : > { %v5660_v53 = vld [vmem:[%s8023_s1 + $0xac] ss:$12 sps:$4 sm:$0xff]   ;;  %v5662_v46 = vld [vmem:[%s8023_s1 + $0xa8] ss:$12 sps:$4 sm:$0xff]   ;;  %v5665_v58 = vld [vmem:[%s8023_s1 + $0x90] ss:$12 sps:$4 sm:$0xff]  }
 0x14c   : > { %1217 = vmatprep.subr.bf16.mxu0 %v5660_v53  ;;  %v5663_v27 = vld [vmem:[%s8023_s1 + $0x94] ss:$12 sps:$4 sm:$0xff]   ;;  %v5666_v59 = vld [vmem:[%s8023_s1 + $0x7c] ss:$12 sps:$4 sm:$0xff]   ;;  %v5668_v60 = vld [vmem:[%s8023_s1 + $0x78] ss:$12 sps:$4 sm:$0xff]  }
 0x14d   : > { %1218 = vmatpush1.bf16.msra.mxu0 %v5662_v46  ;;  %v5669_v61 = vld [vmem:[%s8023_s1 + $0x64] ss:$12 sps:$4 sm:$0xff]   ;;  %v5671_v63 = vld [vmem:[%s8023_s1 + $0x60] ss:$12 sps:$4 sm:$0xff]   ;;  %v5674_v2 = vld [vmem:[%s8023_s1 + $0x48] ss:$12 sps:$4 sm:$0xff]  }
 0x14e   : > { %1219 = vmatprep.subr.bf16.mxu0 %v5663_v27  ;;  %v5681_v62 = vld [vmem:[%s8023_s1 + $0xb0] ss:$12 sps:$4 sm:$0xff]   ;;  %v5672_v0 = vld [vmem:[%s8023_s1 + $0x4c] ss:$12 sps:$4 sm:$0xff]   ;;  %v5675_v4 = vld [vmem:[%s8023_s1 + $0x34] ss:$12 sps:$4 sm:$0xff]  }
 0x14f   : > { %5302 = vmatpush3.bf16.msra.mxu1 %v5681_v62  ;;  %v5685_v1 = vld [vmem:[%s8023_s1 + $0x98] ss:$12 sps:$4 sm:$0xff]   ;;  %v5689_v5 = vld [vmem:[%s8023_s1 + $0x80] ss:$12 sps:$4 sm:$0xff]   ;;  %v5677_v6 = vld [vmem:[%s8023_s1 + $0x30] ss:$12 sps:$4 sm:$0xff]  }
 0x150   : > { %5303 = vmatprep.subr.bf16.mxu1 %v6093_v57  ;;  %v5678_v7 = vld [vmem:[%s8023_s1 + $0x1c] ss:$12 sps:$4 sm:$0xff]   ;;  %v5680_v9 = vld [vmem:[%s8023_s1 + $0x18] ss:$12 sps:$4 sm:$0xff]   ;;  %v5684_v12 = vld [vmem:[%s8023_s1] ss:$12 sps:$4 sm:$0xff]  }
 0x151   : > { %1220 = vmatpush1.bf16.msra.mxu0 %v5665_v58  ;;  %v5693_v8 = vld [vmem:[%s8023_s1 + $0x68] ss:$12 sps:$4 sm:$0xff]   ;;  %v5682_v10 = vld [vmem:[%s8023_s1 + $0x4] ss:$12 sps:$4 sm:$0xff]   ;;  %v5688_v15 = vld [vmem:[%s8024_s30 + $0xac] ss:$12 sps:$4 sm:$0xff]  }
 0x152   : > { %1221 = vmatprep.subr.bf16.mxu0 %v5666_v59  ;;  %v5697_v11 = vld [vmem:[%s8023_s1 + $0x50] ss:$12 sps:$4 sm:$0xff]   ;;  %v5701_v16 = vld [vmem:[%s8023_s1 + $0x38] ss:$12 sps:$4 sm:$0xff]   ;;  %v5686_v18 = vld [vmem:[%s8024_s30 + $0xa8] ss:$12 sps:$4 sm:$0xff]  }
 0x153   : > { %5304 = vmatpush3.bf16.msra.mxu1 %v5685_v1  ;;  %v5692_v19 = vld [vmem:[%s8024_s30 + $0x94] ss:$12 sps:$4 sm:$0xff]   ;;  %v5690_v22 = vld [vmem:[%s8024_s30 + $0x90] ss:$12 sps:$4 sm:$0xff]   ;;  %v5694_v28 = vld [vmem:[%s8024_s30 + $0x78] ss:$12 sps:$4 sm:$0xff]  }
 0x154   : > { %5305 = vmatprep.subr.bf16.mxu1 %v6093_v57  ;;  %v5705_v21 = vld [vmem:[%s8023_s1 + $0x20] ss:$12 sps:$4 sm:$0xff]   ;;  %v5696_v25 = vld [vmem:[%s8024_s30 + $0x7c] ss:$12 sps:$4 sm:$0xff]   ;;  %v5700_v30 = vld [vmem:[%s8024_s30 + $0x64] ss:$12 sps:$4 sm:$0xff]  }
 0x155   : > { %1222 = vmatpush1.bf16.msra.mxu0 %v5668_v60  ;;  %v5709_v26 = vld [vmem:[%s8023_s1 + $0x8] ss:$12 sps:$4 sm:$0xff]   ;;  %v5713_v31 = vld [vmem:[%s8024_s30 + $0xb0] ss:$12 sps:$4 sm:$0xff]   ;;  %v5698_v33 = vld [vmem:[%s8024_s30 + $0x60] ss:$12 sps:$4 sm:$0xff]  }
 0x156   : > { %1223 = vmatprep.subr.bf16.mxu0 %v5669_v61  ;;  %v5704_v34 = vld [vmem:[%s8024_s30 + $0x4c] ss:$12 sps:$4 sm:$0xff]   ;;  %v5702_v39 = vld [vmem:[%s8024_s30 + $0x48] ss:$12 sps:$4 sm:$0xff]   ;;  %v5706_v42 = vld [vmem:[%s8024_s30 + $0x30] ss:$12 sps:$4 sm:$0xff]  }
 0x157   : > { %5306 = vmatpush3.bf16.msra.mxu1 %v5689_v5  ;;  %v5717_v38 = vld [vmem:[%s8024_s30 + $0x98] ss:$12 sps:$4 sm:$0xff]   ;;  %v5708_v40 = vld [vmem:[%s8024_s30 + $0x34] ss:$12 sps:$4 sm:$0xff]   ;;  %v5712_v43 = vld [vmem:[%s8024_s30 + $0x1c] ss:$12 sps:$4 sm:$0xff]  }
 0x158   : > { %5307 = vmatprep.subr.bf16.mxu1 %v6093_v57  ;;  %v5718_v41 = vld [vmem:[%s8024_s30 + $0x80] ss:$12 sps:$4 sm:$0xff]   ;;  %v5719_v45 = vld [vmem:[%s8024_s30 + $0x68] ss:$12 sps:$4 sm:$0xff]   ;;  %v5710_v47 = vld [vmem:[%s8024_s30 + $0x18] ss:$12 sps:$4 sm:$0xff]  }
 0x159   : > { %1224 = vmatpush1.bf16.msra.mxu0 %v5671_v63  ;;  %v5716_v48 = vld [vmem:[%s8024_s30 + $0x4] ss:$12 sps:$4 sm:$0xff]   ;;  %v5714_v50 = vld [vmem:[%s8024_s30] ss:$12 sps:$4 sm:$0xff]   ;;  %v5723_v54 = vld [vmem:[%s8024_s30 + $0x8] ss:$12 sps:$4 sm:$0xff]  }
 0x15a   : > { %1225 = vmatprep.subr.bf16.mxu0 %v5672_v0  ;;  %v5720_v49 = vld [vmem:[%s8024_s30 + $0x50] ss:$12 sps:$4 sm:$0xff]   ;;  %v5721_v37 = vld [vmem:[%s8024_s30 + $0x38] ss:$12 sps:$4 sm:$0xff]   ;;  %v5722_v29 = vld [vmem:[%s8024_s30 + $0x20] ss:$12 sps:$4 sm:$0xff]  }
 0x15b   : > { %5308 = vmatpush3.bf16.msra.mxu1 %v5693_v8  ;;  %s6825_s10 = scalar_lea.vmem [#allocation6], %s5037_s9  ;;  %s5038_s2 = smul.u32 48, %s1044_s11 }
 0x15c   : > { %5309 = vmatprep.subr.bf16.mxu1 %v6093_v57  ;;  %v1050_v55 = vld [vmem:[%s6825_s10] sm:$0xff]  ;;  %v1051_v58 = vld [vmem:[%s6825_s10 + $0x8] sm:$0xff]  ;;  %s1671_s6 = scalar_lea.vmem [#allocation8], %s5041_s12  ;;  %s1675_s3 = ssub.s32 7, %s6086_s5 }
 0x15d   : > { %1226 = vmatpush1.bf16.msra.mxu0 %v5674_v2  ;;  %v1054_v62 = vld [vmem:[%s6825_s10 + $0x20] sm:$0xff]  ;;  %s6836_s25 = scalar_lea.vmem [#allocation7], %s5038_s2  ;;  %s5044_s26 = sshll.u32 %s1675_s3, 3 }
 0x15e   : > { %1227 = vmatprep.subr.bf16.mxu0 %v5675_v4  ;;  %s1685_s7 = scalar_lea.vmem [#allocation9], %s5044_s26  ;;  %p1035_p2 = scmp.ge.s32.totalorder %s6833_s0, 8  }
 0x15f   : > { %5310 = vmatpush3.bf16.msra.mxu1 %v5697_v11  ;;  %s8025_s5 = smov %s6833_s0  ;;  %s8026_s13 = sld [smem:[#allocation14_spill]] (%p1035_p2) }
 0x160   : > { %5311 = vmatprep.subr.bf16.mxu1 %v6093_v57  ;;  %s8027_s1 = sld [smem:[#allocation13_spill]] (%p1035_p2) }
 0x161   : > { %1228 = vmatpush1.bf16.msra.mxu0 %v5677_v6  ;;  %s8028_s26 = sld [smem:[#allocation16_spill]] (%p1035_p2) }
 0x162   : > { %1229 = vmatprep.subr.bf16.mxu0 %v5678_v7  ;;  %s8029_s4 = sld [smem:[#allocation17_spill]] (%p1035_p2) }
 0x163   : > { %5312 = vmatpush3.bf16.msra.mxu1 %v5701_v16 }
 0x164   : > { %5313 = vmatprep.subr.bf16.mxu1 %v6093_v57 }
 0x165   : > { %1230 = vmatpush1.bf16.msra.mxu0 %v5680_v9 }
 0x166   : > { %1231 = vmatprep.subr.bf16.mxu0 %v5682_v10 }
 0x167   : > { %5314 = vmatpush3.bf16.msra.mxu1 %v5705_v21 }
 0x168   : > { %5315 = vmatprep.subr.bf16.mxu1 %v6093_v57 }
 0x169   : > { %1232 = vmatpush1.bf16.msra.mxu0 %v5684_v12 }
 0x16a   : > { %1523 = vmatprep.subr.bf16.mxu0 %v5688_v15  ;;  %v1356_v15 = vld [vmem:[%s6836_s25] sm:$0xff] }
 0x16b   : > { %5316 = vmatpush3.bf16.msra.mxu1 %v5709_v26  ;;  %v1052_v26 = vld [vmem:[%s6825_s10 + $0x10] sm:$0xff] }
 0x16c   : > { %1250 = vmatmul.mubr.bf16.vlgmr.msra.gmra.mxu0 %v1056_v17  ;;  %5321 = vmatprep.subr.bf16.mxu1 %v6093_v57 }
 0x16d   : > { %1524 = vmatpush1.bf16.msra.mxu0 %v5686_v18  ;;  %1555 = vmatprep.mubr.bf16.mxu0 %v6094_v32  ;;  %v1053_v32 = vld [vmem:[%s6825_s10 + $0x18] sm:$0xff] }
 0x16e   : > { %1525 = vmatprep.subr.bf16.mxu0 %v5692_v19  ;;  %5318 = vmatmul.mubr.bf16.vlgmr.msra.gmra.mxu1 %v1056_v17 }
 0x16f   : > { %5322 = vmatpush3.bf16.msra.mxu1 %v5713_v31  ;;  %5337 = vmatprep.mubr.msk.bf16.mxu1 %vm6095_vm0, %v6093_v57 }
 0x170   : > { %5323 = vmatprep.subr.bf16.mxu1 %v6093_v57 }
 0x171   : > { %1526 = vmatpush1.bf16.msra.mxu0 %v5690_v22 }
 0x172   : > { %1527 = vmatprep.subr.bf16.mxu0 %v5696_v25 }
 0x173   : > { %5324 = vmatpush3.bf16.msra.mxu1 %v5717_v38 }
 0x174   : > { %5325 = vmatprep.subr.bf16.mxu1 %v6093_v57 }
 0x175   : > { %1528 = vmatpush1.bf16.msra.mxu0 %v5694_v28 }
 0x176   : > { %1529 = vmatprep.subr.bf16.mxu0 %v5700_v30 }
 0x177   : > { %5326 = vmatpush3.bf16.msra.mxu1 %v5718_v41 }
 0x178   : > { %5327 = vmatprep.subr.bf16.mxu1 %v6093_v57 }
 0x179   : > { %1530 = vmatpush1.bf16.msra.mxu0 %v5698_v33  ;;  %v1359_v33 = vld [vmem:[%s6836_s25 + $0x18] sm:$0xff] }
 0x17a   : > { %1531 = vmatprep.subr.bf16.mxu0 %v5704_v34  ;;  %v1357_v34 = vld [vmem:[%s6836_s25 + $0x8] sm:$0xff] }
 0x17b   : > { %5328 = vmatpush3.bf16.msra.mxu1 %v5719_v45 }
 0x17c   : > { %5329 = vmatprep.subr.bf16.mxu1 %v6093_v57 }
 0x17d   : > { %1532 = vmatpush1.bf16.msra.mxu0 %v5702_v39 }
 0x17e   : > { %1533 = vmatprep.subr.bf16.mxu0 %v5708_v40 }
 0x17f   : > { %5330 = vmatpush3.bf16.msra.mxu1 %v5720_v49 }
 0x180   : > { %5331 = vmatprep.subr.bf16.mxu1 %v6093_v57 }
 0x181   : > { %1534 = vmatpush1.bf16.msra.mxu0 %v5706_v42  ;;  %v1055_v42 = vld [vmem:[%s6825_s10 + $0x28] sm:$0xff] }
 0x182   : > { %1535 = vmatprep.subr.bf16.mxu0 %v5712_v43 }
 0x183   : > { %5332 = vmatpush3.bf16.msra.mxu1 %v5721_v37 }
 0x184   : > { %5333 = vmatprep.subr.bf16.mxu1 %v6093_v57 }
 0x185   : > { %1536 = vmatpush1.bf16.msra.mxu0 %v5710_v47 }
 0x186   : > { %1537 = vmatprep.subr.bf16.mxu0 %v5716_v48 }
 0x187   : > { %5334 = vmatpush3.bf16.msra.mxu1 %v5722_v29 }
 0x188   : > { %5335 = vmatprep.subr.bf16.mxu1 %v6093_v57 }
 0x189   : > { %1538 = vmatpush1.bf16.msra.mxu0 %v5714_v50  ;;  %v1360_v50 = vld [vmem:[%s6836_s25 + $0x20] sm:$0xff] }
 0x18b   : > { %5336 = vmatpush3.bf16.msra.mxu1 %v5723_v54 }
 0x18c   : > { %1556 = vmatmul.mubr.bf16.vlgmr.msra.gmra.mxu0 %v1362_v44 }
 0x18d   :  { %1992 = vmatprep.mubr.bf16.mxu0 (%p1035_p2), %v6092_v3 }
 0x18e   : > { %5338 = vmatmul.mubr.bf16.vlgmr.msra.gmra.mxu1 %v1362_v44 }
 0x22c   : > { %v1251_v56 = vpop.f32.mrf.mxu0 }
 0x22d   : > { %v1301_v53 = vadd.f32 %v1251_v56, %v1050_v55 }
 0x22e   : > { %v1253_v46 = vpop.f32.mrf.mxu0  ;;  %v1294_v0 = vpop.f32.mrf.mxu1 }
 0x22f   : > { %v4781_v27 = vmul.f32 -1.442695, %v1301_v53  ;;  %v1315_v60 = vadd.f32 %v1253_v46, %v1051_v58  ;;  %v1335_v18 = vadd.f32 %v6535_v35, %v1294_v0 }
 0x230   : > { %v1255_v57 = vpop.f32.mrf.mxu0  ;;  %v5319_v4 = vpop.f32.mrf.mxu1 }
 0x231   : > { %5724 = vpow2.f32 %v4781_v27  ;;  %v1302_v59 = vadd.f32 %v1255_v57, %v1053_v32  ;;  %v4783_v2 = vmul.f32 -1.442695, %v1315_v60 }
 0x232   : > { %v1257_v63 = vpop.f32.mrf.mxu0  ;;  %v1297_v5 = vpop.f32.mrf.mxu1 }
 0x233   : > { %v4782_v61 = vmul.f32 -1.442695, %v1302_v59  ;;  %v1316_v1 = vadd.f32 %v1257_v63, %v1054_v62  ;;  %v1336_v40 = vadd.f32 %v6535_v35, %v1297_v5  ;;  %v5770_v35 = vld [vmem:[%s8026_s13 + $0x98] ss:$12 sps:$4 sm:$0xff] (%p1035_p2)  }
 0x234   : > { %v5320_v7 = vpop.f32.mrf.mxu1 }
 0x235   : > { %5726 = vpow2.f32 %v4782_v61  ;;  %v4784_v6 = vmul.f32 -1.442695, %v1316_v1 }
 0x236   : > { %5728 = vpow2.f32 %v4783_v2 }
 0x237   : > { %5730 = vpow2.f32 %v4784_v6 }
 0x23e   : > { %v5725_v8 = vpop.eup %5724 }
 0x23f   : > { %v1309_v9 = vadd.f32 1.0, %v5725_v8 }
 0x241   : > { %5732 = vrcp.f32 %v1309_v9 }
 0x242   : > { %v5727_v10 = vpop.eup %5726 }
 0x243   : > { %v1310_v11 = vadd.f32 1.0, %v5727_v10  ;;  %v5729_v12 = vpop.eup %5728 }
 0x244   : > { %v5731_v16 = vpop.eup %5730  ;;  %v1323_v17 = vadd.f32 1.0, %v5729_v12 }
 0x245   : > { %5734 = vrcp.f32 %v1310_v11  ;;  %v1324_v25 = vadd.f32 1.0, %v5731_v16 }
 0x246   : > { %5736 = vrcp.f32 %v1323_v17 }
 0x24c   : > { %v1557_v19 = vpop.f32.mrf.mxu0 }
 0x24d   : > { %v1607_v21 = vadd.f32 %v1557_v19, %v1356_v15  ;;  %v1358_v15 = vld [vmem:[%s6836_s25 + $0x10] sm:$0xff] }
 0x24e   : > { %v5733_v22 = vpop.eup %5732  ;;  %v1559_v28 = vpop.f32.mrf.mxu0 }
 0x24f   : > { %v1337_v30 = vmul.f32 %v5733_v22, %v1335_v18  ;;  %v4811_v31 = vmul.f32 -1.442695, %v1607_v21  ;;  %v1621_v47 = vadd.f32 %v1559_v28, %v1357_v34  ;;  %v1600_v44 = vpop.f32.mrf.mxu1  ;;  %v1361_v21 = vld [vmem:[%s6836_s25 + $0x28] sm:$0xff] }
 0x250   : > { %v1561_v38 = vpop.f32.mrf.mxu0  ;;  %v1641_v10 = vadd.f32 %v6540_v36, %v1600_v44  ;;  %v5776_v44 = vld [vmem:[%s8026_s13 + $0x64] ss:$12 sps:$4 sm:$0xff] (%p1035_p2)  }
 0x251   : > { %v1339_v39 = vadd.f32 %v1337_v30, %v1052_v26  ;;  %5738 = vpow2.f32 %v4811_v31  ;;  %v1608_v43 = vadd.f32 %v1561_v38, %v1359_v33  ;;  %v4813_v29 = vmul.f32 -1.442695, %v1621_v47  ;;  %v5339_v54 = vpop.f32.mrf.mxu1  ;;  %v5767_v47 = vld [vmem:[%s8026_s13 + $0xa8] ss:$12 sps:$4 sm:$0xff] (%p1035_p2)  }
 0x252   : > { %v5735_v41 = vpop.eup %5734  ;;  %5740 = vrcp.f32 %v1324_v25  ;;  %v1563_v37 = vpop.f32.mrf.mxu0  ;;  %v5779_v54 = vld [vmem:[%s8026_s13 + $0x60] ss:$12 sps:$4 sm:$0xff] (%p1035_p2)  }
 0x253   : > { %5742 = vtanh.f32 %v1339_v39  ;;  %v1338_v45 = vmul.f32 %v5735_v41, %v1336_v40  ;;  %v4812_v48 = vmul.f32 -1.442695, %v1608_v43  ;;  %v1622_v55 = vadd.f32 %v1563_v37, %v1360_v50  ;;  %v1603_v56 = vpop.f32.mrf.mxu1  ;;  %v5737_v46 = vpop.eup %5736  ;;  %v5774_v50 = vld [vmem:[%s8026_s13 + $0x80] ss:$12 sps:$4 sm:$0xff] (%p1035_p2)   ;;  %v5775_v37 = vld [vmem:[%s8026_s13 + $0x78] ss:$12 sps:$4 sm:$0xff] (%p1035_p2)  }
 0x254   : > { %v1343_v57 = vsub.f32 1.0, %v5737_v46  ;;  %v1347_v61 = vmul.f32 %v5737_v46, %v6716_v13  ;;  %v1642_v18 = vadd.f32 %v6540_v36, %v1603_v56  ;;  %v5771_v36 = vld [vmem:[%s8026_s13 + $0x90] ss:$12 sps:$4 sm:$0xff] (%p1035_p2)   ;;  %v5784_v46 = vld [vmem:[%s8026_s13 + $0x34] ss:$12 sps:$4 sm:$0xff] (%p1035_p2)  }
 0x255   : > { %v1340_v49 = vadd.f32 %v1338_v45, %v1055_v42  ;;  %5744 = vpow2.f32 %v4812_v48  ;;  %v5340_v53 = vpop.f32.mrf.mxu1  ;;  %v4814_v32 = vmul.f32 -1.442695, %v1622_v55  ;;  %v5768_v48 = vld [vmem:[%s8026_s13 + $0x94] ss:$12 sps:$4 sm:$0xff] (%p1035_p2)   ;;  %v5780_v55 = vld [vmem:[%s8026_s13 + $0x4c] ss:$12 sps:$4 sm:$0xff] (%p1035_p2)  }
 0x256   :  { %v5782_v56 = vld [vmem:[%s8026_s13 + $0x50] ss:$12 sps:$4 sm:$0xff] (%p1035_p2)   ;;  %v5783_v53 = vld [vmem:[%s8026_s13 + $0x48] ss:$12 sps:$4 sm:$0xff] (%p1035_p2)  }
 0x257   : > { %5746 = vtanh.f32 %v1340_v49  ;;  %v5772_v49 = vld [vmem:[%s8026_s13 + $0x7c] ss:$12 sps:$4 sm:$0xff] (%p1035_p2)  }
 0x258   : > { %5748 = vpow2.f32 %v4813_v29  ;;  %v5778_v29 = vld [vmem:[%s8026_s13 + $0x68] ss:$12 sps:$4 sm:$0xff] (%p1035_p2)  }
 0x259   : > { %5750 = vpow2.f32 %v4814_v32  ;;  %v5786_v32 = vld [vmem:[%s8026_s13 + $0x38] ss:$12 sps:$4 sm:$0xff] (%p1035_p2)  }
 0x25e   : > { %v5739_v27 = vpop.eup %5738 }
 0x25f   : > { %v5741_v58 = vpop.eup %5740  ;;  %v1615_v59 = vadd.f32 1.0, %v5739_v27 }
 0x260   : > { %v5743_v60 = vpop.eup %5742  ;;  %v1344_v0 = vsub.f32 1.0, %v5741_v58  ;;  %v1348_v5 = vmul.f32 %v5741_v58, %v6718_v14  ;;  %v5787_v58 = vld [vmem:[%s8026_s13 + $0x30] ss:$12 sps:$4 sm:$0xff] (%p1035_p2)  }
 0x261   : > { %v1345_v62 = vmul.f32 %v5743_v60, %v1343_v57  ;;  %5752 = vrcp.f32 %v1615_v59  ;;  %v5788_v57 = vld [vmem:[%s8026_s13 + $0x1c] ss:$12 sps:$4 sm:$0xff] (%p1035_p2)   ;;  %v5790_v59 = vld [vmem:[%s8026_s13 + $0x20] ss:$12 sps:$4 sm:$0xff] (%p1035_p2)   ;;  %v5791_v60 = vld [vmem:[%s8026_s13 + $0x18] ss:$12 sps:$4 sm:$0xff] (%p1035_p2)  }
 0x262   : > { %v5745_v63 = vpop.eup %5744 }
 0x263   : > { %v1349_v1 = vadd.f32 %v1347_v61, %v1345_v62  ;;  %v1616_v4 = vadd.f32 1.0, %v5745_v63  ;;  %v5792_v61 = vld [vmem:[%s8026_s13 + $0x4] ss:$12 sps:$4 sm:$0xff] (%p1035_p2)   ;;  %v5794_v62 = vld [vmem:[%s8026_s13 + $0x8] ss:$12 sps:$4 sm:$0xff] (%p1035_p2)  }
 0x264   : > { %v5747_v2 = vpop.eup %5746  ;;  %v5795_v63 = vld [vmem:[%s8026_s13] ss:$12 sps:$4 sm:$0xff] (%p1035_p2)  }
 0x265   : > { %1657 = vst [vmem:[#allocation2] sm:$0xff] %v1349_v1  ;;  %v1346_v6 = vmul.f32 %v5747_v2, %v1344_v0  ;;  %5754 = vrcp.f32 %v1616_v4  ;;  %v5749_v8 = vpop.eup %5748  ;;  %v5800_v0 = vld [vmem:[%s8027_s1 + $0xac] ss:$12 sps:$4 sm:$0xff] (%p1035_p2)   ;;  %v5798_v4 = vld [vmem:[%s8027_s1 + $0xa8] ss:$12 sps:$4 sm:$0xff] (%p1035_p2)  }
 0x266   : > { %v1629_v13 = vadd.f32 1.0, %v5749_v8  ;;  %v5751_v11 = vpop.eup %5750  ;;  %v5802_v8 = vld [vmem:[%s8027_s1 + $0x90] ss:$12 sps:$4 sm:$0xff] (%p1035_p2)  }
 0x267   : > { %v1350_v7 = vadd.f32 %v1348_v5, %v1346_v6  ;;  %v1630_v14 = vadd.f32 1.0, %v5751_v11  ;;  %v5804_v5 = vld [vmem:[%s8027_s1 + $0x94] ss:$12 sps:$4 sm:$0xff] (%p1035_p2)   ;;  %v5807_v11 = vld [vmem:[%s8027_s1 + $0x78] ss:$12 sps:$4 sm:$0xff] (%p1035_p2)  }
 0x268   : > { %5756 = vrcp.f32 %v1629_v13  ;;  %v5819_v13 = vld [vmem:[%s8027_s1 + $0x80] ss:$12 sps:$4 sm:$0xff] (%p1035_p2)  }
 0x269   : > { %1658 = vst [vmem:[#allocation2 + $0x8] sm:$0xff] %v1350_v7  ;;  %v5056_v9 = vpack.c.bf16 %v1350_v7, %v1349_v1  ;;  %v5801_v1 = vld [vmem:[%s8027_s1 + $0xb0] ss:$12 sps:$4 sm:$0xff] (%p1035_p2)   ;;  %v5810_v7 = vld [vmem:[%s8027_s1 + $0x98] ss:$12 sps:$4 sm:$0xff] (%p1035_p2)  }
 0x26b   : > { %5057 = vst [vmem:[%s1671_s6] sm:$0xff] %v5056_v9   ;;  %v5809_v9 = vld [vmem:[%s8027_s1 + $0x7c] ss:$12 sps:$4 sm:$0xff] (%p1035_p2)  }
 0x26e   : > { %v5753_v12 = vpop.eup %5752 }
 0x26f   : > { %v1643_v16 = vmul.f32 %v5753_v12, %v1641_v10  ;;  %v5813_v12 = vld [vmem:[%s8027_s1 + $0x64] ss:$12 sps:$4 sm:$0xff] (%p1035_p2)  }
 0x271   : > { %v1645_v17 = vadd.f32 %v1643_v16, %v1358_v15  ;;  %v5828_v16 = vld [vmem:[%s8027_s1 + $0x68] ss:$12 sps:$4 sm:$0xff] (%p1035_p2)  }
 0x272   : > { %v5755_v19 = vpop.eup %5754 }
 0x273   : > { %5758 = vtanh.f32 %v1645_v17  ;;  %v1644_v22 = vmul.f32 %v5755_v19, %v1642_v18  ;;  %v5818_v17 = vld [vmem:[%s8027_s1 + $0x4c] ss:$12 sps:$4 sm:$0xff] (%p1035_p2)   ;;  %v5816_v19 = vld [vmem:[%s8027_s1 + $0x48] ss:$12 sps:$4 sm:$0xff] (%p1035_p2)  }
 0x274   : > { %5760 = vrcp.f32 %v1630_v14  ;;  %v5811_v14 = vld [vmem:[%s8027_s1 + $0x60] ss:$12 sps:$4 sm:$0xff] (%p1035_p2)  }
 0x275   : > { %v1646_v25 = vadd.f32 %v1644_v22, %v1361_v21  ;;  %v5757_v26 = vpop.eup %5756  ;;  %v5822_v21 = vld [vmem:[%s8027_s1 + $0x34] ss:$12 sps:$4 sm:$0xff] (%p1035_p2)  }
 0x276   : > { %v1649_v28 = vsub.f32 1.0, %v5757_v26  ;;  %v1653_v33 = vmul.f32 %v5757_v26, %v6805_v51  ;;  %v5764_v51 = vld [vmem:[%s8026_s13 + $0xac] ss:$12 sps:$4 sm:$0xff] (%p1035_p2)   ;;  %v5820_v26 = vld [vmem:[%s8027_s1 + $0x30] ss:$12 sps:$4 sm:$0xff] (%p1035_p2)  }
 0x277   : > { %5762 = vtanh.f32 %v1646_v25  ;;  %1960 = vmatprep.subr.bf16.mxu0 (%p1035_p2), %v5764_v51  ;;  %v5833_v25 = vld [vmem:[%s8027_s1 + $0x50] ss:$12 sps:$4 sm:$0xff] (%p1035_p2)   ;;  %v5840_v51 = vld [vmem:[%s7993_s16 + $0x80] ss:$12 sps:$4 sm:$0xff] (%p1035_p2)  }
 0x278   :  { %1961 = vmatpush1.bf16.msra.mxu0 (%p1035_p2), %v5767_v47  ;;  %v5843_v47 = vld [vmem:[%s7993_s16 + $0x68] ss:$12 sps:$4 sm:$0xff] (%p1035_p2)  }
 0x279   :  { %1962 = vmatprep.subr.bf16.mxu0 (%p1035_p2), %v5768_v48  ;;  %v5848_v48 = vld [vmem:[%s7993_s16 + $0x50] ss:$12 sps:$4 sm:$0xff] (%p1035_p2)  }
 0x27c   :  { %1963 = vmatpush1.bf16.msra.mxu0 (%p1035_p2), %v5771_v36  ;;  %v5856_v36 = vld [vmem:[%s7993_s16 + $0x38] ss:$12 sps:$4 sm:$0xff] (%p1035_p2)  }
 0x27d   :  { %1964 = vmatprep.subr.bf16.mxu0 (%p1035_p2), %v5772_v49  ;;  %v5864_v49 = vld [vmem:[%s7993_s16 + $0x20] ss:$12 sps:$4 sm:$0xff] (%p1035_p2)  }
 0x280   : > { %v5759_v30 = vpop.eup %5758  ;;  %1965 = vmatpush1.bf16.msra.mxu0 (%p1035_p2), %v5775_v37  ;;  %v5872_v37 = vld [vmem:[%s7993_s16 + $0x8] ss:$12 sps:$4 sm:$0xff] (%p1035_p2)  }
 0x281   : > { %v5761_v31 = vpop.eup %5760  ;;  %v1651_v34 = vmul.f32 %v5759_v30, %v1649_v28  ;;  %1966 = vmatprep.subr.bf16.mxu0 (%p1035_p2), %v5776_v44  ;;  %v5836_v28 = vld [vmem:[%s8027_s1 + $0x38] ss:$12 sps:$4 sm:$0xff] (%p1035_p2)   ;;  %v5827_v30 = vld [vmem:[%s8027_s1 + $0x1c] ss:$12 sps:$4 sm:$0xff] (%p1035_p2)  }
 0x282   : > { %v1650_v39 = vsub.f32 1.0, %v5761_v31  ;;  %v1654_v41 = vmul.f32 %v5761_v31, %v6807_v52  ;;  %v5766_v52 = vld [vmem:[%s8026_s13 + $0xb0] ss:$12 sps:$4 sm:$0xff] (%p1035_p2)   ;;  %v5878_v44 = vld [vmem:[%s7992_s15 + $0xac] ss:$12 sps:$4 sm:$0xff] (%p1035_p2)  }
 0x283   : > { %v1655_v38 = vadd.f32 %v1653_v33, %v1651_v34  ;;  %5341 = vmatprep.subr.bf16.mxu1 (%p1035_p2), %v5766_v52  ;;  %v5825_v33 = vld [vmem:[%s8027_s1 + $0x18] ss:$12 sps:$4 sm:$0xff] (%p1035_p2)  }
 0x284   : > { %v5763_v40 = vpop.eup %5762  ;;  %5342 = vmatpush3.bf16.msra.mxu1 (%p1035_p2), %v5766_v52  ;;  %1967 = vmatpush1.bf16.msra.mxu0 (%p1035_p2), %v5779_v54  ;;  %v5831_v34 = vld [vmem:[%s8027_s1 + $0x4] ss:$12 sps:$4 sm:$0xff] (%p1035_p2)   ;;  %v7056_v52 = vld [vmem:[#allocation8 + $0x8] sm:$0xff] (%p1035_p2)  }
 0x285   : > { %1659 = vst [vmem:[#allocation3 + $0x8] sm:$0xff] %v1655_v38  ;;  %v1652_v42 = vmul.f32 %v5763_v40, %v1650_v39  ;;  %5343 = vmatprep.subr.bf16.mxu1 (%p1035_p2), %v5770_v35  ;;  %1968 = vmatprep.subr.bf16.mxu0 (%p1035_p2), %v5780_v55  ;;  %v5829_v39 = vld [vmem:[%s8027_s1] ss:$12 sps:$4 sm:$0xff] (%p1035_p2)   ;;  %v5834_v40 = vld [vmem:[%s7993_s16 + $0xb0] ss:$12 sps:$4 sm:$0xff] (%p1035_p2)  }
 0x286   :  { %v5845_v54 = vld [vmem:[%s7993_s16 + $0xa8] ss:$12 sps:$4 sm:$0xff] (%p1035_p2)  }
 0x287   : > { %v1656_v43 = vadd.f32 %v1654_v41, %v1652_v42  ;;  %v7038_v41 = vld [vmem:[#allocation8] sm:$0xff] (%p1035_p2)  }
 0x288   :  { %5344 = vmatpush3.bf16.msra.mxu1 (%p1035_p2), %v5770_v35  ;;  %1969 = vmatpush1.bf16.msra.mxu0 (%p1035_p2), %v5783_v53  ;;  %v5837_v42 = vld [vmem:[%s7993_s16 + $0x98] ss:$12 sps:$4 sm:$0xff] (%p1035_p2)   ;;  %v7068_v35 = vld [vmem:[#allocation8 + $0x10] sm:$0xff] (%p1035_p2)   ;;  %v5855_v53 = vld [vmem:[%s7993_s16 + $0x7c] ss:$12 sps:$4 sm:$0xff] (%p1035_p2)  }
 0x289   : > { %1660 = vst [vmem:[#allocation3] sm:$0xff] %v1656_v43  ;;  %v5061_v45 = vpack.c.bf16 %v1656_v43, %v1655_v38  ;;  %1037 = sbr.rel (!%p1035_p2) target bundleno = 325 (0x145), region = 134  ;;  %5345 = vmatprep.subr.bf16.mxu1 (%p1035_p2), %v5774_v50  ;;  %1970 = vmatprep.subr.bf16.mxu0 (%p1035_p2), %v5784_v46  ;;  %v5839_v38 = vld [vmem:[%s8027_s1 + $0x20] ss:$12 sps:$4 sm:$0xff] (%p1035_p2)   ;;  %v5842_v43 = vld [vmem:[%s8027_s1 + $0x8] ss:$12 sps:$4 sm:$0xff] (%p1035_p2)  }
 0x28a   :  { %v5851_v55 = vld [vmem:[%s7993_s16 + $0x94] ss:$12 sps:$4 sm:$0xff] (%p1035_p2)   ;;  %v7110_v46 = vld [vmem:[#allocation8 + $0x28] sm:$0xff] (%p1035_p2)  }
 0x28b   : > { %5062 = vst [vmem:[%s1685_s7] sm:$0xff] %v5061_v45   ;;  %v5847_v45 = vld [vmem:[%s7993_s16 + $0xac] ss:$12 sps:$4 sm:$0xff] (%p1035_p2)  }
 0x28c   :  { %5346 = vmatpush3.bf16.msra.mxu1 (%p1035_p2), %v5774_v50  ;;  %1971 = vmatpush1.bf16.msra.mxu0 (%p1035_p2), %v5787_v58  ;;  %v7080_v50 = vld [vmem:[#allocation8 + $0x18] sm:$0xff] (%p1035_p2)   ;;  %v5859_v58 = vld [vmem:[%s7993_s16 + $0x64] ss:$12 sps:$4 sm:$0xff] (%p1035_p2)  }
 0x28d   :  { %5347 = vmatprep.subr.bf16.mxu1 (%p1035_p2), %v5778_v29  ;;  %1972 = vmatprep.subr.bf16.mxu0 (%p1035_p2), %v5788_v57  ;;  %v5857_v57 = vld [vmem:[%s7993_s16 + $0x60] ss:$12 sps:$4 sm:$0xff] (%p1035_p2)  }
 0x290   :  { %5348 = vmatpush3.bf16.msra.mxu1 %v5778_v29  ;;  %1973 = vmatpush1.bf16.msra.mxu0 %v5791_v60  ;;  %v7092_v29 = vld [vmem:[#allocation8 + $0x20] sm:$0xff]   ;;  %v7128_v60 = vld [vmem:[#allocation8 + $0x30] sm:$0xff]  }
 0x291   :  { %5349 = vmatprep.subr.bf16.mxu1 %v5782_v56  ;;  %1974 = vmatprep.subr.bf16.mxu0 %v5792_v61  ;;  %v5861_v61 = vld [vmem:[%s7993_s16 + $0x48] ss:$12 sps:$4 sm:$0xff]  }
 0x292   :  { %v6912_v27 = vld [vmem:[#allocation9] sm:$0xff]   ;;  %v6942_v2 = vld [vmem:[#allocation9 + $0x8] sm:$0xff]   ;;  %v6950_v6 = vld [vmem:[#allocation9 + $0x10] sm:$0xff]  }
 0x293   :  { %5357 = vmatprep.mubr.bf16.mxu1 %v6912_v27  ;;  %v6968_v10 = vld [vmem:[#allocation9 + $0x18] sm:$0xff]   ;;  %v6976_v15 = vld [vmem:[#allocation9 + $0x20] sm:$0xff]   ;;  %v6991_v18 = vld [vmem:[#allocation9 + $0x28] sm:$0xff]  }
 0x294   :  { %5350 = vmatpush3.bf16.msra.mxu1 %v5782_v56  ;;  %1975 = vmatpush1.bf16.msra.mxu0 %v5795_v63  ;;  %v6999_v22 = vld [vmem:[#allocation9 + $0x30] sm:$0xff]   ;;  %v7017_v31 = vld [vmem:[#allocation9 + $0x38] sm:$0xff]  }
 0x295   :  { %5351 = vmatprep.subr.bf16.mxu1 %v5786_v32  ;;  %5373 = vmatprep.subr.bf16.mxu0 %v5801_v1  ;;  %v5849_v56 = vld [vmem:[%s7993_s16 + $0x90] ss:$12 sps:$4 sm:$0xff]  }
 0x296   :  { %v5865_v63 = vld [vmem:[%s7993_s16 + $0x30] ss:$12 sps:$4 sm:$0xff]  }
 0x297   :  { %1993 = vmatmul.mubr.bf16.vlgmr.msra.gmra.mxu0 %v6912_v27 }
 0x298   :  { %5352 = vmatpush3.bf16.msra.mxu1 %v5786_v32  ;;  %5374 = vmatpush3.bf16.msra.mxu0 %v5801_v1  ;;  %v5853_v32 = vld [vmem:[%s7993_s16 + $0x78] ss:$12 sps:$4 sm:$0xff]  }
 0x299   :  { %5353 = vmatprep.subr.bf16.mxu1 %v5790_v59  ;;  %2002 = vmatprep.mubr.bf16.mxu0 %v6092_v3  ;;  %v7146_v1 = vld [vmem:[#allocation8 + $0x38] sm:$0xff]  }
 0x29a   :  { %5375 = vmatprep.subr.bf16.mxu0 %v5810_v7 }
 0x29c   :  { %5354 = vmatpush3.bf16.msra.mxu1 %v5790_v59  ;;  %5376 = vmatpush3.bf16.msra.mxu0 %v5810_v7  ;;  %v5863_v59 = vld [vmem:[%s7993_s16 + $0x4c] ss:$12 sps:$4 sm:$0xff]  }
 0x29d   :  { %5355 = vmatprep.subr.bf16.mxu1 %v5794_v62  ;;  %5377 = vmatprep.subr.bf16.mxu0 %v5819_v13  ;;  %v5873_v7 = vld [vmem:[%s7993_s16] ss:$12 sps:$4 sm:$0xff]  }
 0x29f   :  { %2003 = vmatmul.mubr.bf16.gmra.mxu0 %v6942_v2 }
 0x2a0   :  { %5356 = vmatpush3.bf16.msra.mxu1 %v5794_v62  ;;  %2012 = vmatprep.mubr.bf16.mxu0 %v6092_v3  ;;  %v5867_v62 = vld [vmem:[%s7993_s16 + $0x34] ss:$12 sps:$4 sm:$0xff]  }
 0x2a1   :  { %2346 = vmatprep.subr.bf16.mxu1 %v5800_v0  ;;  %5378 = vmatpush3.bf16.msra.mxu0 %v5819_v13  ;;  %v5871_v0 = vld [vmem:[%s7993_s16 + $0x1c] ss:$12 sps:$4 sm:$0xff]   ;;  %v5882_v13 = vld [vmem:[%s7992_s15 + $0x94] ss:$12 sps:$4 sm:$0xff]  }
 0x2a2   :  { %5379 = vmatprep.subr.bf16.mxu0 %v5828_v16 }
 0x2a3   :  { %5358 = vmatmul.mubr.bf16.vlgmr.msra.gmra.mxu1 %v6942_v2 }
 0x2a4   :  { %2347 = vmatpush1.bf16.msra.mxu1 %v5798_v4  ;;  %5361 = vmatprep.mubr.bf16.mxu1 %v6950_v6  ;;  %v5869_v4 = vld [vmem:[%s7993_s16 + $0x18] ss:$12 sps:$4 sm:$0xff]  }
 0x2a5   :  { %2348 = vmatprep.subr.bf16.mxu1 %v5804_v5  ;;  %5380 = vmatpush3.bf16.msra.mxu0 %v5828_v16  ;;  %v5875_v5 = vld [vmem:[%s7993_s16 + $0x4] ss:$12 sps:$4 sm:$0xff]   ;;  %v5885_v16 = vld [vmem:[%s7992_s15 + $0x7c] ss:$12 sps:$4 sm:$0xff]  }
 0x2a6   :  { %5381 = vmatprep.subr.bf16.mxu0 %v5833_v25 }
 0x2a7   :  { %2013 = vmatmul.mubr.bf16.gmra.mxu0 %v6950_v6 }
 0x2a8   :  { %2349 = vmatpush1.bf16.msra.mxu1 %v5802_v8  ;;  %2022 = vmatprep.mubr.bf16.mxu0 %v6092_v3  ;;  %v5879_v8 = vld [vmem:[%s7992_s15 + $0xb0] ss:$12 sps:$4 sm:$0xff]  }
 0x2a9   :  { %2350 = vmatprep.subr.bf16.mxu1 %v5809_v9  ;;  %5382 = vmatpush3.bf16.msra.mxu0 %v5833_v25  ;;  %v5876_v9 = vld [vmem:[%s7992_s15 + $0xa8] ss:$12 sps:$4 sm:$0xff]  }
 0x2aa   :  { %5383 = vmatprep.subr.bf16.mxu0 %v5836_v28  ;;  %v5890_v25 = vld [vmem:[%s7992_s15 + $0x48] ss:$12 sps:$4 sm:$0xff]  }
 0x2ab   :  { %5362 = vmatmul.mubr.bf16.gmra.mxu1 %v6968_v10 }
 0x2ac   :  { %2351 = vmatpush1.bf16.msra.mxu1 %v5807_v11  ;;  %5365 = vmatprep.mubr.bf16.mxu1 %v6976_v15  ;;  %v5886_v11 = vld [vmem:[%s7992_s15 + $0x98] ss:$12 sps:$4 sm:$0xff]  }
 0x2ad   :  { %2352 = vmatprep.subr.bf16.mxu1 %v5813_v12  ;;  %5384 = vmatpush3.bf16.msra.mxu0 %v5836_v28  ;;  %v5880_v12 = vld [vmem:[%s7992_s15 + $0x90] ss:$12 sps:$4 sm:$0xff]  }
 0x2ae   :  { %5385 = vmatprep.subr.bf16.mxu0 %v5839_v38  ;;  %v5904_v28 = vld [vmem:[%s7992_s15 + $0x50] ss:$12 sps:$4 sm:$0xff]  }
 0x2af   :  { %2023 = vmatmul.mubr.bf16.gmra.mxu0 %v6968_v10 }
 0x2b0   :  { %2353 = vmatpush1.bf16.msra.mxu1 %v5811_v14  ;;  %2032 = vmatprep.mubr.bf16.mxu0 %v6092_v3  ;;  %v5893_v14 = vld [vmem:[%s7992_s15 + $0x80] ss:$12 sps:$4 sm:$0xff]  }
 0x2b1   :  { %2354 = vmatprep.subr.bf16.mxu1 %v5818_v17  ;;  %5386 = vmatpush3.bf16.msra.mxu0 %v5839_v38  ;;  %v5889_v17 = vld [vmem:[%s7992_s15 + $0x64] ss:$12 sps:$4 sm:$0xff]  }
 0x2b2   :  { %5387 = vmatprep.subr.bf16.mxu0 %v5842_v43  ;;  %v5903_v38 = vld [vmem:[%s7992_s15 + $0x4] ss:$12 sps:$4 sm:$0xff]  }
 0x2b3   :  { %5366 = vmatmul.mubr.bf16.gmra.mxu1 %v6991_v18 }
 0x2b4   :  { %2355 = vmatpush1.bf16.msra.mxu1 %v5816_v19  ;;  %5369 = vmatprep.mubr.bf16.mxu1 %v6999_v22  ;;  %v5900_v19 = vld [vmem:[%s7992_s15 + $0x68] ss:$12 sps:$4 sm:$0xff]  }
 0x2b5   :  { %2356 = vmatprep.subr.bf16.mxu1 %v5822_v21  ;;  %5388 = vmatpush3.bf16.msra.mxu0 %v5842_v43  ;;  %v5887_v21 = vld [vmem:[%s7992_s15 + $0x60] ss:$12 sps:$4 sm:$0xff]  }
 0x2b6   :  { %2861 = vmatprep.subr.bf16.mxu0 %v5847_v45 }
 0x2b7   :  { %2033 = vmatmul.mubr.bf16.gmra.mxu0 %v6976_v15 }
 0x2b8   :  { %2357 = vmatpush1.bf16.msra.mxu1 %v5820_v26  ;;  %2042 = vmatprep.mubr.bf16.mxu0 %v6092_v3  ;;  %v5896_v26 = vld [vmem:[%s7992_s15 + $0x34] ss:$12 sps:$4 sm:$0xff]  }
 0x2b9   :  { %2358 = vmatprep.subr.bf16.mxu1 %v5827_v30  ;;  %v5894_v30 = vld [vmem:[%s7992_s15 + $0x30] ss:$12 sps:$4 sm:$0xff]  }
 0x2bb   :  { %5370 = vmatmul.mubr.bf16.gmra.mxu1 %v7017_v31 }
 0x2bc   :  { %2359 = vmatpush1.bf16.msra.mxu1 %v5825_v33  ;;  %2378 = vmatprep.mubr.bf16.mxu1 %v6092_v3  ;;  %v5905_v33 = vld [vmem:[%s7992_s15 + $0x38] ss:$12 sps:$4 sm:$0xff]  }
 0x2bd   :  { %2360 = vmatprep.subr.bf16.mxu1 %v5831_v34  ;;  %v5897_v34 = vld [vmem:[%s7992_s15 + $0x18] ss:$12 sps:$4 sm:$0xff]  }
 0x2bf   :  { %2043 = vmatmul.mubr.bf16.gmra.mxu0 %v6991_v18 }
 0x2c0   :  { %2361 = vmatpush1.bf16.msra.mxu1 %v5829_v39  ;;  %2052 = vmatprep.mubr.bf16.mxu0 %v6092_v3  ;;  %v5906_v39 = vld [vmem:[%s7992_s15 + $0x20] ss:$12 sps:$4 sm:$0xff]  }
 0x2c1   :  { %5405 = vmatprep.subr.bf16.mxu1 %v5834_v40 }
 0x2c3   :  { %2379 = vmatmul.mubr.bf16.vlgmr.msra.gmra.mxu1 %v7038_v41 }
 0x2c4   :  { %5406 = vmatpush3.bf16.msra.mxu1 %v5834_v40  ;;  %2388 = vmatprep.mubr.bf16.mxu1 %v6092_v3  ;;  %v5901_v40 = vld [vmem:[%s7992_s15] ss:$12 sps:$4 sm:$0xff]  }
 0x2c5   :  { %5407 = vmatprep.subr.bf16.mxu1 %v5837_v42 }
 0x2c7   :  { %2053 = vmatmul.mubr.bf16.gmra.mxu0 %v6999_v22 }
 0x2c8   :  { %5408 = vmatpush3.bf16.msra.mxu1 %v5837_v42  ;;  %2062 = vmatprep.mubr.bf16.mxu0 %v6092_v3 }
 0x2c9   :  { %5409 = vmatprep.subr.bf16.mxu1 %v5840_v51 }
 0x2cb   :  { %2389 = vmatmul.mubr.bf16.gmra.mxu1 %v7056_v52 }
 0x2cc   :  { %2398 = vmatprep.mubr.bf16.mxu1 %v6092_v3  ;;  %5410 = vmatpush3.bf16.msra.mxu1 %v5840_v51 }
 0x2cd   :  { %5411 = vmatprep.subr.bf16.mxu1 %v5843_v47 }
 0x2cf   :  { %2063 = vmatmul.mubr.bf16.gmra.mxu0 %v7017_v31 }
 0x2d0   :  { %5412 = vmatpush3.bf16.msra.mxu1 %v5843_v47  ;;  %5389 = vmatprep.mubr.bf16.mxu0 %v7038_v41 }
 0x2d1   :  { %5413 = vmatprep.subr.bf16.mxu1 %v5848_v48 }
 0x2d3   :  { %2399 = vmatmul.mubr.bf16.gmra.mxu1 %v7068_v35 }
 0x2d4   :  { %2408 = vmatprep.mubr.bf16.mxu1 %v6092_v3  ;;  %5414 = vmatpush3.bf16.msra.mxu1 %v5848_v48 }
 0x2d5   :  { %5415 = vmatprep.subr.bf16.mxu1 %v5856_v36 }
 0x2d7   :  { %5390 = vmatmul.mubr.bf16.vlgmr.msra.gmra.mxu0 %v7056_v52 }
 0x2d8   :  { %5416 = vmatpush3.bf16.msra.mxu1 %v5856_v36  ;;  %2862 = vmatpush1.bf16.msra.mxu0 %v5845_v54 }
 0x2d9   :  { %5417 = vmatprep.subr.bf16.mxu1 %v5864_v49  ;;  %2863 = vmatprep.subr.bf16.mxu0 %v5851_v55 }
 0x2da   :  { %5393 = vmatprep.mubr.bf16.mxu0 %v7068_v35 }
 0x2db   :  { %2409 = vmatmul.mubr.bf16.gmra.mxu1 %v7080_v50 }
 0x2dc   :  { %2418 = vmatprep.mubr.bf16.mxu1 %v6092_v3  ;;  %5418 = vmatpush3.bf16.msra.mxu1 %v5864_v49 }
 0x2dd   :  { %5419 = vmatprep.subr.bf16.mxu1 %v5872_v37  ;;  %2864 = vmatpush1.bf16.msra.mxu0 %v5849_v56 }
 0x2de   :  { %2865 = vmatprep.subr.bf16.mxu0 %v5855_v53 }
 0x2df   :  { %5394 = vmatmul.mubr.bf16.gmra.mxu0 %v7080_v50 }
 0x2e0   :  { %5420 = vmatpush3.bf16.msra.mxu1 %v5872_v37  ;;  %5397 = vmatprep.mubr.bf16.mxu0 %v7092_v29 }
 0x2e1   :  { %3199 = vmatprep.subr.bf16.mxu1 %v5878_v44  ;;  %2866 = vmatpush1.bf16.msra.mxu0 %v5853_v32 }
 0x2e2   :  { %2867 = vmatprep.subr.bf16.mxu0 %v5859_v58 }
 0x2e3   :  { %2419 = vmatmul.mubr.bf16.gmra.mxu1 %v7092_v29 }
 0x2e4   :  { %2428 = vmatprep.mubr.bf16.mxu1 %v6092_v3 }
 0x2e5   :  { %2868 = vmatpush1.bf16.msra.mxu0 %v5857_v57 }
 0x2e6   :  { %2869 = vmatprep.subr.bf16.mxu0 %v5863_v59 }
 0x2e7   :  { %5398 = vmatmul.mubr.bf16.gmra.mxu0 %v7110_v46 }
 0x2e8   :  { %5401 = vmatprep.mubr.bf16.mxu0 %v7128_v60 }
 0x2e9   :  { %2870 = vmatpush1.bf16.msra.mxu0 %v5861_v61  ;;  %v7321_v61 = vld [vmem:[%s8028_s26] sm:$0x7] }
 0x2ea   :  { %2871 = vmatprep.subr.bf16.mxu0 %v5867_v62 }
 0x2eb   :  { %2429 = vmatmul.mubr.bf16.gmra.mxu1 %v7110_v46 }
 0x2ec   :  { %2438 = vmatprep.mubr.bf16.mxu1 %v6092_v3 }
 0x2ed   :  { %2872 = vmatpush1.bf16.msra.mxu0 %v5865_v63 }
 0x2ee   :  { %2873 = vmatprep.subr.bf16.mxu0 %v5871_v0  ;;  %v7329_v0 = vrot.slane %v7321_v61, %v6485_v20 }
 0x2ef   :  { %5402 = vmatmul.mubr.bf16.gmra.mxu0 %v7146_v1 }
 0x2f0   :  { %2893 = vmatprep.mubr.bf16.mxu0 %v6092_v3 }
 0x2f1   :  { %2874 = vmatpush1.bf16.msra.mxu0 %v5869_v4 }
 0x2f2   :  { %2875 = vmatprep.subr.bf16.mxu0 %v5875_v5 }
 0x2f3   :  { %2439 = vmatmul.mubr.bf16.gmra.mxu1 %v7128_v60 }
 0x2f4   :  { %2448 = vmatprep.mubr.bf16.mxu1 %v6092_v3 }
 0x2f5   :  { %2876 = vmatpush1.bf16.msra.mxu0 %v5873_v7  ;;  %v7335_v7 = vrot.slane %v7321_v61, %v6497_v24 }
 0x2f6   :  { %5437 = vmatprep.subr.bf16.mxu0 %v5879_v8 }
 0x2f8   :  { %2894 = vmatmul.mubr.bf16.vlgmr.msra.gmra.mxu0 %v6912_v27 }
 0x2f9   :  { %5438 = vmatpush3.bf16.msra.mxu0 %v5879_v8  ;;  %2903 = vmatprep.mubr.bf16.mxu0 %v6092_v3 }
 0x2fa   :  { %5439 = vmatprep.subr.bf16.mxu0 %v5886_v11 }
 0x2fb   :  { %2449 = vmatmul.mubr.bf16.gmra.mxu1 %v7146_v1 }
 0x2fc   :  { %5421 = vmatprep.mubr.bf16.mxu1 %v6912_v27  ;;  %v5883_v27 = vld [vmem:[%s7992_s15 + $0x78] ss:$12 sps:$4 sm:$0xff]  }
 0x2fd   :  { %5440 = vmatpush3.bf16.msra.mxu0 %v5886_v11 }
 0x2fe   :  { %5441 = vmatprep.subr.bf16.mxu0 %v5893_v14 }
 0x300   :  { %2904 = vmatmul.mubr.bf16.gmra.mxu0 %v6942_v2 }
 0x301   :  { %2913 = vmatprep.mubr.bf16.mxu0 %v6092_v3  ;;  %5442 = vmatpush3.bf16.msra.mxu0 %v5893_v14 }
 0x302   :  { %5443 = vmatprep.subr.bf16.mxu0 %v5900_v19 }
 0x303   :  { %5422 = vmatmul.mubr.bf16.vlgmr.msra.gmra.mxu1 %v6942_v2  ;;  %v5892_v2 = vld [vmem:[%s7992_s15 + $0x4c] ss:$12 sps:$4 sm:$0xff]  }
 0x304   :  { %3200 = vmatpush1.bf16.msra.mxu1 %v5876_v9  ;;  %5425 = vmatprep.mubr.bf16.mxu1 %v6950_v6 }
 0x305   :  { %3201 = vmatprep.subr.bf16.mxu1 %v5882_v13  ;;  %5444 = vmatpush3.bf16.msra.mxu0 %v5900_v19 }
 0x306   :  { %5445 = vmatprep.subr.bf16.mxu0 %v5904_v28 }
 0x308   :  { %3202 = vmatpush1.bf16.msra.mxu1 %v5880_v12  ;;  %2914 = vmatmul.mubr.bf16.gmra.mxu0 %v6950_v6  ;;  %v5899_v6 = vld [vmem:[%s7992_s15 + $0x1c] ss:$12 sps:$4 sm:$0xff]  }
 0x309   :  { %3203 = vmatprep.subr.bf16.mxu1 %v5885_v16  ;;  %2923 = vmatprep.mubr.bf16.mxu0 %v6092_v3 }
 0x30a   :  { %5446 = vmatpush3.bf16.msra.mxu0 %v5904_v28 }
 0x30b   :  { %5426 = vmatmul.mubr.bf16.gmra.mxu1 %v6968_v10  ;;  %5447 = vmatprep.subr.bf16.mxu0 %v5905_v33 }
 0x30c   :  { %3204 = vmatpush1.bf16.msra.mxu1 %v5883_v27  ;;  %5429 = vmatprep.mubr.bf16.mxu1 %v6976_v15 }
 0x30d   :  { %3205 = vmatprep.subr.bf16.mxu1 %v5889_v17 }
 0x30e   :  { %5448 = vmatpush3.bf16.msra.mxu0 %v5905_v33 }
 0x30f   :  { %5449 = vmatprep.subr.bf16.mxu0 %v5906_v39 }
 0x310   :  { %3206 = vmatpush1.bf16.msra.mxu1 %v5887_v21  ;;  %2924 = vmatmul.mubr.bf16.gmra.mxu0 %v6968_v10  ;;  %v5907_v10 = vld [vmem:[%s7992_s15 + $0x8] ss:$12 sps:$4 sm:$0xff]  }
 0x311   :  { %3207 = vmatprep.subr.bf16.mxu1 %v5892_v2  ;;  %2933 = vmatprep.mubr.bf16.mxu0 %v6092_v3 }
 0x312   :  { %5450 = vmatpush3.bf16.msra.mxu0 %v5906_v39 }
 0x313   :  { %5430 = vmatmul.mubr.bf16.gmra.mxu1 %v6991_v18  ;;  %5451 = vmatprep.subr.bf16.mxu0 %v5907_v10 }
 0x314   :  { %3208 = vmatpush1.bf16.msra.mxu1 %v5890_v25  ;;  %5433 = vmatprep.mubr.bf16.mxu1 %v6999_v22 }
 0x315   :  { %3209 = vmatprep.subr.bf16.mxu1 %v5896_v26 }
 0x316   :  { %5452 = vmatpush3.bf16.msra.mxu0 %v5907_v10 }
 0x318   :  { %3210 = vmatpush1.bf16.msra.mxu1 %v5894_v30  ;;  %2934 = vmatmul.mubr.bf16.gmra.mxu0 %v6976_v15 }
 0x319   :  { %3211 = vmatprep.subr.bf16.mxu1 %v5899_v6  ;;  %2943 = vmatprep.mubr.bf16.mxu0 %v6092_v3 }
 0x31b   :  { %5434 = vmatmul.mubr.bf16.gmra.mxu1 %v7017_v31 }
 0x31c   :  { %3212 = vmatpush1.bf16.msra.mxu1 %v5897_v34  ;;  %3231 = vmatprep.mubr.bf16.mxu1 %v6092_v3 }
 0x31d   :  { %3213 = vmatprep.subr.bf16.mxu1 %v5903_v38 }
 0x320   :  { %3214 = vmatpush1.bf16.msra.mxu1 %v5901_v40  ;;  %2944 = vmatmul.mubr.bf16.gmra.mxu0 %v6991_v18 }
 0x321   :  { %2953 = vmatprep.mubr.bf16.mxu0 %v6092_v3 }
 0x323   :  { %3232 = vmatmul.mubr.bf16.vlgmr.msra.gmra.mxu1 %v7038_v41 }
 0x324   :  { %3241 = vmatprep.mubr.bf16.mxu1 %v6092_v3 }
 0x328   :  { %2954 = vmatmul.mubr.bf16.gmra.mxu0 %v6999_v22 }
 0x329   :  { %2963 = vmatprep.mubr.bf16.mxu0 %v6092_v3 }
 0x32b   :  { %3242 = vmatmul.mubr.bf16.gmra.mxu1 %v7056_v52 }
 0x32c   :  { %3251 = vmatprep.mubr.bf16.mxu1 %v6092_v3 }
 0x330   :  { %2964 = vmatmul.mubr.bf16.gmra.mxu0 %v7017_v31 }
 0x331   :  { %5453 = vmatprep.mubr.bf16.mxu0 %v7038_v41 }
 0x333   :  { %3252 = vmatmul.mubr.bf16.gmra.mxu1 %v7068_v35 }
 0x334   :  { %3261 = vmatprep.mubr.bf16.mxu1 %v6092_v3 }
 0x338   :  { %5454 = vmatmul.mubr.bf16.vlgmr.msra.gmra.mxu0 %v7056_v52 }
 0x339   :  { %5457 = vmatprep.mubr.bf16.mxu0 %v7068_v35 }
 0x33b   :  { %3262 = vmatmul.mubr.bf16.gmra.mxu1 %v7080_v50 }
 0x33c   :  { %3271 = vmatprep.mubr.bf16.mxu1 %v6092_v3 }
 0x340   :  { %5458 = vmatmul.mubr.bf16.gmra.mxu0 %v7080_v50 }
 0x341   :  { %5461 = vmatprep.mubr.bf16.mxu0 %v7092_v29 }
 0x343   :  { %3272 = vmatmul.mubr.bf16.gmra.mxu1 %v7092_v29 }
 0x344   :  { %3281 = vmatprep.mubr.bf16.mxu1 %v6092_v3 }
 0x348   :  { %5462 = vmatmul.mubr.bf16.gmra.mxu0 %v7110_v46 }
 0x349   :  { %5465 = vmatprep.mubr.bf16.mxu0 %v7128_v60 }
 0x34b   :  { %3282 = vmatmul.mubr.bf16.gmra.mxu1 %v7110_v46 }
 0x34c   :  { %3291 = vmatprep.mubr.bf16.mxu1 %v6092_v3 }
 0x350   :  { %5466 = vmatmul.mubr.bf16.gmra.mxu0 %v7146_v1 }
 0x353   :  { %3292 = vmatmul.mubr.bf16.gmra.mxu1 %v7128_v60 }
 0x354   :  { %3301 = vmatprep.mubr.bf16.mxu1 %v6092_v3 }
 0x357   :  { %v1994_v15 = vpop.f32.mrf.mxu0 }
 0x359   :  { %v1996_v22 = vpop.f32.mrf.mxu0 }
 0x35b   :  { %3302 = vmatmul.mubr.bf16.gmra.mxu1 %v7146_v1  ;;  %v1998_v41 = vpop.f32.mrf.mxu0 }
 0x35d   :  { %v2000_v43 = vpop.f32.mrf.mxu0 }
 0x35f   :  { %v2004_v51 = vpop.f32.mrf.mxu0 }
 0x361   :  { %v2006_v52 = vpop.f32.mrf.mxu0 }
 0x363   :  { %v7276_v18 = vpop.f32.mrf.mxu1  ;;  %v2008_v48 = vpop.f32.mrf.mxu0 }
 0x365   :  { %v7278_v31 = vpop.f32.mrf.mxu1  ;;  %v2010_v36 = vpop.f32.mrf.mxu0 }
 0x367   :  { %v7280_v42 = vpop.f32.mrf.mxu1  ;;  %v2014_v50 = vpop.f32.mrf.mxu0 }
 0x369   :  { %v7282_v45 = vpop.f32.mrf.mxu1  ;;  %v7294_v44 = vpop.f32.mrf.mxu0 }
 0x36b   :  { %v7284_v3 = vpop.f32.mrf.mxu1  ;;  %v7298_v54 = vpop.f32.mrf.mxu0 }
 0x36d   :  { %v7286_v47 = vpop.f32.mrf.mxu1  ;;  %v7302_v56 = vpop.f32.mrf.mxu0 }
 0x36f   :  { %v7288_v35 = vpop.f32.mrf.mxu1  ;;  %v7306_v46 = vpop.f32.mrf.mxu0 }
 0x371   :  { %v7290_v49 = vpop.f32.mrf.mxu1  ;;  %v7310_v58 = vpop.f32.mrf.mxu0 }
 0x373   :  { %v7292_v37 = vpop.f32.mrf.mxu1  ;;  %v7314_v59 = vpop.f32.mrf.mxu0 }
 0x375   :  { %v7296_v29 = vpop.f32.mrf.mxu1  ;;  %v7323_v62 = vpop.f32.mrf.mxu0 }
 0x377   :  { %v7300_v55 = vpop.f32.mrf.mxu1  ;;  %v7331_v1 = vpop.f32.mrf.mxu0 }
 0x379   :  { %v7304_v53 = vpop.f32.mrf.mxu1  ;;  %v7337_v8 = vpop.f32.mrf.mxu0 }
 0x37b   :  { %v7308_v32 = vpop.f32.mrf.mxu1  ;;  %v7340_v12 = vpop.f32.mrf.mxu0 }
 0x37d   :  { %v7312_v57 = vpop.f32.mrf.mxu1  ;;  %v7343_v17 = vpop.f32.mrf.mxu0 }
 0x37f   :  { %v7316_v60 = vpop.f32.mrf.mxu1  ;;  %v7346_v25 = vpop.f32.mrf.mxu0 }
 0x381   :  { %v7325_v63 = vpop.f32.mrf.mxu1  ;;  %v7349_v33 = vpop.f32.mrf.mxu0 }
 0x383   :  { %v2380_v4 = vpop.f32.mrf.mxu1  ;;  %v7352_v39 = vpop.f32.mrf.mxu0 }
 0x384   :  { %v2381_v5 = vadd.f32 %v2380_v4, %v1994_v15 }
 0x385   :  { %v2382_v9 = vpop.f32.mrf.mxu1 }
 0x386   :  { %v2573_v13 = vadd.f32 %v7329_v0, %v2381_v5  ;;  %v2383_v11 = vadd.f32 %v2382_v9, %v1996_v22  ;;  %v7355_v22 = vpop.f32.mrf.mxu0 }
 0x387   :  { %v2384_v16 = vpop.f32.mrf.mxu1 }
 0x388   :  { %2621 = vst [vmem:[#allocation6] sm:$0xff] %v2573_v13  ;;  %v2574_v14 = vadd.f32 %v7335_v7, %v2383_v11  ;;  %v2385_v27 = vadd.f32 %v2384_v16, %v1998_v41  ;;  %v7358_v4 = vpop.f32.mrf.mxu0 }
 0x389   :  { %v2386_v19 = vpop.f32.mrf.mxu1 }
 0x38a   :  { %2622 = vst [vmem:[#allocation6 + $0x8] sm:$0xff] %v2574_v14  ;;  %v2576_v21 = vadd.f32 %v7329_v0, %v2385_v27  ;;  %v2387_v2 = vadd.f32 %v2386_v19, %v2000_v43  ;;  %v7361_v13 = vpop.f32.mrf.mxu0 }
 0x38b   :  { %v2390_v26 = vpop.f32.mrf.mxu1 }
 0x38c   :  { %2624 = vst [vmem:[#allocation6 + $0x18] sm:$0xff] %v2576_v21  ;;  %v2577_v28 = vadd.f32 %v7335_v7, %v2387_v2  ;;  %v2391_v30 = vadd.f32 %v2390_v26, %v2004_v51  ;;  %v7365_v14 = vpop.f32.mrf.mxu0 }
 0x38d   :  { %v2392_v6 = vpop.f32.mrf.mxu1 }
 0x38e   :  { %2625 = vst [vmem:[#allocation6 + $0x20] sm:$0xff] %v2577_v28  ;;  %v2579_v34 = vadd.f32 %v7329_v0, %v2391_v30  ;;  %v2393_v38 = vadd.f32 %v2392_v6, %v2006_v52  ;;  %v7369_v21 = vpop.f32.mrf.mxu0 }
 0x38f   :  { %v2394_v40 = vpop.f32.mrf.mxu1 }
 0x390   :  { %2627 = vst [vmem:[#allocation6 + $0x30] sm:$0xff] %v2579_v34  ;;  %v2580_v10 = vadd.f32 %v7335_v7, %v2393_v38  ;;  %v2395_v15 = vadd.f32 %v2394_v40, %v2008_v48  ;;  %v7373_v28 = vpop.f32.mrf.mxu0 }
 0x391   :  { %v2396_v41 = vpop.f32.mrf.mxu1 }
 0x392   :  { %2628 = vst [vmem:[#allocation6 + $0x38] sm:$0xff] %v2580_v10  ;;  %v2582_v43 = vadd.f32 %v7329_v0, %v2395_v15  ;;  %v2397_v51 = vadd.f32 %v2396_v41, %v2010_v36  ;;  %v7377_v34 = vpop.f32.mrf.mxu0 }
 0x393   :  { %v2400_v5 = vpop.f32.mrf.mxu1 }
 0x394   :  { %2630 = vst [vmem:[#allocation6 + $0x48] sm:$0xff] %v2582_v43  ;;  %v2583_v52 = vadd.f32 %v7335_v7, %v2397_v51  ;;  %v2401_v9 = vadd.f32 %v2400_v5, %v2014_v50  ;;  %v7381_v10 = vpop.f32.mrf.mxu0 }
 0x395   :  { %v2402_v11 = vpop.f32.mrf.mxu1 }
 0x396   :  { %2631 = vst [vmem:[#allocation6 + $0x50] sm:$0xff] %v2583_v52  ;;  %v2585_v48 = vadd.f32 %v7329_v0, %v2401_v9  ;;  %v2403_v16 = vadd.f32 %v2402_v11, %v7294_v44  ;;  %v7385_v43 = vpop.f32.mrf.mxu0  ;;  %v7391_v52 = vrot.slane %v7321_v61, %v6495_v23 }
 0x397   :  { %v2404_v27 = vpop.f32.mrf.mxu1 }
 0x398   :  { %2633 = vst [vmem:[#allocation6 + $0x60] sm:$0xff] %v2585_v48  ;;  %v2586_v36 = vadd.f32 %v7335_v7, %v2403_v16  ;;  %v2405_v19 = vadd.f32 %v2404_v27, %v7298_v54  ;;  %v5391_v9 = vpop.f32.mrf.mxu0 }
 0x399   :  { %v2406_v2 = vpop.f32.mrf.mxu1 }
 0x39a   :  { %2634 = vst [vmem:[#allocation6 + $0x68] sm:$0xff] %v2586_v36  ;;  %v2588_v50 = vadd.f32 %v7329_v0, %v2405_v19  ;;  %v2407_v26 = vadd.f32 %v2406_v2, %v7302_v56  ;;  %v2493_v27 = vpop.f32.mrf.mxu0  ;;  %v7403_v2 = vld [vmem:[%s8029_s4] ss:$0 sm:$0xff] }
 0x39b   :  { %v2410_v30 = vpop.f32.mrf.mxu1  ;;  %v2494_v61 = vadd.f32 %v2493_v27, %v7278_v31 }
 0x39c   :  { %2636 = vst [vmem:[#allocation6 + $0x78] sm:$0xff] %v2588_v50  ;;  %v2589_v44 = vadd.f32 %v7335_v7, %v2407_v26  ;;  %v2411_v6 = vadd.f32 %v2410_v30, %v7306_v46  ;;  %v5392_v50 = vpop.f32.mrf.mxu0 }
 0x39d   :  { %v2412_v38 = vpop.f32.mrf.mxu1  ;;  %v2505_v30 = vadd.f32 %v5392_v50, %v7280_v42 }
 0x39e   :  { %2637 = vst [vmem:[#allocation6 + $0x80] sm:$0xff] %v2589_v44  ;;  %v2591_v54 = vadd.f32 %v7329_v0, %v2411_v6  ;;  %v2413_v40 = vadd.f32 %v2412_v38, %v7310_v58  ;;  %v2496_v6 = vpop.f32.mrf.mxu0 }
 0x39f   :  { %v2414_v15 = vpop.f32.mrf.mxu1 }
 0x3a0   :  { %2639 = vst [vmem:[#allocation6 + $0x90] sm:$0xff] %v2591_v54  ;;  %v2592_v56 = vadd.f32 %v7335_v7, %v2413_v40  ;;  %v2415_v41 = vadd.f32 %v2414_v15, %v7314_v59  ;;  %v2502_v59 = vadd.f32 %v5391_v9, %v7276_v18  ;;  %v7408_v18 = vld [vmem:[%s7996_s19] ss:$0 sm:$0xff]  ;;  %v2584_v54 = vadd.f32 %v7391_v52, %v2505_v30 }
 0x3a1   :  { %v2416_v51 = vpop.f32.mrf.mxu1  ;;  %v2497_v15 = vadd.f32 %v2496_v6, %v7282_v45 }
 0x3a2   :  { %2640 = vst [vmem:[#allocation6 + $0x98] sm:$0xff] %v2592_v56  ;;  %v2594_v46 = vadd.f32 %v7329_v0, %v2415_v41  ;;  %v2417_v5 = vadd.f32 %v2416_v51, %v7323_v62  ;;  %v2581_v62 = vadd.f32 %v7391_v52, %v2502_v59  ;;  %v5395_v41 = vpop.f32.mrf.mxu0  ;;  %2632 = vst [vmem:[#allocation6 + $0x58] sm:$0xff] %v2584_v54 }
 0x3a3   :  { %v2420_v58 = vpop.f32.mrf.mxu1  ;;  %v2578_v42 = vadd.f32 %v7391_v52, %v2497_v15 }
 0x3a4   :  { %2642 = vst [vmem:[#allocation6 + $0xa8] sm:$0xff] %v2594_v46  ;;  %v2595_v11 = vadd.f32 %v7335_v7, %v2417_v5  ;;  %v2421_v48 = vadd.f32 %v2420_v58, %v7331_v1  ;;  %2629 = vst [vmem:[#allocation6 + $0x40] sm:$0xff] %v2581_v62  ;;  %v2518_v46 = vadd.f32 %v5395_v41, %v7284_v3  ;;  %v2509_v58 = vpop.f32.mrf.mxu0 }
 0x3a5   :  { %v2422_v16 = vpop.f32.mrf.mxu1  ;;  %2626 = vst [vmem:[#allocation6 + $0x28] sm:$0xff] %v2578_v42 }
 0x3a6   :  { %2643 = vst [vmem:[#allocation6 + $0xb0] sm:$0xff] %v2595_v11  ;;  %v2597_v36 = vadd.f32 %v7329_v0, %v2421_v48  ;;  %v2423_v19 = vadd.f32 %v2422_v16, %v7337_v8  ;;  %v2575_v8 = vadd.f32 %v7391_v52, %v2494_v61  ;;  %v2593_v45 = vadd.f32 %v7391_v52, %v2518_v46  ;;  %v5396_v59 = vpop.f32.mrf.mxu0 }
 0x3a7   :  { %v2424_v1 = vpop.f32.mrf.mxu1  ;;  %v2510_v11 = vadd.f32 %v2509_v58, %v7286_v47  ;;  %v2521_v27 = vadd.f32 %v5396_v59, %v7288_v35 }
 0x3a8   :  { %2645 = vst [vmem:[#allocation6 + $0xc0] sm:$0xff] %v2597_v36  ;;  %v2598_v26 = vadd.f32 %v7335_v7, %v2423_v19  ;;  %v2425_v31 = vadd.f32 %v2424_v1, %v7340_v12  ;;  %2623 = vst [vmem:[#allocation6 + $0x10] sm:$0xff] %v2575_v8  ;;  %v2512_v62 = vpop.f32.mrf.mxu0 }
 0x3a9   :  { %v2426_v44 = vpop.f32.mrf.mxu1  ;;  %2641 = vst [vmem:[#allocation6 + $0xa0] sm:$0xff] %v2593_v45  ;;  %v2587_v3 = vadd.f32 %v7391_v52, %v2510_v11  ;;  %v2596_v47 = vadd.f32 %v7391_v52, %v2521_v27  ;;  %v2513_v61 = vadd.f32 %v2512_v62, %v7290_v49 }
 0x3aa   :  { %2646 = vst [vmem:[#allocation6 + $0xc8] sm:$0xff] %v2598_v26  ;;  %v2600_v38 = vadd.f32 %v7329_v0, %v2425_v31  ;;  %v2427_v40 = vadd.f32 %v2426_v44, %v7343_v17  ;;  %v5399_v50 = vpop.f32.mrf.mxu0 }
 0x3ab   :  { %v2430_v56 = vpop.f32.mrf.mxu1  ;;  %2635 = vst [vmem:[#allocation6 + $0x70] sm:$0xff] %v2587_v3  ;;  %2644 = vst [vmem:[#allocation6 + $0xb8] sm:$0xff] %v2596_v47  ;;  %v2590_v35 = vadd.f32 %v7391_v52, %v2513_v61  ;;  %v2534_v8 = vadd.f32 %v5399_v50, %v7292_v37 }
 0x3ac   :  { %2648 = vst [vmem:[#allocation6 + $0xd8] sm:$0xff] %v2600_v38  ;;  %v2601_v12 = vadd.f32 %v7335_v7, %v2427_v40  ;;  %v2431_v51 = vadd.f32 %v2430_v56, %v7346_v25  ;;  %v2525_v30 = vpop.f32.mrf.mxu0 }
 0x3ad   :  { %v2432_v5 = vpop.f32.mrf.mxu1  ;;  %2638 = vst [vmem:[#allocation6 + $0x88] sm:$0xff] %v2590_v35  ;;  %v2605_v49 = vadd.f32 %v7391_v52, %v2534_v8  ;;  %v2526_v6 = vadd.f32 %v2525_v30, %v7296_v29 }
 0x3ae   :  { %2649 = vst [vmem:[#allocation6 + $0xe0] sm:$0xff] %v2601_v12  ;;  %v2603_v17 = vadd.f32 %v7329_v0, %v2431_v51  ;;  %v2433_v9 = vadd.f32 %v2432_v5, %v7349_v33  ;;  %v5400_v54 = vpop.f32.mrf.mxu0 }
 0x3af   :  { %v2434_v48 = vpop.f32.mrf.mxu1  ;;  %2653 = vst [vmem:[#allocation6 + $0x100] sm:$0xff] %v2605_v49  ;;  %v2599_v37 = vadd.f32 %v7391_v52, %v2526_v6  ;;  %v2537_v15 = vadd.f32 %v5400_v54, %v7300_v55 }
 0x3b0   :  { %2651 = vst [vmem:[#allocation6 + $0xf0] sm:$0xff] %v2603_v17  ;;  %v2604_v25 = vadd.f32 %v7335_v7, %v2433_v9  ;;  %v2435_v16 = vadd.f32 %v2434_v48, %v7352_v39  ;;  %v2528_v41 = vpop.f32.mrf.mxu0 }
 0x3b1   :  { %v2436_v36 = vpop.f32.mrf.mxu1  ;;  %2647 = vst [vmem:[#allocation6 + $0xd0] sm:$0xff] %v2599_v37  ;;  %v2608_v29 = vadd.f32 %v7391_v52, %v2537_v15  ;;  %v2529_v42 = vadd.f32 %v2528_v41, %v7304_v53 }
 0x3b2   :  { %2652 = vst [vmem:[#allocation6 + $0xf8] sm:$0xff] %v2604_v25  ;;  %v2606_v33 = vadd.f32 %v7329_v0, %v2435_v16  ;;  %v2437_v19 = vadd.f32 %v2436_v36, %v7355_v22  ;;  %v5403_v46 = vpop.f32.mrf.mxu0 }
 0x3b3   :  { %v2440_v1 = vpop.f32.mrf.mxu1  ;;  %2656 = vst [vmem:[#allocation6 + $0x118] sm:$0xff] %v2608_v29  ;;  %v2602_v55 = vadd.f32 %v7391_v52, %v2529_v42  ;;  %v2550_v58 = vadd.f32 %v5403_v46, %v7308_v32  ;;  %v7513_v29 = vld [vmem:[%s7995_s18] sm:$0x7]  ;;  %s7650_s18 = smov 0  }
 0x3b4   :  { %2654 = vst [vmem:[#allocation6 + $0x108] sm:$0xff] %v2606_v33  ;;  %v2607_v39 = vadd.f32 %v7335_v7, %v2437_v19  ;;  %v2441_v26 = vadd.f32 %v2440_v1, %v7358_v4  ;;  %v2541_v45 = vpop.f32.mrf.mxu0 }
 0x3b5   :  { %v2442_v31 = vpop.f32.mrf.mxu1  ;;  %2650 = vst [vmem:[#allocation6 + $0xe8] sm:$0xff] %v2602_v55  ;;  %v2617_v53 = vadd.f32 %v7391_v52, %v2550_v58  ;;  %v2542_v11 = vadd.f32 %v2541_v45, %v7312_v57 }
 0x3b6   :  { %2655 = vst [vmem:[#allocation6 + $0x110] sm:$0xff] %v2607_v39  ;;  %v2609_v22 = vadd.f32 %v7329_v0, %v2441_v26  ;;  %v2443_v44 = vadd.f32 %v2442_v31, %v7361_v13  ;;  %v5404_v59 = vpop.f32.mrf.mxu0 }
 0x3b7   :  { %v2444_v38 = vpop.f32.mrf.mxu1  ;;  %2665 = vst [vmem:[#allocation6 + $0x160] sm:$0xff] %v2617_v53  ;;  %v2611_v32 = vadd.f32 %v7391_v52, %v2542_v11  ;;  %v2553_v3 = vadd.f32 %v5404_v59, %v7316_v60 }
 0x3b8   :  { %2657 = vst [vmem:[#allocation6 + $0x120] sm:$0xff] %v2609_v22  ;;  %v2610_v4 = vadd.f32 %v7335_v7, %v2443_v44  ;;  %v2445_v40 = vadd.f32 %v2444_v38, %v7365_v14  ;;  %v2544_v27 = vpop.f32.mrf.mxu0 }
 0x3b9   :  { %v2446_v56 = vpop.f32.mrf.mxu1  ;;  %2659 = vst [vmem:[#allocation6 + $0x130] sm:$0xff] %v2611_v32  ;;  %v2620_v57 = vadd.f32 %v7391_v52, %v2553_v3  ;;  %v2545_v62 = vadd.f32 %v2544_v27, %v7325_v63 }
 0x3ba   :  { %2658 = vst [vmem:[#allocation6 + $0x128] sm:$0xff] %v2610_v4  ;;  %v2612_v13 = vadd.f32 %v7329_v0, %v2445_v40  ;;  %v2447_v12 = vadd.f32 %v2446_v56, %v7369_v21  ;;  %v2895_v33 = vpop.f32.mrf.mxu0 }
 0x3bb   :  { %v2450_v51 = vpop.f32.mrf.mxu1  ;;  %2668 = vst [vmem:[#allocation6 + $0x178] sm:$0xff] %v2620_v57  ;;  %v2614_v60 = vadd.f32 %v7391_v52, %v2545_v62 }
 0x3bc   :  { %2660 = vst [vmem:[#allocation6 + $0x138] sm:$0xff] %v2612_v13  ;;  %v2613_v14 = vadd.f32 %v7335_v7, %v2447_v12  ;;  %v2451_v5 = vadd.f32 %v2450_v51, %v7373_v28  ;;  %v2897_v19 = vpop.f32.mrf.mxu0  ;;  %v7521_v51 = vrot.slane %v7513_v29, %v6485_v20 }
 0x3bd   :  { %v2452_v17 = vpop.f32.mrf.mxu1  ;;  %2662 = vst [vmem:[#allocation6 + $0x148] sm:$0xff] %v2614_v60 }
 0x3be   :  { %2661 = vst [vmem:[#allocation6 + $0x140] sm:$0xff] %v2613_v14  ;;  %v2615_v21 = vadd.f32 %v7329_v0, %v2451_v5  ;;  %v2453_v9 = vadd.f32 %v2452_v17, %v7377_v34  ;;  %v7527_v5 = vrot.slane %v7513_v29, %v6497_v24 }
 0x3bf   :  { %v2454_v48 = vpop.f32.mrf.mxu1 }
 0x3c0   :  { %2663 = vst [vmem:[#allocation6 + $0x150] sm:$0xff] %v2615_v21  ;;  %v2616_v28 = vadd.f32 %v7335_v7, %v2453_v9  ;;  %v2455_v25 = vadd.f32 %v2454_v48, %v7381_v10 }
 0x3c1   :  { %v2456_v16 = vpop.f32.mrf.mxu1 }
 0x3c2   :  { %2664 = vst [vmem:[#allocation6 + $0x158] sm:$0xff] %v2616_v28  ;;  %v2618_v34 = vadd.f32 %v7329_v0, %v2455_v25  ;;  %v2457_v36 = vadd.f32 %v2456_v16, %v7385_v43  ;;  %v2899_v0 = vpop.f32.mrf.mxu0 }
 0x3c3   :  { %v7466_v47 = vpop.f32.mrf.mxu1 }
 0x3c4   :  { %2666 = vst [vmem:[#allocation6 + $0x168] sm:$0xff] %v2618_v34  ;;  %v2619_v10 = vadd.f32 %v7335_v7, %v2457_v36  ;;  %v2901_v43 = vpop.f32.mrf.mxu0 }
 0x3c5   :  { %v7470_v61 = vpop.f32.mrf.mxu1 }
 0x3c6   :  { %2667 = vst [vmem:[#allocation6 + $0x170] sm:$0xff] %v2619_v10  ;;  %v2905_v63 = vpop.f32.mrf.mxu0 }
 0x3c7   :  { %v7472_v1 = vpop.f32.mrf.mxu1 }
 0x3c8   :  { %v2907_v35 = vpop.f32.mrf.mxu0 }
 0x3c9   :  { %v7474_v50 = vpop.f32.mrf.mxu1 }
 0x3ca   :  { %v2909_v7 = vpop.f32.mrf.mxu0 }
 0x3cb   :  { %v7476_v39 = vpop.f32.mrf.mxu1 }
 0x3cc   :  { %v2911_v52 = vpop.f32.mrf.mxu0 }
 0x3cd   :  { %v7478_v26 = vpop.f32.mrf.mxu1 }
 0x3ce   :  { %v2915_v30 = vpop.f32.mrf.mxu0 }
 0x3cf   :  { %v7480_v8 = vpop.f32.mrf.mxu1 }
 0x3d0   :  { %v7486_v49 = vpop.f32.mrf.mxu0 }
 0x3d1   :  { %v7482_v31 = vpop.f32.mrf.mxu1 }
 0x3d2   :  { %v7490_v6 = vpop.f32.mrf.mxu0 }
 0x3d3   :  { %v7484_v22 = vpop.f32.mrf.mxu1 }
 0x3d4   :  { %v7494_v54 = vpop.f32.mrf.mxu0 }
 0x3d5   :  { %v7488_v44 = vpop.f32.mrf.mxu1 }
 0x3d6   :  { %v7498_v37 = vpop.f32.mrf.mxu0 }
 0x3d7   :  { %v7492_v38 = vpop.f32.mrf.mxu1 }
 0x3d8   :  { %v7502_v15 = vpop.f32.mrf.mxu0 }
 0x3d9   :  { %v7496_v4 = vpop.f32.mrf.mxu1 }
 0x3da   :  { %v7506_v41 = vpop.f32.mrf.mxu0 }
 0x3db   :  { %v7500_v40 = vpop.f32.mrf.mxu1 }
 0x3dc   :  { %v7515_v12 = vpop.f32.mrf.mxu0 }
 0x3dd   :  { %v7504_v56 = vpop.f32.mrf.mxu1 }
 0x3de   :  { %v7523_v46 = vpop.f32.mrf.mxu0 }
 0x3df   :  { %v7508_v13 = vpop.f32.mrf.mxu1 }
 0x3e0   :  { %v7529_v58 = vpop.f32.mrf.mxu0 }
 0x3e1   :  { %v7517_v42 = vpop.f32.mrf.mxu1 }
 0x3e2   :  { %v7532_v53 = vpop.f32.mrf.mxu0 }
 0x3e3   :  { %v3233_v14 = vpop.f32.mrf.mxu1 }
 0x3e4   :  { %v3234_v55 = vadd.f32 %v3233_v14, %v2895_v33  ;;  %v7535_v48 = vpop.f32.mrf.mxu0 }
 0x3e5   :  { %v3235_v17 = vpop.f32.mrf.mxu1 }
 0x3e6   :  { %v3426_v45 = vadd.f32 %v7521_v51, %v3234_v55  ;;  %v3236_v21 = vadd.f32 %v3235_v17, %v2897_v19  ;;  %v7538_v32 = vpop.f32.mrf.mxu0 }
 0x3e7   :  { %v3237_v9 = vpop.f32.mrf.mxu1 }
 0x3e8   :  { %3474 = vst [vmem:[#allocation7] sm:$0xff] %v3426_v45  ;;  %v3427_v20 = vadd.f32 %v7527_v5, %v3236_v21  ;;  %v3238_v11 = vadd.f32 %v3237_v9, %v2899_v0  ;;  %v7541_v27 = vpop.f32.mrf.mxu0 }
 0x3e9   :  { %v3239_v59 = vpop.f32.mrf.mxu1 }
 0x3ea   :  { %3475 = vst [vmem:[#allocation7 + $0x8] sm:$0xff] %v3427_v20  ;;  %v3429_v24 = vadd.f32 %v7521_v51, %v3238_v11  ;;  %v3240_v28 = vadd.f32 %v3239_v59, %v2901_v43  ;;  %v7544_v62 = vpop.f32.mrf.mxu0 }
 0x3eb   :  { %v3243_v25 = vpop.f32.mrf.mxu1 }
 0x3ec   :  { %3477 = vst [vmem:[#allocation7 + $0x18] sm:$0xff] %v3429_v24  ;;  %v3430_v3 = vadd.f32 %v7527_v5, %v3240_v28  ;;  %v3244_v16 = vadd.f32 %v3243_v25, %v2905_v63  ;;  %v7547_v19 = vpop.f32.mrf.mxu0 }
 0x3ed   :  { %v3245_v34 = vpop.f32.mrf.mxu1 }
 0x3ee   :  { %3478 = vst [vmem:[#allocation7 + $0x20] sm:$0xff] %v3430_v3  ;;  %v3432_v57 = vadd.f32 %v7521_v51, %v3244_v16  ;;  %v3246_v36 = vadd.f32 %v3245_v34, %v2907_v35  ;;  %v7550_v14 = vpop.f32.mrf.mxu0 }
 0x3ef   :  { %v3247_v33 = vpop.f32.mrf.mxu1 }
 0x3f0   :  { %3480 = vst [vmem:[#allocation7 + $0x30] sm:$0xff] %v3432_v57  ;;  %v3433_v10 = vadd.f32 %v7527_v5, %v3246_v36  ;;  %v3248_v60 = vadd.f32 %v3247_v33, %v2909_v7  ;;  %v7553_v45 = vpop.f32.mrf.mxu0 }
 0x3f1   :  { %v3249_v0 = vpop.f32.mrf.mxu1 }
 0x3f2   :  { %3481 = vst [vmem:[#allocation7 + $0x38] sm:$0xff] %v3433_v10  ;;  %v3435_v43 = vadd.f32 %v7521_v51, %v3248_v60  ;;  %v3250_v63 = vadd.f32 %v3249_v0, %v2911_v52  ;;  %v7557_v20 = vpop.f32.mrf.mxu0 }
 0x3f3   :  { %v3253_v55 = vpop.f32.mrf.mxu1 }
 0x3f4   :  { %3483 = vst [vmem:[#allocation7 + $0x48] sm:$0xff] %v3435_v43  ;;  %v3436_v35 = vadd.f32 %v7527_v5, %v3250_v63  ;;  %v3254_v17 = vadd.f32 %v3253_v55, %v2915_v30  ;;  %v7561_v24 = vpop.f32.mrf.mxu0 }
 0x3f5   :  { %v3255_v21 = vpop.f32.mrf.mxu1 }
 0x3f6   :  { %3484 = vst [vmem:[#allocation7 + $0x50] sm:$0xff] %v3436_v35  ;;  %v3438_v7 = vadd.f32 %v7521_v51, %v3254_v17  ;;  %v3256_v9 = vadd.f32 %v3255_v21, %v7486_v49  ;;  %v7565_v3 = vpop.f32.mrf.mxu0  ;;  %v7583_v35 = vrot.slane %v7513_v29, %v6495_v23 }
 0x3f7   :  { %v3257_v11 = vpop.f32.mrf.mxu1 }
 0x3f8   :  { %3486 = vst [vmem:[#allocation7 + $0x60] sm:$0xff] %v3438_v7  ;;  %v3439_v52 = vadd.f32 %v7527_v5, %v3256_v9  ;;  %v3258_v59 = vadd.f32 %v3257_v11, %v7490_v6  ;;  %v7569_v57 = vpop.f32.mrf.mxu0 }
 0x3f9   :  { %v3259_v28 = vpop.f32.mrf.mxu1 }
 0x3fa   :  { %3487 = vst [vmem:[#allocation7 + $0x68] sm:$0xff] %v3439_v52  ;;  %v3441_v30 = vadd.f32 %v7521_v51, %v3258_v59  ;;  %v3260_v25 = vadd.f32 %v3259_v28, %v7494_v54  ;;  %v7573_v10 = vpop.f32.mrf.mxu0 }
 0x3fb   :  { %v3263_v16 = vpop.f32.mrf.mxu1 }
 0x3fc   :  { %3489 = vst [vmem:[#allocation7 + $0x78] sm:$0xff] %v3441_v30  ;;  %v3442_v49 = vadd.f32 %v7527_v5, %v3260_v25  ;;  %v3264_v34 = vadd.f32 %v3263_v16, %v7498_v37  ;;  %v7577_v43 = vpop.f32.mrf.mxu0 }
 0x3fd   :  { %v3265_v36 = vpop.f32.mrf.mxu1 }
 0x3fe   :  { %3490 = vst [vmem:[#allocation7 + $0x80] sm:$0xff] %v3442_v49  ;;  %v3444_v6 = vadd.f32 %v7521_v51, %v3264_v34  ;;  %v3266_v33 = vadd.f32 %v3265_v36, %v7502_v15  ;;  %v5455_v17 = vpop.f32.mrf.mxu0 }
 0x3ff   :  { %v3267_v60 = vpop.f32.mrf.mxu1 }
 0x400   :  { %3492 = vst [vmem:[#allocation7 + $0x90] sm:$0xff] %v3444_v6  ;;  %v3445_v54 = vadd.f32 %v7527_v5, %v3266_v33  ;;  %v3268_v0 = vadd.f32 %v3267_v60, %v7506_v41  ;;  %v3355_v41 = vadd.f32 %v5455_v17, %v7466_v47  ;;  %v3346_v11 = vpop.f32.mrf.mxu0 }
 0x401   :  { %v3269_v63 = vpop.f32.mrf.mxu1  ;;  %v3347_v23 = vadd.f32 %v3346_v11, %v7470_v61 }
 0x402   :  { %3493 = vst [vmem:[#allocation7 + $0x98] sm:$0xff] %v3445_v54  ;;  %v3447_v37 = vadd.f32 %v7521_v51, %v3268_v0  ;;  %v3270_v55 = vadd.f32 %v3269_v63, %v7515_v12  ;;  %v3434_v12 = vadd.f32 %v7583_v35, %v3355_v41  ;;  %v5456_v28 = vpop.f32.mrf.mxu0 }
 0x403   :  { %v3273_v15 = vpop.f32.mrf.mxu1  ;;  %v3358_v25 = vadd.f32 %v5456_v28, %v7472_v1 }
 0x404   :  { %3495 = vst [vmem:[#allocation7 + $0xa8] sm:$0xff] %v3447_v37  ;;  %v3448_v21 = vadd.f32 %v7527_v5, %v3270_v55  ;;  %v3274_v7 = vadd.f32 %v3273_v15, %v7523_v46  ;;  %3482 = vst [vmem:[#allocation7 + $0x40] sm:$0xff] %v3434_v12  ;;  %v3428_v46 = vadd.f32 %v7583_v35, %v3347_v23  ;;  %v3349_v49 = vpop.f32.mrf.mxu0 }
 0x405   :  { %v3275_v9 = vpop.f32.mrf.mxu1  ;;  %v3437_v61 = vadd.f32 %v7583_v35, %v3358_v25  ;;  %v3350_v36 = vadd.f32 %v3349_v49, %v7474_v50 }
 0x406   :  { %3496 = vst [vmem:[#allocation7 + $0xb0] sm:$0xff] %v3448_v21  ;;  %v3450_v52 = vadd.f32 %v7521_v51, %v3274_v7  ;;  %v3276_v59 = vadd.f32 %v3275_v9, %v7529_v58  ;;  %3476 = vst [vmem:[#allocation7 + $0x10] sm:$0xff] %v3428_v46  ;;  %v5459_v33 = vpop.f32.mrf.mxu0 }
 0x407   :  { %v3277_v29 = vpop.f32.mrf.mxu1  ;;  %3485 = vst [vmem:[#allocation7 + $0x58] sm:$0xff] %v3437_v61  ;;  %v3431_v1 = vadd.f32 %v7583_v35, %v3350_v36  ;;  %v3371_v54 = vadd.f32 %v5459_v33, %v7476_v39 }
 0x408   :  { %3498 = vst [vmem:[#allocation7 + $0xc0] sm:$0xff] %v3450_v52  ;;  %v3451_v30 = vadd.f32 %v7527_v5, %v3276_v59  ;;  %v3278_v47 = vadd.f32 %v3277_v29, %v7532_v53  ;;  %v3362_v63 = vpop.f32.mrf.mxu0 }
 0x409   :  { %v3279_v16 = vpop.f32.mrf.mxu1  ;;  %3479 = vst [vmem:[#allocation7 + $0x28] sm:$0xff] %v3431_v1  ;;  %v3446_v50 = vadd.f32 %v7583_v35, %v3371_v54  ;;  %v3363_v55 = vadd.f32 %v3362_v63, %v7478_v26 }
 0x40a   :  { %3499 = vst [vmem:[#allocation7 + $0xc8] sm:$0xff] %v3451_v30  ;;  %v3453_v58 = vadd.f32 %v7521_v51, %v3278_v47  ;;  %v3280_v34 = vadd.f32 %v3279_v16, %v7535_v48  ;;  %v5460_v17 = vpop.f32.mrf.mxu0 }
 0x40b   :  { %v3283_v6 = vpop.f32.mrf.mxu1  ;;  %3494 = vst [vmem:[#allocation7 + $0xa0] sm:$0xff] %v3446_v50  ;;  %v3440_v39 = vadd.f32 %v7583_v35, %v3363_v55  ;;  %v3374_v7 = vadd.f32 %v5460_v17, %v7480_v8 }
 0x40c   :  { %3501 = vst [vmem:[#allocation7 + $0xd8] sm:$0xff] %v3453_v58  ;;  %v3454_v53 = vadd.f32 %v7527_v5, %v3280_v34  ;;  %v3284_v60 = vadd.f32 %v3283_v6, %v7538_v32  ;;  %v3365_v9 = vpop.f32.mrf.mxu0 }
 0x40d   :  { %v3285_v0 = vpop.f32.mrf.mxu1  ;;  %3488 = vst [vmem:[#allocation7 + $0x70] sm:$0xff] %v3440_v39  ;;  %v3449_v26 = vadd.f32 %v7583_v35, %v3374_v7  ;;  %v3366_v52 = vadd.f32 %v3365_v9, %v7482_v31 }
 0x40e   :  { %3502 = vst [vmem:[#allocation7 + $0xe0] sm:$0xff] %v3454_v53  ;;  %v3456_v48 = vadd.f32 %v7521_v51, %v3284_v60  ;;  %v3286_v37 = vadd.f32 %v3285_v0, %v7541_v27  ;;  %v5463_v59 = vpop.f32.mrf.mxu0 }
 0x40f   :  { %v3287_v15 = vpop.f32.mrf.mxu1  ;;  %3497 = vst [vmem:[#allocation7 + $0xb8] sm:$0xff] %v3449_v26  ;;  %v3443_v8 = vadd.f32 %v7583_v35, %v3366_v52  ;;  %v3387_v29 = vadd.f32 %v5463_v59, %v7484_v22 }
 0x410   :  { %3504 = vst [vmem:[#allocation7 + $0xf0] sm:$0xff] %v3456_v48  ;;  %v3457_v32 = vadd.f32 %v7527_v5, %v3286_v37  ;;  %v3288_v21 = vadd.f32 %v3287_v15, %v7544_v62  ;;  %v3378_v30 = vpop.f32.mrf.mxu0 }
 0x411   :  { %v3289_v41 = vpop.f32.mrf.mxu1  ;;  %3491 = vst [vmem:[#allocation7 + $0x88] sm:$0xff] %v3443_v8  ;;  %v3458_v31 = vadd.f32 %v7583_v35, %v3387_v29  ;;  %v3379_v47 = vadd.f32 %v3378_v30, %v7488_v44 }
 0x412   :  { %3505 = vst [vmem:[#allocation7 + $0xf8] sm:$0xff] %v3457_v32  ;;  %v3459_v27 = vadd.f32 %v7521_v51, %v3288_v21  ;;  %v3290_v11 = vadd.f32 %v3289_v41, %v7547_v19  ;;  %v5464_v16 = vpop.f32.mrf.mxu0 }
 0x413   :  { %v3293_v12 = vpop.f32.mrf.mxu1  ;;  %3506 = vst [vmem:[#allocation7 + $0x100] sm:$0xff] %v3458_v31  ;;  %v3452_v22 = vadd.f32 %v7583_v35, %v3379_v47  ;;  %v3390_v58 = vadd.f32 %v5464_v16, %v7492_v38 }
 0x414   :  { %3507 = vst [vmem:[#allocation7 + $0x108] sm:$0xff] %v3459_v27  ;;  %v3460_v62 = vadd.f32 %v7527_v5, %v3290_v11  ;;  %v3294_v23 = vadd.f32 %v3293_v12, %v7550_v14  ;;  %v3381_v34 = vpop.f32.mrf.mxu0 }
 0x415   :  { %v3295_v28 = vpop.f32.mrf.mxu1  ;;  %3500 = vst [vmem:[#allocation7 + $0xd0] sm:$0xff] %v3452_v22  ;;  %v3461_v44 = vadd.f32 %v7583_v35, %v3390_v58  ;;  %v3382_v6 = vadd.f32 %v3381_v34, %v7496_v4 }
 0x416   :  { %3508 = vst [vmem:[#allocation7 + $0x110] sm:$0xff] %v3460_v62  ;;  %v3462_v19 = vadd.f32 %v7521_v51, %v3294_v23  ;;  %v3296_v46 = vadd.f32 %v3295_v28, %v7553_v45  ;;  %v5467_v53 = vpop.f32.mrf.mxu0 }
 0x417   :  { %v3297_v25 = vpop.f32.mrf.mxu1  ;;  %3509 = vst [vmem:[#allocation7 + $0x118] sm:$0xff] %v3461_v44  ;;  %v3455_v38 = vadd.f32 %v7583_v35, %v3382_v6  ;;  %v3403_v60 = vadd.f32 %v5467_v53, %v7500_v40 }
 0x418   :  { %3510 = vst [vmem:[#allocation7 + $0x120] sm:$0xff] %v3462_v19  ;;  %v3463_v14 = vadd.f32 %v7527_v5, %v3296_v46  ;;  %v3298_v49 = vadd.f32 %v3297_v25, %v7557_v20  ;;  %v3394_v0 = vpop.f32.mrf.mxu0 }
 0x419   :  { %v3299_v61 = vpop.f32.mrf.mxu1  ;;  %3503 = vst [vmem:[#allocation7 + $0xe8] sm:$0xff] %v3455_v38  ;;  %v3470_v4 = vadd.f32 %v7583_v35, %v3403_v60  ;;  %v3395_v48 = vadd.f32 %v3394_v0, %v7504_v56 }
 0x41a   :  { %3511 = vst [vmem:[#allocation7 + $0x128] sm:$0xff] %v3463_v14  ;;  %v3465_v45 = vadd.f32 %v7521_v51, %v3298_v49  ;;  %v3300_v36 = vadd.f32 %v3299_v61, %v7561_v24  ;;  %v5468_v37 = vpop.f32.mrf.mxu0 }
 0x41b   :  { %v3303_v33 = vpop.f32.mrf.mxu1  ;;  %3518 = vst [vmem:[#allocation7 + $0x160] sm:$0xff] %v3470_v4  ;;  %v3464_v40 = vadd.f32 %v7583_v35, %v3395_v48  ;;  %v3406_v15 = vadd.f32 %v5468_v37, %v7508_v13 }
 0x41c   :  { %3513 = vst [vmem:[#allocation7 + $0x138] sm:$0xff] %v3465_v45  ;;  %v3466_v20 = vadd.f32 %v7527_v5, %v3300_v36  ;;  %v3304_v1 = vadd.f32 %v3303_v33, %v7565_v3  ;;  %v3397_v32 = vpop.f32.mrf.mxu0 }
 0x41d   :  { %v3305_v54 = vpop.f32.mrf.mxu1  ;;  %3512 = vst [vmem:[#allocation7 + $0x130] sm:$0xff] %v3464_v40  ;;  %v3473_v56 = vadd.f32 %v7583_v35, %v3406_v15  ;;  %v3398_v21 = vadd.f32 %v3397_v32, %v7517_v42 }
 0x41e   :  { %3514 = vst [vmem:[#allocation7 + $0x140] sm:$0xff] %v3466_v20  ;;  %v3468_v24 = vadd.f32 %v7521_v51, %v3304_v1  ;;  %v3306_v63 = vadd.f32 %v3305_v54, %v7569_v57 }
 0x41f   :  { %v3307_v50 = vpop.f32.mrf.mxu1  ;;  %3521 = vst [vmem:[#allocation7 + $0x178] sm:$0xff] %v3473_v56 }
 0x420   :  { %3516 = vst [vmem:[#allocation7 + $0x150] sm:$0xff] %v3468_v24  ;;  %v3469_v3 = vadd.f32 %v7527_v5, %v3306_v63  ;;  %v3308_v55 = vadd.f32 %v3307_v50, %v7573_v10  ;;  %v3467_v10 = vadd.f32 %v7583_v35, %v3398_v21 }
 0x421   :  { %v3309_v17 = vpop.f32.mrf.mxu1 }
 0x422   :  { %3517 = vst [vmem:[#allocation7 + $0x158] sm:$0xff] %v3469_v3  ;;  %v3471_v57 = vadd.f32 %v7521_v51, %v3308_v55  ;;  %v3310_v39 = vadd.f32 %v3309_v17, %v7577_v43  ;;  %3515 = vst [vmem:[#allocation7 + $0x148] sm:$0xff] %v3467_v10 }
 0x424   :  { %3519 = vst [vmem:[#allocation7 + $0x168] sm:$0xff] %v3471_v57  ;;  %v3472_v7 = vadd.f32 %v7527_v5, %v3310_v39 }
 0x426   :  { %3520 = vst [vmem:[#allocation7 + $0x170] sm:$0xff] %v3472_v7 }
 0x427 LB: > { %s8030_s28 = sld [smem:[#allocation15_spill]]  ;;  %v6096_v51 = vmov 0.0   ;;  %v6097_v5 = vmov 0   ;;  %vm6098_vm1 = vmmov 0   ;;  %v7726_v47 = vld [vmem:[#allocation4 + $0x8] sm:$0xff]  ;;  %v7728_v25 = vld [vmem:[#allocation4] sm:$0xff]  ;;  %s6090_s18 = sphi %s7650_s18, %s3529_s18  }
 0x428   : > { %5469 = vmatprep.subr.bf16.mxu1 %v6096_v51  ;;  %3734 = vmatprep.mubr.bf16.mxu0 %v6097_v5  ;;  %v5936_v16 = vld [vmem:[%s7994_s17 + $0xac] ss:$12 sps:$4 sm:$0xff]   ;;  %v3541_v22 = vpack.c.bf16 %v7728_v25, %v7726_v47  ;;  %v5934_v49 = vld [vmem:[%s7994_s17 + $0xa8] ss:$12 sps:$4 sm:$0xff]   ;;  %v5938_v34 = vld [vmem:[%s7994_s17 + $0x90] ss:$12 sps:$4 sm:$0xff]  }
 0x429   : > { %5485 = vmatprep.mubr.msk.bf16.mxu1 %vm6098_vm1, %v6096_v51  ;;  %v5940_v58 = vld [vmem:[%s7994_s17 + $0x94] ss:$12 sps:$4 sm:$0xff]   ;;  %v5944_v45 = vld [vmem:[%s7994_s17 + $0x7c] ss:$12 sps:$4 sm:$0xff]   ;;  %v5942_v36 = vld [vmem:[%s7994_s17 + $0x78] ss:$12 sps:$4 sm:$0xff]  }
 0x42a   : > { %v5948_v6 = vld [vmem:[%s7994_s17 + $0x64] ss:$12 sps:$4 sm:$0xff]   ;;  %v5946_v53 = vld [vmem:[%s7994_s17 + $0x60] ss:$12 sps:$4 sm:$0xff]   ;;  %v5950_v1 = vld [vmem:[%s7994_s17 + $0x48] ss:$12 sps:$4 sm:$0xff]  }
 0x42b   : > { %v5961_v33 = vld [vmem:[%s7994_s17 + $0xb0] ss:$12 sps:$4 sm:$0xff]   ;;  %v5952_v20 = vld [vmem:[%s7994_s17 + $0x4c] ss:$12 sps:$4 sm:$0xff]   ;;  %v5956_v60 = vld [vmem:[%s7994_s17 + $0x34] ss:$12 sps:$4 sm:$0xff]  }
 0x42c   : > { %v5965_v38 = vld [vmem:[%s7994_s17 + $0x98] ss:$12 sps:$4 sm:$0xff]   ;;  %v5966_v54 = vld [vmem:[%s7994_s17 + $0x80] ss:$12 sps:$4 sm:$0xff]   ;;  %v5954_v0 = vld [vmem:[%s7994_s17 + $0x30] ss:$12 sps:$4 sm:$0xff]  }
 0x42d   : > { %v5908_v13 = vld [vmem:[%s8030_s28 + $0xac] ss:$12 sps:$4 sm:$0xff]   ;;  %v5910_v42 = vld [vmem:[%s8030_s28 + $0xa8] ss:$12 sps:$4 sm:$0xff]   ;;  %v5913_v35 = vld [vmem:[%s8030_s28 + $0x90] ss:$12 sps:$4 sm:$0xff]  }
 0x42e   : > { %3702 = vmatprep.subr.bf16.mxu0 %v5908_v13  ;;  %v5911_v43 = vld [vmem:[%s8030_s28 + $0x94] ss:$12 sps:$4 sm:$0xff]   ;;  %v5914_v41 = vld [vmem:[%s8030_s28 + $0x7c] ss:$12 sps:$4 sm:$0xff]   ;;  %v5916_v9 = vld [vmem:[%s8030_s28 + $0x78] ss:$12 sps:$4 sm:$0xff]  }
 0x42f   : > { %3703 = vmatpush1.bf16.msra.mxu0 %v5910_v42  ;;  %v5917_v27 = vld [vmem:[%s8030_s28 + $0x64] ss:$12 sps:$4 sm:$0xff]   ;;  %v5919_v11 = vld [vmem:[%s8030_s28 + $0x60] ss:$12 sps:$4 sm:$0xff]   ;;  %v5922_v59 = vld [vmem:[%s8030_s28 + $0x48] ss:$12 sps:$4 sm:$0xff]  }
 0x430   : > { %3704 = vmatprep.subr.bf16.mxu0 %v5911_v43  ;;  %v5929_v26 = vld [vmem:[%s8030_s28 + $0xb0] ss:$12 sps:$4 sm:$0xff]   ;;  %v5920_v52 = vld [vmem:[%s8030_s28 + $0x4c] ss:$12 sps:$4 sm:$0xff]   ;;  %v5923_v62 = vld [vmem:[%s8030_s28 + $0x34] ss:$12 sps:$4 sm:$0xff]  }
 0x431   : > { %5470 = vmatpush3.bf16.msra.mxu1 %v5929_v26  ;;  %v5933_v12 = vld [vmem:[%s8030_s28 + $0x98] ss:$12 sps:$4 sm:$0xff]   ;;  %v5937_v8 = vld [vmem:[%s8030_s28 + $0x80] ss:$12 sps:$4 sm:$0xff]   ;;  %v5925_v23 = vld [vmem:[%s8030_s28 + $0x30] ss:$12 sps:$4 sm:$0xff]  }
 0x432   : > { %5471 = vmatprep.subr.bf16.mxu1 %v6096_v51  ;;  %v5926_v29 = vld [vmem:[%s8030_s28 + $0x1c] ss:$12 sps:$4 sm:$0xff]   ;;  %v5928_v30 = vld [vmem:[%s8030_s28 + $0x18] ss:$12 sps:$4 sm:$0xff]   ;;  %v5932_v46 = vld [vmem:[%s8030_s28] ss:$12 sps:$4 sm:$0xff]  }
 0x433   : > { %3705 = vmatpush1.bf16.msra.mxu0 %v5913_v35  ;;  %v5941_v28 = vld [vmem:[%s8030_s28 + $0x68] ss:$12 sps:$4 sm:$0xff]   ;;  %v5930_v19 = vld [vmem:[%s8030_s28 + $0x4] ss:$12 sps:$4 sm:$0xff]   ;;  %v5953_v61 = vld [vmem:[%s8030_s28 + $0x20] ss:$12 sps:$4 sm:$0xff]  }
 0x434   : > { %3706 = vmatprep.subr.bf16.mxu0 %v5914_v41  ;;  %v5945_v31 = vld [vmem:[%s8030_s28 + $0x50] ss:$12 sps:$4 sm:$0xff]   ;;  %v5949_v14 = vld [vmem:[%s8030_s28 + $0x38] ss:$12 sps:$4 sm:$0xff]   ;;  %v5957_v44 = vld [vmem:[%s8030_s28 + $0x8] ss:$12 sps:$4 sm:$0xff]  }
 0x435   : > { %5472 = vmatpush3.bf16.msra.mxu1 %v5933_v12  ;;  %v5960_v24 = vld [vmem:[%s7994_s17 + $0x1c] ss:$12 sps:$4 sm:$0xff]   ;;  %v5958_v63 = vld [vmem:[%s7994_s17 + $0x18] ss:$12 sps:$4 sm:$0xff]   ;;  %v5962_v37 = vld [vmem:[%s7994_s17] ss:$12 sps:$4 sm:$0xff]  }
 0x436   : > { %5473 = vmatprep.subr.bf16.mxu1 %v6096_v51  ;;  %v5967_v4 = vld [vmem:[%s7994_s17 + $0x68] ss:$12 sps:$4 sm:$0xff]   ;;  %v5964_v48 = vld [vmem:[%s7994_s17 + $0x4] ss:$12 sps:$4 sm:$0xff]   ;;  %v7817_v40 = vld [vmem:[#allocation5 + $0x8] sm:$0xff]  ;;  %s5045_s24 = smul.u32 48, %s6090_s18 }
 0x437   : > { %3707 = vmatpush1.bf16.msra.mxu0 %v5916_v9  ;;  %v5968_v50 = vld [vmem:[%s7994_s17 + $0x50] ss:$12 sps:$4 sm:$0xff]   ;;  %v5969_v55 = vld [vmem:[%s7994_s17 + $0x38] ss:$12 sps:$4 sm:$0xff]   ;;  %v5970_v17 = vld [vmem:[%s7994_s17 + $0x20] ss:$12 sps:$4 sm:$0xff]  }
 0x438   : > { %3708 = vmatprep.subr.bf16.mxu0 %v5917_v27  ;;  %v7815_v3 = vld [vmem:[#allocation5] sm:$0xff]  ;;  %s7834_s14 = scalar_lea.vmem [#allocation6], %s5045_s24  ;;  %s3838_s8 = ssub.s32 7, %s6090_s18 }
 0x439   : > { %5474 = vmatpush3.bf16.msra.mxu1 %v5937_v8  ;;  %v3848_v15 = vpack.c.bf16 %v7817_v40, %v7815_v3  ;;  %v5971_v32 = vld [vmem:[%s7994_s17 + $0x8] ss:$12 sps:$4 sm:$0xff]   ;;  %v3535_v57 = vld [vmem:[%s7834_s14] sm:$0xff]  ;;  %v3538_v7 = vld [vmem:[%s7834_s14 + $0x18] sm:$0xff]  ;;  %s5046_s29 = smul.u32 48, %s3838_s8  ;;  %s5049_s9 = sshll.u32 %s3838_s8, 3 }
 0x43a   : > { %5475 = vmatprep.subr.bf16.mxu1 %v6096_v51  ;;  %v3536_v13 = vld [vmem:[%s7834_s14 + $0x8] sm:$0xff]  ;;  %v3539_v35 = vld [vmem:[%s7834_s14 + $0x20] sm:$0xff]  ;;  %s4157_s10 = scalar_lea.vmem [#allocation8], %s5049_s9  ;;  %s5052_s0 = sshll.u32 %s6090_s18, 3 }
 0x43b   : > { %3709 = vmatpush1.bf16.msra.mxu0 %v5919_v11  ;;  %s7843_s30 = scalar_lea.vmem [#allocation7], %s5046_s29  ;;  %s4170_s11 = scalar_lea.vmem [#allocation9], %s5052_s0 }
 0x43c   : > { %3710 = vmatprep.subr.bf16.mxu0 %v5920_v52  ;;  %s3529_s18 = sadd.s32 1, %s6090_s18  }
 0x43d   : > { %5476 = vmatpush3.bf16.msra.mxu1 %v5941_v28  ;;  %p3526_p3 = scmp.ge.s32.totalorder %s3529_s18, 8  }
 0x43e   : > { %5477 = vmatprep.subr.bf16.mxu1 %v6096_v51 }
 0x43f   : > { %3711 = vmatpush1.bf16.msra.mxu0 %v5922_v59 }
 0x440   : > { %3712 = vmatprep.subr.bf16.mxu0 %v5923_v62 }
 0x441   : > { %5478 = vmatpush3.bf16.msra.mxu1 %v5945_v31 }
 0x442   : > { %5479 = vmatprep.subr.bf16.mxu1 %v6096_v51 }
 0x443   : > { %3713 = vmatpush1.bf16.msra.mxu0 %v5925_v23 }
 0x444   : > { %3714 = vmatprep.subr.bf16.mxu0 %v5926_v29 }
 0x445   : > { %5480 = vmatpush3.bf16.msra.mxu1 %v5949_v14 }
 0x446   : > { %5481 = vmatprep.subr.bf16.mxu1 %v6096_v51 }
 0x447   : > { %3715 = vmatpush1.bf16.msra.mxu0 %v5928_v30  ;;  %v3842_v30 = vld [vmem:[%s7843_s30] sm:$0xff] }
 0x448   : > { %3716 = vmatprep.subr.bf16.mxu0 %v5930_v19 }
 0x449   : > { %5482 = vmatpush3.bf16.msra.mxu1 %v5953_v61 }
 0x44a   : > { %5483 = vmatprep.subr.bf16.mxu1 %v6096_v51 }
 0x44b   : > { %3717 = vmatpush1.bf16.msra.mxu0 %v5932_v46 }
 0x44c   : > { %4009 = vmatprep.subr.bf16.mxu0 %v5936_v16 }
 0x44d   : > { %5484 = vmatpush3.bf16.msra.mxu1 %v5957_v44  ;;  %v3845_v44 = vld [vmem:[%s7843_s30 + $0x18] sm:$0xff] }
 0x44e   : > { %3735 = vmatmul.mubr.bf16.vlgmr.msra.gmra.mxu0 %v3541_v22  ;;  %5489 = vmatprep.subr.bf16.mxu1 %v6096_v51 }
 0x44f   : > { %4010 = vmatpush1.bf16.msra.mxu0 %v5934_v49  ;;  %4041 = vmatprep.mubr.bf16.mxu0 %v6097_v5 }
 0x450   : > { %4011 = vmatprep.subr.bf16.mxu0 %v5940_v58  ;;  %5486 = vmatmul.mubr.bf16.vlgmr.msra.gmra.mxu1 %v3541_v22  ;;  %v3537_v58 = vld [vmem:[%s7834_s14 + $0x10] sm:$0xff] }
 0x451   : > { %5490 = vmatpush3.bf16.msra.mxu1 %v5961_v33  ;;  %5505 = vmatprep.mubr.msk.bf16.mxu1 %vm6098_vm1, %v6096_v51 }
 0x452   : > { %5491 = vmatprep.subr.bf16.mxu1 %v6096_v51 }
 0x453   : > { %4012 = vmatpush1.bf16.msra.mxu0 %v5938_v34 }
 0x454   : > { %4013 = vmatprep.subr.bf16.mxu0 %v5944_v45 }
 0x455   : > { %5492 = vmatpush3.bf16.msra.mxu1 %v5965_v38  ;;  %v3540_v38 = vld [vmem:[%s7834_s14 + $0x28] sm:$0xff] }
 0x456   : > { %5493 = vmatprep.subr.bf16.mxu1 %v6096_v51 }
 0x457   : > { %4014 = vmatpush1.bf16.msra.mxu0 %v5942_v36  ;;  %v3843_v36 = vld [vmem:[%s7843_s30 + $0x8] sm:$0xff] }
 0x458   : > { %4015 = vmatprep.subr.bf16.mxu0 %v5948_v6 }
 0x459   : > { %5494 = vmatpush3.bf16.msra.mxu1 %v5966_v54 }
 0x45a   : > { %5495 = vmatprep.subr.bf16.mxu1 %v6096_v51 }
 0x45b   : > { %4016 = vmatpush1.bf16.msra.mxu0 %v5946_v53 }
 0x45c   : > { %4017 = vmatprep.subr.bf16.mxu0 %v5952_v20 }
 0x45d   : > { %5496 = vmatpush3.bf16.msra.mxu1 %v5967_v4  ;;  %v3846_v4 = vld [vmem:[%s7843_s30 + $0x20] sm:$0xff] }
 0x45e   : > { %5497 = vmatprep.subr.bf16.mxu1 %v6096_v51 }
 0x45f   : > { %4018 = vmatpush1.bf16.msra.mxu0 %v5950_v1 }
 0x460   : > { %4019 = vmatprep.subr.bf16.mxu0 %v5956_v60 }
 0x461   : > { %5498 = vmatpush3.bf16.msra.mxu1 %v5968_v50 }
 0x462   : > { %5499 = vmatprep.subr.bf16.mxu1 %v6096_v51 }
 0x463   : > { %4020 = vmatpush1.bf16.msra.mxu0 %v5954_v0 }
 0x464   : > { %4021 = vmatprep.subr.bf16.mxu0 %v5960_v24 }
 0x465   : > { %5500 = vmatpush3.bf16.msra.mxu1 %v5969_v55 }
 0x466   : > { %5501 = vmatprep.subr.bf16.mxu1 %v6096_v51 }
 0x467   : > { %4022 = vmatpush1.bf16.msra.mxu0 %v5958_v63 }
 0x468   : > { %4023 = vmatprep.subr.bf16.mxu0 %v5964_v48 }
 0x469   : > { %5502 = vmatpush3.bf16.msra.mxu1 %v5970_v17 }
 0x46a   : > { %5503 = vmatprep.subr.bf16.mxu1 %v6096_v51 }
 0x46b   : > { %4024 = vmatpush1.bf16.msra.mxu0 %v5962_v37 }
 0x46d   : > { %5504 = vmatpush3.bf16.msra.mxu1 %v5971_v32 }
 0x46e   : > { %4042 = vmatmul.mubr.bf16.vlgmr.msra.gmra.mxu0 %v3848_v15 }
 0x470   : > { %5506 = vmatmul.mubr.bf16.vlgmr.msra.gmra.mxu1 %v3848_v15 }
 0x50e   : > { %v3736_v56 = vpop.f32.mrf.mxu0 }
 0x50f   : > { %v3786_v39 = vadd.f32 %v3736_v56, %v3535_v57 }
 0x510   : > { %v3738_v21 = vpop.f32.mrf.mxu0  ;;  %v3779_v9 = vpop.f32.mrf.mxu1 }
 0x511   : > { %v4961_v10 = vmul.f32 -1.442695, %v3786_v39  ;;  %v3800_v51 = vadd.f32 %v3738_v21, %v3536_v13  ;;  %v3820_v46 = vadd.f32 %v7403_v2, %v3779_v9 }
 0x512   : > { %v3740_v42 = vpop.f32.mrf.mxu0  ;;  %v5487_v11 = vpop.f32.mrf.mxu1 }
 0x513   : > { %5972 = vpow2.f32 %v4961_v10  ;;  %v3787_v5 = vadd.f32 %v3740_v42, %v3538_v7  ;;  %v4963_v26 = vmul.f32 -1.442695, %v3800_v51 }
 0x514   : > { %v3742_v41 = vpop.f32.mrf.mxu0  ;;  %v3782_v52 = vpop.f32.mrf.mxu1 }
 0x515   : > { %v4962_v43 = vmul.f32 -1.442695, %v3787_v5  ;;  %v3801_v27 = vadd.f32 %v3742_v41, %v3539_v35  ;;  %v3821_v53 = vadd.f32 %v7403_v2, %v3782_v52  ;;  %v6016_v2 = vld [vmem:[%s7998_s21 + $0x28] sm:$0xff] (%p3526_p3)  }
 0x516   : > { %v5488_v59 = vpop.f32.mrf.mxu1 }
 0x517   : > { %5974 = vpow2.f32 %v4962_v43  ;;  %v4964_v12 = vmul.f32 -1.442695, %v3801_v27 }
 0x518   : > { %5976 = vpow2.f32 %v4963_v26 }
 0x519   : > { %5978 = vpow2.f32 %v4964_v12 }
 0x520   : > { %v5973_v62 = vpop.eup %5972 }
 0x521   : > { %v3794_v8 = vadd.f32 1.0, %v5973_v62 }
 0x523   : > { %5980 = vrcp.f32 %v3794_v8  ;;  %v3844_v8 = vld [vmem:[%s7843_s30 + $0x10] sm:$0xff] }
 0x524   : > { %v5975_v23 = vpop.eup %5974 }
 0x525   : > { %v3795_v29 = vadd.f32 1.0, %v5975_v23  ;;  %v5977_v28 = vpop.eup %5976 }
 0x526   : > { %v5979_v19 = vpop.eup %5978  ;;  %v3808_v31 = vadd.f32 1.0, %v5977_v28 }
 0x527   : > { %5982 = vrcp.f32 %v3795_v29  ;;  %v3809_v49 = vadd.f32 1.0, %v5979_v19  ;;  %v3847_v19 = vld [vmem:[%s7843_s30 + $0x28] sm:$0xff] }
 0x528   : > { %5984 = vrcp.f32 %v3808_v31 }
 0x52e   : > { %v4043_v16 = vpop.f32.mrf.mxu0 }
 0x52f   : > { %v4093_v14 = vadd.f32 %v4043_v16, %v3842_v30 }
 0x530   : > { %v5981_v22 = vpop.eup %5980  ;;  %v4045_v61 = vpop.f32.mrf.mxu0 }
 0x531   : > { %v3822_v34 = vmul.f32 %v5981_v22, %v3820_v46  ;;  %v4991_v45 = vmul.f32 -1.442695, %v4093_v14  ;;  %v4107_v54 = vadd.f32 %v4045_v61, %v3843_v36  ;;  %v4086_v48 = vpop.f32.mrf.mxu1 }
 0x532   : > { %v4047_v6 = vpop.f32.mrf.mxu0  ;;  %v4127_v12 = vadd.f32 %v7408_v18, %v4086_v48 }
 0x533   : > { %v3824_v33 = vadd.f32 %v3822_v34, %v3537_v58  ;;  %5986 = vpow2.f32 %v4991_v45  ;;  %v4094_v1 = vadd.f32 %v4047_v6, %v3845_v44  ;;  %v4993_v50 = vmul.f32 -1.442695, %v4107_v54  ;;  %v5507_v37 = vpop.f32.mrf.mxu1  ;;  %v6020_v54 = vld [vmem:[%s7998_s21 + $0x18] sm:$0xff] (%p3526_p3)  }
 0x534   : > { %v5983_v20 = vpop.eup %5982  ;;  %5988 = vrcp.f32 %v3809_v49  ;;  %v4049_v63 = vpop.f32.mrf.mxu0  ;;  %v6025_v37 = vld [vmem:[%s7997_s20 + $0x8] sm:$0xff] (%p3526_p3)  }
 0x535   : > { %5990 = vtanh.f32 %v3824_v33  ;;  %v3823_v60 = vmul.f32 %v5983_v20, %v3821_v53  ;;  %v4992_v0 = vmul.f32 -1.442695, %v4094_v1  ;;  %v4108_v55 = vadd.f32 %v4049_v63, %v3846_v4  ;;  %v4089_v15 = vpop.f32.mrf.mxu1  ;;  %v5985_v32 = vpop.eup %5984  ;;  %v6014_v20 = vld [vmem:[%s7998_s21 + $0x30] sm:$0xff] (%p3526_p3)   ;;  %v6018_v1 = vld [vmem:[%s7998_s21 + $0x20] sm:$0xff] (%p3526_p3)  }
 0x536   : > { %v3828_v21 = vsub.f32 1.0, %v5985_v32  ;;  %v3832_v13 = vmul.f32 %v5985_v32, %v7726_v47  ;;  %v4128_v28 = vadd.f32 %v7408_v18, %v4089_v15  ;;  %v6017_v18 = vld [vmem:[%s7997_s20 + $0x28] sm:$0xff] (%p3526_p3)   ;;  %v6023_v4 = vld [vmem:[%s7997_s20 + $0x10] sm:$0xff] (%p3526_p3)   ;;  %v6027_v15 = vld [vmem:[%s7997_s20] sm:$0xff] (%p3526_p3)  }
 0x537   : > { %v3825_v24 = vadd.f32 %v3823_v60, %v3540_v38  ;;  %5992 = vpow2.f32 %v4992_v0  ;;  %v5508_v17 = vpop.f32.mrf.mxu1  ;;  %v4994_v57 = vmul.f32 -1.442695, %v4108_v55  ;;  %v6015_v38 = vld [vmem:[%s7997_s20 + $0x30] sm:$0xff] (%p3526_p3)   ;;  %v6019_v60 = vld [vmem:[%s7997_s20 + $0x20] sm:$0xff] (%p3526_p3)   ;;  %v6021_v0 = vld [vmem:[%s7997_s20 + $0x18] sm:$0xff] (%p3526_p3)  }
 0x538   :  { %v6026_v55 = vld [vmem:[%s7998_s21] sm:$0xff] (%p3526_p3)  }
 0x539   : > { %5994 = vtanh.f32 %v3825_v24  ;;  %v6022_v24 = vld [vmem:[%s7998_s21 + $0x10] sm:$0xff] (%p3526_p3)  }
 0x53a   : > { %5996 = vpow2.f32 %v4993_v50  ;;  %v6024_v50 = vld [vmem:[%s7998_s21 + $0x8] sm:$0xff] (%p3526_p3)  }
 0x53b   : > { %5998 = vpow2.f32 %v4994_v57 }
 0x540   : > { %v5987_v56 = vpop.eup %5986 }
 0x541   : > { %v5989_v39 = vpop.eup %5988  ;;  %v4101_v7 = vadd.f32 1.0, %v5987_v56 }
 0x542   : > { %v5991_v10 = vpop.eup %5990  ;;  %v3829_v51 = vsub.f32 1.0, %v5989_v39  ;;  %v3833_v9 = vmul.f32 %v5989_v39, %v7728_v25 }
 0x543   : > { %v3830_v42 = vmul.f32 %v5991_v10, %v3828_v21  ;;  %6000 = vrcp.f32 %v4101_v7 }
 0x544   : > { %v5993_v5 = vpop.eup %5992 }
 0x545   : > { %v3834_v43 = vadd.f32 %v3832_v13, %v3830_v42  ;;  %v4102_v41 = vadd.f32 1.0, %v5993_v5 }
 0x546   : > { %v5995_v35 = vpop.eup %5994 }
 0x547   : > { %v3831_v27 = vmul.f32 %v5995_v35, %v3829_v51  ;;  %4143 = vst [vmem:[#allocation4 + $0x8] sm:$0xff] %v3834_v43  ;;  %6002 = vrcp.f32 %v4102_v41  ;;  %v5997_v11 = vpop.eup %5996 }
 0x548   : > { %v4115_v52 = vadd.f32 1.0, %v5997_v11  ;;  %v5999_v59 = vpop.eup %5998 }
 0x549   : > { %v3835_v26 = vadd.f32 %v3833_v9, %v3831_v27  ;;  %v4116_v23 = vadd.f32 1.0, %v5999_v59  ;;  %v7918_v27 = vld [vmem:[%s7999_s22] ss:$0 sm:$0xff] (%p3526_p3) }
 0x54a   : > { %6004 = vrcp.f32 %v4115_v52 }
 0x54b   : > { %4144 = vst [vmem:[#allocation4] sm:$0xff] %v3835_v26  ;;  %v5066_v47 = vpack.c.bf16 %v3835_v26, %v3834_v43 }
 0x54d   : > { %5067 = vst [vmem:[%s4157_s10] sm:$0xff] %v5066_v47  }
 0x550   : > { %v6001_v62 = vpop.eup %6000 }
 0x551   : > { %v4129_v25 = vmul.f32 %v6001_v62, %v4127_v12 }
 0x553   : > { %v4131_v29 = vadd.f32 %v4129_v25, %v3844_v8 }
 0x554   : > { %v6003_v30 = vpop.eup %6002  ;;  %v6029_v48 = vld [vmem:[#allocation8] sm:$0xff] (%p3526_p3)   ;;  %v6031_v32 = vld [vmem:[#allocation8 + $0x8] sm:$0xff] (%p3526_p3)   ;;  %v6033_v56 = vld [vmem:[#allocation8 + $0x10] sm:$0xff] (%p3526_p3)  }
 0x555   : > { %6006 = vtanh.f32 %v4131_v29  ;;  %v4130_v31 = vmul.f32 %v6003_v30, %v4128_v28  ;;  %5557 = vmatprep.mubr.bf16.mxu1 (%p3526_p3), %v6029_v48  ;;  %v6035_v21 = vld [vmem:[#allocation8 + $0x18] sm:$0xff] (%p3526_p3)   ;;  %v6037_v10 = vld [vmem:[#allocation8 + $0x20] sm:$0xff] (%p3526_p3)   ;;  %v6039_v42 = vld [vmem:[#allocation8 + $0x28] sm:$0xff] (%p3526_p3)  }
 0x556   : > { %6008 = vrcp.f32 %v4116_v23  ;;  %v6041_v51 = vld [vmem:[#allocation8 + $0x30] sm:$0xff] (%p3526_p3)   ;;  %v6043_v35 = vld [vmem:[#allocation8 + $0x38] sm:$0xff] (%p3526_p3)  }
 0x557   : > { %v4132_v46 = vadd.f32 %v4130_v31, %v3847_v19  ;;  %v6005_v16 = vpop.eup %6004 }
 0x558   : > { %v4135_v14 = vsub.f32 1.0, %v6005_v16  ;;  %v4139_v58 = vmul.f32 %v6005_v16, %v7815_v3  ;;  %v6012_v3 = vld [vmem:[%s7998_s21 + $0x38] sm:$0xff] (%p3526_p3)  }
 0x559   : > { %6010 = vtanh.f32 %v4132_v46  ;;  %5509 = vmatprep.subr.bf16.mxu0 (%p3526_p3), %v6012_v3 }
 0x55a   :  { %5510 = vmatpush3.bf16.msra.mxu0 (%p3526_p3), %v6012_v3 }
 0x55b   :  { %5511 = vmatprep.subr.bf16.mxu0 (%p3526_p3), %v6014_v20 }
 0x55e   :  { %5512 = vmatpush3.bf16.msra.mxu0 (%p3526_p3), %v6014_v20 }
 0x55f   :  { %5513 = vmatprep.subr.bf16.mxu0 (%p3526_p3), %v6016_v2 }
 0x562   : > { %v6007_v22 = vpop.eup %6006  ;;  %5514 = vmatpush3.bf16.msra.mxu0 (%p3526_p3), %v6016_v2 }
 0x563   : > { %v6009_v49 = vpop.eup %6008  ;;  %v4137_v61 = vmul.f32 %v6007_v22, %v4135_v14  ;;  %5515 = vmatprep.subr.bf16.mxu0 (%p3526_p3), %v6018_v1 }
 0x564   : > { %v4136_v45 = vsub.f32 1.0, %v6009_v49  ;;  %v4140_v36 = vmul.f32 %v6009_v49, %v7817_v40  ;;  %v6013_v40 = vld [vmem:[%s7997_s20 + $0x38] sm:$0xff] (%p3526_p3)  }
 0x565   : > { %v4141_v34 = vadd.f32 %v4139_v58, %v4137_v61  ;;  %5541 = vmatprep.subr.bf16.mxu1 (%p3526_p3), %v6013_v40 }
 0x566   : > { %v6011_v44 = vpop.eup %6010  ;;  %5542 = vmatpush3.bf16.msra.mxu1 (%p3526_p3), %v6013_v40  ;;  %5516 = vmatpush3.bf16.msra.mxu0 (%p3526_p3), %v6018_v1 }
 0x567   : > { %4145 = vst [vmem:[#allocation5] sm:$0xff] %v4141_v34  ;;  %v4138_v6 = vmul.f32 %v6011_v44, %v4136_v45  ;;  %5543 = vmatprep.subr.bf16.mxu1 (%p3526_p3), %v6015_v38  ;;  %5517 = vmatprep.subr.bf16.mxu0 (%p3526_p3), %v6020_v54 }
 0x569   : > { %v4142_v33 = vadd.f32 %v4140_v36, %v4138_v6  ;;  %3528 = sbr.rel (!%p3526_p3) target bundleno = 1063 (0x427), region = 145 }
 0x56a   :  { %5544 = vmatpush3.bf16.msra.mxu1 (%p3526_p3), %v6015_v38  ;;  %5518 = vmatpush3.bf16.msra.mxu0 (%p3526_p3), %v6020_v54 }
 0x56b   : > { %4146 = vst [vmem:[#allocation5 + $0x8] sm:$0xff] %v4142_v33  ;;  %v5071_v53 = vpack.c.bf16 %v4142_v33, %v4141_v34  ;;  %5545 = vmatprep.subr.bf16.mxu1 (%p3526_p3), %v6017_v18  ;;  %5519 = vmatprep.subr.bf16.mxu0 (%p3526_p3), %v6022_v24 }
 0x56d   : > { %5072 = vst [vmem:[%s4170_s11] sm:$0xff] %v5071_v53  }
 0x56e   :  { %5546 = vmatpush3.bf16.msra.mxu1 %v6017_v18  ;;  %5520 = vmatpush3.bf16.msra.mxu0 %v6022_v24 }
 0x56f   :  { %5547 = vmatprep.subr.bf16.mxu1 %v6019_v60  ;;  %5521 = vmatprep.subr.bf16.mxu0 %v6024_v50 }
 0x572   :  { %5548 = vmatpush3.bf16.msra.mxu1 %v6019_v60  ;;  %5522 = vmatpush3.bf16.msra.mxu0 %v6024_v50 }
 0x573   :  { %5549 = vmatprep.subr.bf16.mxu1 %v6021_v0  ;;  %5523 = vmatprep.subr.bf16.mxu0 %v6026_v55 }
 0x574   :  { %v6028_v63 = vld [vmem:[#allocation9] sm:$0xff]   ;;  %v6030_v17 = vld [vmem:[#allocation9 + $0x8] sm:$0xff]   ;;  %v6032_v57 = vld [vmem:[#allocation9 + $0x10] sm:$0xff]  }
 0x575   :  { %5525 = vmatprep.mubr.bf16.mxu0 %v6028_v63  ;;  %v6034_v39 = vld [vmem:[#allocation9 + $0x18] sm:$0xff]   ;;  %v6036_v7 = vld [vmem:[#allocation9 + $0x20] sm:$0xff]   ;;  %v6038_v13 = vld [vmem:[#allocation9 + $0x28] sm:$0xff]  }
 0x576   :  { %5550 = vmatpush3.bf16.msra.mxu1 %v6021_v0  ;;  %5524 = vmatpush3.bf16.msra.mxu0 %v6026_v55  ;;  %v6040_v5 = vld [vmem:[#allocation9 + $0x30] sm:$0xff]   ;;  %v6042_v43 = vld [vmem:[#allocation9 + $0x38] sm:$0xff]  }
 0x577   :  { %5551 = vmatprep.subr.bf16.mxu1 %v6023_v4 }
 0x579   :  { %5526 = vmatmul.mubr.bf16.vlgmr.msra.gmra.mxu0 %v6030_v17 }
 0x57a   :  { %5552 = vmatpush3.bf16.msra.mxu1 %v6023_v4  ;;  %5529 = vmatprep.mubr.bf16.mxu0 %v6032_v57 }
 0x57b   :  { %5553 = vmatprep.subr.bf16.mxu1 %v6025_v37 }
 0x57e   :  { %5554 = vmatpush3.bf16.msra.mxu1 %v6025_v37 }
 0x57f   :  { %5555 = vmatprep.subr.bf16.mxu1 %v6027_v15 }
 0x581   :  { %5530 = vmatmul.mubr.bf16.gmra.mxu0 %v6034_v39 }
 0x582   :  { %5556 = vmatpush3.bf16.msra.mxu1 %v6027_v15  ;;  %5533 = vmatprep.mubr.bf16.mxu0 %v6036_v7 }
 0x585   :  { %5558 = vmatmul.mubr.bf16.vlgmr.msra.gmra.mxu1 %v6031_v32 }
 0x586   :  { %5561 = vmatprep.mubr.bf16.mxu1 %v6033_v56 }
 0x589   :  { %5534 = vmatmul.mubr.bf16.gmra.mxu0 %v6038_v13 }
 0x58a   :  { %5537 = vmatprep.mubr.bf16.mxu0 %v6040_v5 }
 0x58d   :  { %5562 = vmatmul.mubr.bf16.gmra.mxu1 %v6035_v21 }
 0x58e   :  { %5565 = vmatprep.mubr.bf16.mxu1 %v6037_v10 }
 0x591   :  { %5538 = vmatmul.mubr.bf16.gmra.mxu0 %v6042_v43 }
 0x595   :  { %5566 = vmatmul.mubr.bf16.gmra.mxu1 %v6039_v42 }
 0x596   :  { %5569 = vmatprep.mubr.bf16.mxu1 %v6041_v51 }
 0x59d   :  { %5570 = vmatmul.mubr.bf16.gmra.mxu1 %v6043_v35 }
 0x639   :  { %v5527_v41 = vpop.f32.mrf.mxu0 }
 0x63b   :  { %v4367_v11 = vpop.f32.mrf.mxu0 }
 0x63d   :  { %v5528_v59 = vpop.f32.mrf.mxu0 }
 0x63f   :  { %v4370_v23 = vpop.f32.mrf.mxu0 }
 0x641   :  { %v5531_v19 = vpop.f32.mrf.mxu0 }
 0x643   :  { %v4383_v14 = vpop.f32.mrf.mxu0 }
 0x645   :  { %v5559_v9 = vpop.f32.mrf.mxu1  ;;  %v5532_v61 = vpop.f32.mrf.mxu0 }
 0x646   :  { %v4569_v26 = vadd.f32 %v5559_v9, %v5527_v41 }
 0x647   :  { %v4560_v47 = vpop.f32.mrf.mxu1  ;;  %v4386_v36 = vpop.f32.mrf.mxu0 }
 0x648   :  { %v4632_v52 = vadd.f32 %v7918_v27, %v4569_v26  ;;  %v4561_v12 = vadd.f32 %v4560_v47, %v4367_v11 }
 0x649   :  { %v5560_v62 = vpop.f32.mrf.mxu1  ;;  %v5535_v3 = vpop.f32.mrf.mxu0 }
 0x64a   :  { %6044 = vtanh.f32 %v4632_v52  ;;  %v4630_v8 = vadd.f32 %v7918_v27, %v4561_v12  ;;  %v4572_v25 = vadd.f32 %v5560_v62, %v5528_v59 }
 0x64b   :  { %v4563_v29 = vpop.f32.mrf.mxu1  ;;  %v4399_v2 = vpop.f32.mrf.mxu0 }
 0x64c   :  { %6046 = vtanh.f32 %v4630_v8  ;;  %v4633_v28 = vadd.f32 %v7918_v27, %v4572_v25  ;;  %v4564_v30 = vadd.f32 %v4563_v29, %v4370_v23 }
 0x64d   :  { %v5563_v31 = vpop.f32.mrf.mxu1  ;;  %v5536_v0 = vpop.f32.mrf.mxu0 }
 0x64e   :  { %6048 = vtanh.f32 %v4633_v28  ;;  %v4631_v46 = vadd.f32 %v7918_v27, %v4564_v30  ;;  %v4585_v16 = vadd.f32 %v5563_v31, %v5531_v19 }
 0x64f   :  { %v4576_v22 = vpop.f32.mrf.mxu1  ;;  %v4402_v50 = vpop.f32.mrf.mxu0 }
 0x650   :  { %6050 = vtanh.f32 %v4631_v46  ;;  %v4636_v49 = vadd.f32 %v7918_v27, %v4585_v16  ;;  %v4577_v58 = vadd.f32 %v4576_v22, %v4383_v14 }
 0x651   :  { %v5564_v34 = vpop.f32.mrf.mxu1  ;;  %v5539_v32 = vpop.f32.mrf.mxu0 }
 0x652   :  { %6052 = vtanh.f32 %v4636_v49  ;;  %v4634_v45 = vadd.f32 %v7918_v27, %v4577_v58  ;;  %v4588_v44 = vadd.f32 %v5564_v34, %v5532_v61 }
 0x653   :  { %v4579_v6 = vpop.f32.mrf.mxu1  ;;  %v4415_v7 = vpop.f32.mrf.mxu0 }
 0x654   :  { %6054 = vtanh.f32 %v4634_v45  ;;  %v4637_v33 = vadd.f32 %v7918_v27, %v4588_v44  ;;  %v4580_v53 = vadd.f32 %v4579_v6, %v4386_v36 }
 0x655   :  { %v5567_v40 = vpop.f32.mrf.mxu1  ;;  %v5540_v51 = vpop.f32.mrf.mxu0 }
 0x656   :  { %6056 = vtanh.f32 %v4637_v33  ;;  %v4635_v20 = vadd.f32 %v7918_v27, %v4580_v53  ;;  %v4601_v38 = vadd.f32 %v5567_v40, %v5535_v3 }
 0x657   :  { %v6045_v18 = vpop.eup %6044  ;;  %v4592_v1 = vpop.f32.mrf.mxu1 }
 0x658   :  { %4664 = vst [vmem:[%s8000_s23 + $0x10] sm:$0xff] %v6045_v18  ;;  %6058 = vtanh.f32 %v4635_v20  ;;  %v4640_v60 = vadd.f32 %v7918_v27, %v4601_v38  ;;  %v4593_v54 = vadd.f32 %v4592_v1, %v4399_v2  ;;  %v4418_v26 = vpop.f32.mrf.mxu0 }
 0x659   :  { %v6047_v24 = vpop.eup %6046  ;;  %v5568_v4 = vpop.f32.mrf.mxu1 }
 0x65a   :  { %4662 = vst [vmem:[%s8000_s23] sm:$0xff] %v6047_v24  ;;  %6060 = vtanh.f32 %v4640_v60  ;;  %v4638_v63 = vadd.f32 %v7918_v27, %v4593_v54  ;;  %v4604_v48 = vadd.f32 %v5568_v4, %v5536_v0 }
 0x65b   :  { %v6049_v37 = vpop.eup %6048  ;;  %v4595_v55 = vpop.f32.mrf.mxu1 }
 0x65c   :  { %4665 = vst [vmem:[%s8000_s23 + $0x18] sm:$0xff] %v6049_v37  ;;  %6062 = vtanh.f32 %v4638_v63  ;;  %v4641_v15 = vadd.f32 %v7918_v27, %v4604_v48  ;;  %v4596_v17 = vadd.f32 %v4595_v55, %v4402_v50 }
 0x65d   :  { %v6051_v57 = vpop.eup %6050  ;;  %v5571_v56 = vpop.f32.mrf.mxu1 }
 0x65e   :  { %4663 = vst [vmem:[%s8000_s23 + $0x8] sm:$0xff] %v6051_v57  ;;  %6064 = vtanh.f32 %v4641_v15  ;;  %v4639_v39 = vadd.f32 %v7918_v27, %v4596_v17  ;;  %v4617_v21 = vadd.f32 %v5571_v56, %v5539_v32 }
 0x65f   :  { %v6053_v10 = vpop.eup %6052  ;;  %v4608_v13 = vpop.f32.mrf.mxu1 }
 0x660   :  { %4668 = vst [vmem:[%s8000_s23 + $0x30] sm:$0xff] %v6053_v10  ;;  %6066 = vtanh.f32 %v4639_v39  ;;  %v4644_v42 = vadd.f32 %v7918_v27, %v4617_v21  ;;  %v4609_v5 = vadd.f32 %v4608_v13, %v4415_v7 }
 0x661   :  { %v6055_v43 = vpop.eup %6054  ;;  %v5572_v35 = vpop.f32.mrf.mxu1 }
 0x662   :  { %4666 = vst [vmem:[%s8000_s23 + $0x20] sm:$0xff] %v6055_v43  ;;  %6068 = vtanh.f32 %v4644_v42  ;;  %v4642_v41 = vadd.f32 %v7918_v27, %v4609_v5  ;;  %v4620_v9 = vadd.f32 %v5572_v35, %v5540_v51 }
 0x663   :  { %v6057_v11 = vpop.eup %6056  ;;  %v4611_v47 = vpop.f32.mrf.mxu1 }
 0x664   :  { %4669 = vst [vmem:[%s8000_s23 + $0x38] sm:$0xff] %v6057_v11  ;;  %6070 = vtanh.f32 %v4642_v41  ;;  %v4645_v52 = vadd.f32 %v7918_v27, %v4620_v9  ;;  %v4612_v12 = vadd.f32 %v4611_v47, %v4418_v26 }
 0x665   :  { %v6059_v59 = vpop.eup %6058 }
 0x666   :  { %4667 = vst [vmem:[%s8000_s23 + $0x28] sm:$0xff] %v6059_v59  ;;  %6072 = vtanh.f32 %v4645_v52  ;;  %v4643_v62 = vadd.f32 %v7918_v27, %v4612_v12 }
 0x667   :  { %v6061_v8 = vpop.eup %6060 }
 0x668   :  { %4672 = vst [vmem:[%s8000_s23 + $0x50] sm:$0xff] %v6061_v8  ;;  %6074 = vtanh.f32 %v4643_v62 }
 0x669   :  { %v6063_v25 = vpop.eup %6062 }
 0x66a   :  { %4670 = vst [vmem:[%s8000_s23 + $0x40] sm:$0xff] %v6063_v25 }
 0x66b   :  { %v6065_v23 = vpop.eup %6064 }
 0x66c   :  { %4673 = vst [vmem:[%s8000_s23 + $0x58] sm:$0xff] %v6065_v23 }
 0x66d   :  { %v6067_v29 = vpop.eup %6066 }
 0x66e   :  { %4671 = vst [vmem:[%s8000_s23 + $0x48] sm:$0xff] %v6067_v29 }
 0x66f   :  { %v6069_v27 = vpop.eup %6068 }
 0x670   :  { %4676 = vst [vmem:[%s8000_s23 + $0x70] sm:$0xff] %v6069_v27 }
 0x671   :  { %v6071_v28 = vpop.eup %6070 }
 0x672   :  { %4674 = vst [vmem:[%s8000_s23 + $0x60] sm:$0xff] %v6071_v28 }
 0x673   :  { %v6073_v30 = vpop.eup %6072 }
 0x674   :  { %4677 = vst [vmem:[%s8000_s23 + $0x78] sm:$0xff] %v6073_v30 }
 0x675   :  { %v6075_v19 = vpop.eup %6074 }
 0x676   :  { %4675 = vst [vmem:[%s8000_s23 + $0x68] sm:$0xff] %v6075_v19 }

</bundles_post_ra>
